<compile_context>
chip_gen: v7x
topology: tpu7x:2x2x1
jax: 0.10.0
libtpu: 0.0.40
codegen_flags: <defaults>
</compile_context>

<pallas_src>
import jax
import jax.numpy as jnp
from jax.experimental import pallas as pl
from jax.experimental.pallas import tpu as pltpu

# ----------------------------- model config ---------------------------------
EMBEDDING_DIM = 128   # (256 in the original; lane-aligned demo size)
HIDDEN_DIM = 128      # (512 in the original; 128 keeps gate slices vreg-aligned)
NUM_LAYERS = 2
INPUT_DIM = 50        # question vocab size (synthetic)
OUTPUT_DIM = 40       # answer vocab size (synthetic)
V_PAD = 128           # vocab padded to a full lane tile for lane-dense stores
DROPOUT = 0.3         # TODO(synk): nn.LSTM inter-layer dropout is train-mode
                      # only; this is the eval-mode forward, so dropout == id.
_SUBLANE = 8          # f32 sublane tile; batch is padded to a multiple of this


# --------------------------- shared in-kernel math ---------------------------
def _lstm_gates(x, h, c, wih, whh, b):
    """One LSTM cell update. wih:[in,4H] whh:[H,4H] b:[1,4H], gates i,f,g,o."""
    gates = (jnp.dot(x, wih, preferred_element_type=jnp.float32)
             + jnp.dot(h, whh, preferred_element_type=jnp.float32) + b)
    H = h.shape[-1]                      # H=128 -> every slice is lane-aligned
    i_g = jax.nn.sigmoid(gates[:, 0 * H:1 * H])
    f_g = jax.nn.sigmoid(gates[:, 1 * H:2 * H])
    g_g = jnp.tanh(gates[:, 2 * H:3 * H])
    o_g = jax.nn.sigmoid(gates[:, 3 * H:4 * H])
    c_new = f_g * c + i_g * g_g
    h_new = o_g * jnp.tanh(c_new)
    return h_new, c_new


# ------------------------------ encoder kernel --------------------------------
def _encoder_seq_kernel(x_ref,                       # [Bp, E]   (timestep t)
                        wih0, whh0, b0, wih1, whh1, b1,
                        h_out, c_out):               # [L, Bp, H] resident state
    t = pl.program_id(0)

    @pl.when(t == 0)
    def _():
        h_out[...] = jnp.zeros_like(h_out)
        c_out[...] = jnp.zeros_like(c_out)

    x = x_ref[...]
    for l, (wih, whh, b) in enumerate(((wih0, whh0, b0), (wih1, whh1, b1))):
        h_new, c_new = _lstm_gates(x, h_out[l], c_out[l],
                                   wih[...], whh[...], b[...])
        h_out[l] = h_new
        c_out[l] = c_new
        x = h_new


def encoder_forward(params, x_seq):
    """x_seq: f32 [T_src, Bp, E] -> (hidden, cell), each [NUM_LAYERS, Bp, H]."""
    T, Bp, E = x_seq.shape
    H = HIDDEN_DIM
    state = jax.ShapeDtypeStruct((NUM_LAYERS, Bp, H), jnp.float32)

    def const(shape):
        return pl.BlockSpec(shape, lambda t: tuple(0 for _ in shape))

    return pl.pallas_call(
        _encoder_seq_kernel,
        out_shape=(state, state),
        grid_spec=pltpu.PrefetchScalarGridSpec(
            num_scalar_prefetch=0,
            grid=(T,),
            in_specs=[
                pl.BlockSpec((None, Bp, E), lambda t: (t, 0, 0)),   # x at step t
                const((E, 4 * H)), const((H, 4 * H)), const((1, 4 * H)),
                const((H, 4 * H)), const((H, 4 * H)), const((1, 4 * H)),
            ],
            out_specs=(
                pl.BlockSpec((NUM_LAYERS, Bp, H), lambda t: (0, 0, 0)),
                pl.BlockSpec((NUM_LAYERS, Bp, H), lambda t: (0, 0, 0)),
            ),
        ),
        compiler_params=pltpu.CompilerParams(
            dimension_semantics=("arbitrary",)),      # time is a serial recurrence
    )(x_seq,
      params["enc_wih_0"], params["enc_whh_0"], params["enc_b_0"],
      params["enc_wih_1"], params["enc_whh_1"], params["enc_b_1"])


# ------------------------------ decoder kernel --------------------------------
def _decoder_seq_kernel(tf_ref,                      # SMEM int32 [T_trg]
                        x0_ref,                      # [Bp, E]  initial input emb
                        teach_ref,                   # [Bp, E]  emb(trg[:, s+1])
                        h0_ref, c0_ref,              # [L, Bp, H] encoder state
                        wih0, whh0, b0, wih1, whh1, b1,
                        fcw_ref, fcb_ref,            # [H, V_PAD], [1, V_PAD]
                        emb_ref,                     # [V_PAD, E] decoder emb table
                        out_ref,                     # [Bp, V_PAD] log-probs @ t=s+1
                        h_st, c_st, x_st):           # VMEM scratch (carried state)
    s = pl.program_id(0)

    @pl.when(s == 0)
    def _():
        h_st[...] = h0_ref[...]
        c_st[...] = c0_ref[...]
        x_st[...] = x0_ref[...]

    x = x_st[...]
    for l, (wih, whh, b) in enumerate(((wih0, whh0, b0), (wih1, whh1, b1))):
        h_new, c_new = _lstm_gates(x, h_st[l], c_st[l],
                                   wih[...], whh[...], b[...])
        h_st[l] = h_new
        c_st[l] = c_new
        x = h_new

    # fc + log-softmax on the padded (lane-dense) vocab; padded bias = -1e30
    logits = (jnp.dot(x, fcw_ref[...], preferred_element_type=jnp.float32)
              + fcb_ref[...])
    m = jnp.max(logits, axis=-1, keepdims=True)
    z = logits - m
    lse = jnp.log(jnp.sum(jnp.exp(z), axis=-1, keepdims=True))
    out_ref[...] = z - lse

    # Next decoder input: teacher forcing vs greedy argmax (first occurrence),
    # embedding gathered in-kernel via one-hot @ table (MXU).
    lanes = jax.lax.broadcasted_iota(jnp.int32, logits.shape, 1)
    idx = jnp.min(jnp.where(logits >= m, lanes, logits.shape[-1]),
                  axis=-1, keepdims=True)
    onehot = (lanes == idx).astype(jnp.float32)
    greedy_emb = jnp.dot(onehot, emb_ref[...], preferred_element_type=jnp.float32)
    tf_f = (tf_ref[s + 1] > 0).astype(jnp.float32)   # scalar per step, as in torch
    x_st[...] = tf_f * teach_ref[...] + (1.0 - tf_f) * greedy_emb


def decoder_forward(params, tf_mask, x0, teacher_emb, h0, c0):
    """Runs the full autoregressive decoder; returns [T_trg-1, Bp, V_PAD]."""
    Tm1, Bp, E = teacher_emb.shape
    H = HIDDEN_DIM

    def const(shape):
        return pl.BlockSpec(shape, lambda s, tf: tuple(0 for _ in shape))

    return pl.pallas_call(
        _decoder_seq_kernel,
        out_shape=jax.ShapeDtypeStruct((Tm1, Bp, V_PAD), jnp.float32),
        grid_spec=pltpu.PrefetchScalarGridSpec(
            num_scalar_prefetch=1,                    # tf_mask -> SMEM
            grid=(Tm1,),
            in_specs=[
                const((Bp, E)),                                        # x0
                pl.BlockSpec((None, Bp, E), lambda s, tf: (s, 0, 0)),  # emb(trg[:,s+1])
                const((NUM_LAYERS, Bp, H)), const((NUM_LAYERS, Bp, H)),
                const((E, 4 * H)), const((H, 4 * H)), const((1, 4 * H)),
                const((H, 4 * H)), const((H, 4 * H)), const((1, 4 * H)),
                const((H, V_PAD)), const((1, V_PAD)),
                const((V_PAD, E)),
            ],
            out_specs=pl.BlockSpec((None, Bp, V_PAD), lambda s, tf: (s, 0, 0)),
            scratch_shapes=[
                pltpu.VMEM((NUM_LAYERS, Bp, H), jnp.float32),   # h state
                pltpu.VMEM((NUM_LAYERS, Bp, H), jnp.float32),   # c state
                pltpu.VMEM((Bp, E), jnp.float32),               # carried input emb
            ],
        ),
        compiler_params=pltpu.CompilerParams(
            dimension_semantics=("arbitrary",)),
    )(tf_mask, x0, teacher_emb, h0, c0,
      params["dec_wih_0"], params["dec_whh_0"], params["dec_b_0"],
      params["dec_wih_1"], params["dec_whh_1"], params["dec_b_1"],
      params["fc_w_t"], params["fc_b"], params["dec_emb"])


# ------------------------------ parameters -----------------------------------
def init_params(key):
    params = {}
    k = iter(jax.random.split(key, 32))

    def uniform(rng, shape, bound):
        return jax.random.uniform(rng, shape, jnp.float32, -bound, bound)

    inv_sqrt_h = 1.0 / (HIDDEN_DIM ** 0.5)

    # embeddings (PyTorch default: N(0,1)); decoder table padded to V_PAD rows
    params["enc_emb"] = jax.random.normal(next(k), (INPUT_DIM, EMBEDDING_DIM),
                                          jnp.float32)
    dec_emb = jnp.zeros((V_PAD, EMBEDDING_DIM), jnp.float32)
    params["dec_emb"] = dec_emb.at[:OUTPUT_DIM].set(
        jax.random.normal(next(k), (OUTPUT_DIM, EMBEDDING_DIM), jnp.float32))

    for prefix in ("enc", "dec"):
        for l in range(NUM_LAYERS):
            layer_in = EMBEDDING_DIM if l == 0 else HIDDEN_DIM
            w_ih = uniform(next(k), (4 * HIDDEN_DIM, layer_in), inv_sqrt_h)
            w_hh = uniform(next(k), (4 * HIDDEN_DIM, HIDDEN_DIM), inv_sqrt_h)
            b_ih = uniform(next(k), (4 * HIDDEN_DIM,), inv_sqrt_h)
            b_hh = uniform(next(k), (4 * HIDDEN_DIM,), inv_sqrt_h)
            params[f"{prefix}_wih_{l}"] = w_ih.T                 # [in, 4H]
            params[f"{prefix}_whh_{l}"] = w_hh.T                 # [H, 4H]
            params[f"{prefix}_b_{l}"] = (b_ih + b_hh)[None, :]   # [1, 4H]

    # decoder fc, padded to V_PAD lanes; padded logits forced to ~-inf via bias
    fc_w = uniform(next(k), (OUTPUT_DIM, HIDDEN_DIM), inv_sqrt_h)
    fc_b = uniform(next(k), (OUTPUT_DIM,), inv_sqrt_h)
    params["fc_w_t"] = jnp.zeros((HIDDEN_DIM, V_PAD),
                                 jnp.float32).at[:, :OUTPUT_DIM].set(fc_w.T)
    params["fc_b"] = jnp.full((V_PAD,), -1e30,
                              jnp.float32).at[:OUTPUT_DIM].set(fc_b)[None, :]
    return params


# ------------------------------ full forward ---------------------------------
def _teacher_force_mask(rng, trg_len, teacher_forcing_ratio):
    # torch.rand(1).item() < ratio, one independent draw per decoder step
    draws = jax.random.uniform(rng, (trg_len,))
    return (draws < teacher_forcing_ratio).astype(jnp.int32)


def _seq2seq_forward(params, src, trg, teacher_forcing_ratio, rng):
    """Mirrors Seq2Seq.forward: returns [B, T_trg, OUTPUT_DIM] (row 0 zeros)."""
    B, _ = src.shape
    _, trg_len = trg.shape
    Bp = max(_SUBLANE, ((B + _SUBLANE - 1) // _SUBLANE) * _SUBLANE)
    pad = Bp - B
    src_p = jnp.pad(src, ((0, pad), (0, 0)))
    trg_p = jnp.pad(trg, ((0, pad), (0, 0)))

    # Encoder: single gather for embeddings, then one fused sequence kernel.
    x_seq = jnp.transpose(params["enc_emb"][src_p], (1, 0, 2))    # [T_src, Bp, E]
    h_enc, c_enc = encoder_forward(params, x_seq)                 # [L, Bp, H] x2

    # Decoder: precompute teacher-forced embeddings and the per-step TF mask.
    tf_mask = _teacher_force_mask(rng, trg_len, teacher_forcing_ratio)
    emb_trg = jnp.transpose(params["dec_emb"][trg_p], (1, 0, 2))  # [T_trg, Bp, E]
    x0 = emb_trg[0]                                               # emb(trg[:, 0])
    teacher_emb = emb_trg[1:]                                     # [T_trg-1, Bp, E]
    dec_out = decoder_forward(params, tf_mask, x0, teacher_emb, h_enc, c_enc)

    out = jnp.transpose(dec_out, (1, 0, 2))[:B, :, :OUTPUT_DIM]   # [B, T-1, V]
    zeros0 = jnp.zeros((B, 1, OUTPUT_DIM), jnp.float32)
    return jnp.concatenate([zeros0, out], axis=1)


seq2seq_forward = jax.jit(_seq2seq_forward)


# --------------------------- pure-JAX reference --------------------------------
def _ref_lstm_cell(x, h, c, wih, whh, b):
    hp = jax.lax.Precision.HIGHEST
    gates = (jnp.dot(x, wih, precision=hp) + jnp.dot(h, whh, precision=hp) + b)
    H = h.shape[-1]
    i_g = jax.nn.sigmoid(gates[:, 0 * H:1 * H])
    f_g = jax.nn.sigmoid(gates[:, 1 * H:2 * H])
    g_g = jnp.tanh(gates[:, 2 * H:3 * H])
    o_g = jax.nn.sigmoid(gates[:, 3 * H:4 * H])
    c_new = f_g * c + i_g * g_g
    return o_g * jnp.tanh(c_new), c_new


def reference_forward(params, src, trg, tf_mask):
    """Plain-JAX replica of Seq2Seq.forward for a fixed teacher-force mask."""
    B, src_len = src.shape
    _, trg_len = trg.shape
    hs = [jnp.zeros((B, HIDDEN_DIM), jnp.float32) for _ in range(NUM_LAYERS)]
    cs = [jnp.zeros((B, HIDDEN_DIM), jnp.float32) for _ in range(NUM_LAYERS)]
    x_seq = params["enc_emb"][src]
    for t in range(src_len):
        x = x_seq[:, t]
        for l in range(NUM_LAYERS):
            hs[l], cs[l] = _ref_lstm_cell(x, hs[l], cs[l],
                                          params[f"enc_wih_{l}"],
                                          params[f"enc_whh_{l}"],
                                          params[f"enc_b_{l}"])
            x = hs[l]
    outputs = jnp.zeros((B, trg_len, OUTPUT_DIM), jnp.float32)
    inp = trg[:, 0]
    for t in range(1, trg_len):
        x = params["dec_emb"][inp]
        for l in range(NUM_LAYERS):
            hs[l], cs[l] = _ref_lstm_cell(x, hs[l], cs[l],
                                          params[f"dec_wih_{l}"],
                                          params[f"dec_whh_{l}"],
                                          params[f"dec_b_{l}"])
            x = hs[l]
        logits = (jnp.dot(x, params["fc_w_t"][:, :OUTPUT_DIM],
                          precision=jax.lax.Precision.HIGHEST)
                  + params["fc_b"][:, :OUTPUT_DIM])
        logp = jax.nn.log_softmax(logits, axis=-1)
        outputs = outputs.at[:, t].set(logp)
        inp = jnp.where(tf_mask[t] > 0, trg[:, t],
                        jnp.argmax(logp, axis=1).astype(trg.dtype))
    return outputs


# --------------------------------- main ---------------------------------------
if __name__ == "__main__":
    assert NUM_LAYERS == 2  # kernels unroll exactly two stacked LSTM layers

    key = jax.random.PRNGKey(0)
    k_param, k_src, k_trg, k_tf = jax.random.split(key, 4)

    params = init_params(k_param)

    BATCH = 2
    SRC_LEN = 8
    TRG_LEN = 8
    src = jax.random.randint(k_src, (BATCH, SRC_LEN), 0, INPUT_DIM, jnp.int32)
    trg = jax.random.randint(k_trg, (BATCH, TRG_LEN), 0, OUTPUT_DIM, jnp.int32)

    # Stochastic teacher-forcing path (mirrors the PyTorch forward).
    out = seq2seq_forward(params, src, trg, 0.5, k_tf)
    out = jax.block_until_ready(out)
    assert out.shape == (BATCH, TRG_LEN, OUTPUT_DIM)
    assert bool(jnp.all(out[:, 0] == 0.0))                 # t=0 row is zeros
    probs_sum = jnp.sum(jnp.exp(out[:, 1:]), axis=-1)      # rows are log-probs
    assert bool(jnp.all(jnp.abs(probs_sum - 1.0) < 1e-3))

    # Fully teacher-forced path checked against the pure-JAX reference
    # (loose tolerance: MXU f32 matmul pass precision differs from XLA dot).
    out_tf = jax.block_until_ready(seq2seq_forward(params, src, trg, 1.0, k_tf))
    ref_tf = reference_forward(params, src, trg, jnp.ones((TRG_LEN,), jnp.int32))
    max_err = float(jnp.max(jnp.abs(out_tf - ref_tf)))
    assert max_err < 5e-2, f"max abs err vs reference: {max_err}"

    print("KERNEL_OK")
</pallas_src>

<mosaic_0001>
module attributes {stable_mosaic.version = 11 : i64} {
  func.func @_encoder_seq_kernel(%arg0: i32, %arg1: memref<1x8x128xf32, #tpu.memory_space<vmem>>, %arg2: memref<128x512xf32, #tpu.memory_space<vmem>>, %arg3: memref<128x512xf32, #tpu.memory_space<vmem>>, %arg4: memref<1x512xf32, #tpu.memory_space<vmem>>, %arg5: memref<128x512xf32, #tpu.memory_space<vmem>>, %arg6: memref<128x512xf32, #tpu.memory_space<vmem>>, %arg7: memref<1x512xf32, #tpu.memory_space<vmem>>, %arg8: memref<2x8x128xf32, #tpu.memory_space<vmem>>, %arg9: memref<2x8x128xf32, #tpu.memory_space<vmem>>) attributes {dimension_semantics = [#tpu.dimension_semantics<arbitrary>], iteration_bounds = array<i64: 8>, scalar_prefetch = 0 : i64, scratch_operands = 0 : i64, tpu.core_type = #tpu.core_type<tc>, window_params = [{transform_indices = @transform_0, window_bounds = array<i64: 1, 8, 128>}, {pipeline_mode = #tpu.pipeline_mode<synchronous>, transform_indices = @transform_1, window_bounds = array<i64: 128, 512>}, {pipeline_mode = #tpu.pipeline_mode<synchronous>, transform_indices = @transform_2, window_bounds = array<i64: 128, 512>}, {pipeline_mode = #tpu.pipeline_mode<synchronous>, transform_indices = @transform_3, window_bounds = array<i64: 1, 512>}, {pipeline_mode = #tpu.pipeline_mode<synchronous>, transform_indices = @transform_4, window_bounds = array<i64: 128, 512>}, {pipeline_mode = #tpu.pipeline_mode<synchronous>, transform_indices = @transform_5, window_bounds = array<i64: 128, 512>}, {pipeline_mode = #tpu.pipeline_mode<synchronous>, transform_indices = @transform_6, window_bounds = array<i64: 1, 512>}, {pipeline_mode = #tpu.pipeline_mode<synchronous>, transform_indices = @transform_7, window_bounds = array<i64: 2, 8, 128>}, {pipeline_mode = #tpu.pipeline_mode<synchronous>, transform_indices = @transform_8, window_bounds = array<i64: 2, 8, 128>}]} {
    %c0_i32 = arith.constant 0 : i32
    %0 = arith.cmpi eq, %arg0, %c0_i32 : i32
    %1 = arith.extui %0 : i1 to i32
    %c0_i32_0 = arith.constant 0 : i32
    %2 = arith.cmpi ne, %1, %c0_i32_0 : i32
    scf.if %2 {
      %cst_47 = arith.constant 0.000000e+00 : f32
      %91 = vector.broadcast %cst_47 : f32 to vector<2x8x128xf32>
      %c0_48 = arith.constant 0 : index
      %c0_49 = arith.constant 0 : index
      %c0_50 = arith.constant 0 : index
      %92 = vector.load %arg8[%c0_48, %c0_49, %c0_50] : memref<2x8x128xf32, #tpu.memory_space<vmem>>, vector<2x8x128xf32>
      tpu.vector_store %arg8[%c0_48, %c0_49, %c0_50], %91 {strides = array<i32>} : memref<2x8x128xf32, #tpu.memory_space<vmem>>, vector<2x8x128xf32>,
      %cst_51 = arith.constant 0.000000e+00 : f32
      %93 = vector.broadcast %cst_51 : f32 to vector<2x8x128xf32>
      %c0_52 = arith.constant 0 : index
      %c0_53 = arith.constant 0 : index
      %c0_54 = arith.constant 0 : index
      %94 = vector.load %arg9[%c0_52, %c0_53, %c0_54] : memref<2x8x128xf32, #tpu.memory_space<vmem>>, vector<2x8x128xf32>
      tpu.vector_store %arg9[%c0_52, %c0_53, %c0_54], %93 {strides = array<i32>} : memref<2x8x128xf32, #tpu.memory_space<vmem>>, vector<2x8x128xf32>,
    } else {
    }
    %c0 = arith.constant 0 : index
    %c0_1 = arith.constant 0 : index
    %c0_2 = arith.constant 0 : index
    %3 = vector.load %arg1[%c0, %c0_1, %c0_2] : memref<1x8x128xf32, #tpu.memory_space<vmem>>, vector<1x8x128xf32>
    %4 = vector.shape_cast %3 : vector<1x8x128xf32> to vector<8x128xf32>
    %c0_3 = arith.constant 0 : index
    %c0_4 = arith.constant 0 : index
    %c0_5 = arith.constant 0 : index
    %5 = vector.load %arg8[%c0_3, %c0_4, %c0_5] : memref<2x8x128xf32, #tpu.memory_space<vmem>>, vector<1x8x128xf32>
    %6 = vector.shape_cast %5 : vector<1x8x128xf32> to vector<8x128xf32>
    %c0_6 = arith.constant 0 : index
    %c0_7 = arith.constant 0 : index
    %c0_8 = arith.constant 0 : index
    %7 = vector.load %arg9[%c0_6, %c0_7, %c0_8] : memref<2x8x128xf32, #tpu.memory_space<vmem>>, vector<1x8x128xf32>
    %8 = vector.shape_cast %7 : vector<1x8x128xf32> to vector<8x128xf32>
    %c0_9 = arith.constant 0 : index
    %c0_10 = arith.constant 0 : index
    %9 = vector.load %arg2[%c0_9, %c0_10] : memref<128x512xf32, #tpu.memory_space<vmem>>, vector<128x512xf32>
    %c0_11 = arith.constant 0 : index
    %c0_12 = arith.constant 0 : index
    %10 = vector.load %arg3[%c0_11, %c0_12] : memref<128x512xf32, #tpu.memory_space<vmem>>, vector<128x512xf32>
    %c0_13 = arith.constant 0 : index
    %c0_14 = arith.constant 0 : index
    %11 = vector.load %arg4[%c0_13, %c0_14] : memref<1x512xf32, #tpu.memory_space<vmem>>, vector<1x512xf32>
    %cst = arith.constant dense<0.000000e+00> : vector<8x512xf32>
    %12 = tpu.matmul %4, %9, %cst {dimension_numbers = #tpu.dot_dimension_numbers<[1], [0], [0], [1], [0, 0, 1, 1], [], []>} : vector<8x128xf32>, vector<128x512xf32>, vector<8x512xf32> -> vector<8x512xf32>
    %cst_15 = arith.constant dense<0.000000e+00> : vector<8x512xf32>
    %13 = tpu.matmul %6, %10, %cst_15 {dimension_numbers = #tpu.dot_dimension_numbers<[1], [0], [0], [1], [0, 0, 1, 1], [], []>} : vector<8x128xf32>, vector<128x512xf32>, vector<8x512xf32> -> vector<8x512xf32>
    %14 = arith.addf %12, %13 : vector<8x512xf32>
    %15 = vector.broadcast %11 : vector<1x512xf32> to vector<8x512xf32>
    %16 = arith.addf %14, %15 : vector<8x512xf32>
    %17 = vector.extract_strided_slice %16 {offsets = [0, 0], sizes = [8, 128], strides = [1, 1]} : vector<8x512xf32> to vector<8x128xf32>
    %18 = arith.negf %17 : vector<8x128xf32>
    %19 = math.exp %18 : vector<8x128xf32>
    %cst_16 = arith.constant 1.000000e+00 : f32
    %20 = vector.broadcast %cst_16 : f32 to vector<8x128xf32>
    %21 = arith.addf %20, %19 : vector<8x128xf32>
    %22 = arith.divf %20, %21 : vector<8x128xf32>
    %23 = vector.extract_strided_slice %16 {offsets = [0, 128], sizes = [8, 128], strides = [1, 1]} : vector<8x512xf32> to vector<8x128xf32>
    %24 = arith.negf %23 : vector<8x128xf32>
    %25 = math.exp %24 : vector<8x128xf32>
    %cst_17 = arith.constant 1.000000e+00 : f32
    %26 = vector.broadcast %cst_17 : f32 to vector<8x128xf32>
    %27 = arith.addf %26, %25 : vector<8x128xf32>
    %28 = arith.divf %26, %27 : vector<8x128xf32>
    %29 = vector.extract_strided_slice %16 {offsets = [0, 256], sizes = [8, 128], strides = [1, 1]} : vector<8x512xf32> to vector<8x128xf32>
    %30 = math.tanh %29 : vector<8x128xf32>
    %31 = vector.extract_strided_slice %16 {offsets = [0, 384], sizes = [8, 128], strides = [1, 1]} : vector<8x512xf32> to vector<8x128xf32>
    %32 = arith.negf %31 : vector<8x128xf32>
    %33 = math.exp %32 : vector<8x128xf32>
    %cst_18 = arith.constant 1.000000e+00 : f32
    %34 = vector.broadcast %cst_18 : f32 to vector<8x128xf32>
    %35 = arith.addf %34, %33 : vector<8x128xf32>
    %36 = arith.divf %34, %35 : vector<8x128xf32>
    %37 = arith.mulf %28, %8 : vector<8x128xf32>
    %38 = arith.mulf %22, %30 : vector<8x128xf32>
    %39 = arith.addf %37, %38 : vector<8x128xf32>
    %40 = math.tanh %39 : vector<8x128xf32>
    %41 = arith.mulf %36, %40 : vector<8x128xf32>
    %c0_19 = arith.constant 0 : index
    %c0_20 = arith.constant 0 : index
    %c0_21 = arith.constant 0 : index
    %42 = vector.load %arg8[%c0_19, %c0_20, %c0_21] : memref<2x8x128xf32, #tpu.memory_space<vmem>>, vector<1x8x128xf32>
    %43 = vector.shape_cast %42 : vector<1x8x128xf32> to vector<8x128xf32>
    %44 = vector.shape_cast %41 : vector<8x128xf32> to vector<1x8x128xf32>
    tpu.vector_store %arg8[%c0_19, %c0_20, %c0_21], %44 {strides = array<i32>} : memref<2x8x128xf32, #tpu.memory_space<vmem>>, vector<1x8x128xf32>,
    %c0_22 = arith.constant 0 : index
    %c0_23 = arith.constant 0 : index
    %c0_24 = arith.constant 0 : index
    %45 = vector.load %arg9[%c0_22, %c0_23, %c0_24] : memref<2x8x128xf32, #tpu.memory_space<vmem>>, vector<1x8x128xf32>
    %46 = vector.shape_cast %45 : vector<1x8x128xf32> to vector<8x128xf32>
    %47 = vector.shape_cast %39 : vector<8x128xf32> to vector<1x8x128xf32>
    tpu.vector_store %arg9[%c0_22, %c0_23, %c0_24], %47 {strides = array<i32>} : memref<2x8x128xf32, #tpu.memory_space<vmem>>, vector<1x8x128xf32>,
    %c1 = arith.constant 1 : index
    %c0_25 = arith.constant 0 : index
    %c0_26 = arith.constant 0 : index
    %48 = vector.load %arg8[%c1, %c0_25, %c0_26] : memref<2x8x128xf32, #tpu.memory_space<vmem>>, vector<1x8x128xf32>
    %49 = vector.shape_cast %48 : vector<1x8x128xf32> to vector<8x128xf32>
    %c1_27 = arith.constant 1 : index
    %c0_28 = arith.constant 0 : index
    %c0_29 = arith.constant 0 : index
    %50 = vector.load %arg9[%c1_27, %c0_28, %c0_29] : memref<2x8x128xf32, #tpu.memory_space<vmem>>, vector<1x8x128xf32>
    %51 = vector.shape_cast %50 : vector<1x8x128xf32> to vector<8x128xf32>
    %c0_30 = arith.constant 0 : index
    %c0_31 = arith.constant 0 : index
    %52 = vector.load %arg5[%c0_30, %c0_31] : memref<128x512xf32, #tpu.memory_space<vmem>>, vector<128x512xf32>
    %c0_32 = arith.constant 0 : index
    %c0_33 = arith.constant 0 : index
    %53 = vector.load %arg6[%c0_32, %c0_33] : memref<128x512xf32, #tpu.memory_space<vmem>>, vector<128x512xf32>
    %c0_34 = arith.constant 0 : index
    %c0_35 = arith.constant 0 : index
    %54 = vector.load %arg7[%c0_34, %c0_35] : memref<1x512xf32, #tpu.memory_space<vmem>>, vector<1x512xf32>
    %cst_36 = arith.constant dense<0.000000e+00> : vector<8x512xf32>
    %55 = tpu.matmul %41, %52, %cst_36 {dimension_numbers = #tpu.dot_dimension_numbers<[1], [0], [0], [1], [0, 0, 1, 1], [], []>} : vector<8x128xf32>, vector<128x512xf32>, vector<8x512xf32> -> vector<8x512xf32>
    %cst_37 = arith.constant dense<0.000000e+00> : vector<8x512xf32>
    %56 = tpu.matmul %49, %53, %cst_37 {dimension_numbers = #tpu.dot_dimension_numbers<[1], [0], [0], [1], [0, 0, 1, 1], [], []>} : vector<8x128xf32>, vector<128x512xf32>, vector<8x512xf32> -> vector<8x512xf32>
    %57 = arith.addf %55, %56 : vector<8x512xf32>
    %58 = vector.broadcast %54 : vector<1x512xf32> to vector<8x512xf32>
    %59 = arith.addf %57, %58 : vector<8x512xf32>
    %60 = vector.extract_strided_slice %59 {offsets = [0, 0], sizes = [8, 128], strides = [1, 1]} : vector<8x512xf32> to vector<8x128xf32>
    %61 = arith.negf %60 : vector<8x128xf32>
    %62 = math.exp %61 : vector<8x128xf32>
    %cst_38 = arith.constant 1.000000e+00 : f32
    %63 = vector.broadcast %cst_38 : f32 to vector<8x128xf32>
    %64 = arith.addf %63, %62 : vector<8x128xf32>
    %65 = arith.divf %63, %64 : vector<8x128xf32>
    %66 = vector.extract_strided_slice %59 {offsets = [0, 128], sizes = [8, 128], strides = [1, 1]} : vector<8x512xf32> to vector<8x128xf32>
    %67 = arith.negf %66 : vector<8x128xf32>
    %68 = math.exp %67 : vector<8x128xf32>
    %cst_39 = arith.constant 1.000000e+00 : f32
    %69 = vector.broadcast %cst_39 : f32 to vector<8x128xf32>
    %70 = arith.addf %69, %68 : vector<8x128xf32>
    %71 = arith.divf %69, %70 : vector<8x128xf32>
    %72 = vector.extract_strided_slice %59 {offsets = [0, 256], sizes = [8, 128], strides = [1, 1]} : vector<8x512xf32> to vector<8x128xf32>
    %73 = math.tanh %72 : vector<8x128xf32>
    %74 = vector.extract_strided_slice %59 {offsets = [0, 384], sizes = [8, 128], strides = [1, 1]} : vector<8x512xf32> to vector<8x128xf32>
    %75 = arith.negf %74 : vector<8x128xf32>
    %76 = math.exp %75 : vector<8x128xf32>
    %cst_40 = arith.constant 1.000000e+00 : f32
    %77 = vector.broadcast %cst_40 : f32 to vector<8x128xf32>
    %78 = arith.addf %77, %76 : vector<8x128xf32>
    %79 = arith.divf %77, %78 : vector<8x128xf32>
    %80 = arith.mulf %71, %51 : vector<8x128xf32>
    %81 = arith.mulf %65, %73 : vector<8x128xf32>
    %82 = arith.addf %80, %81 : vector<8x128xf32>
    %83 = math.tanh %82 : vector<8x128xf32>
    %84 = arith.mulf %79, %83 : vector<8x128xf32>
    %c1_41 = arith.constant 1 : index
    %c0_42 = arith.constant 0 : index
    %c0_43 = arith.constant 0 : index
    %85 = vector.load %arg8[%c1_41, %c0_42, %c0_43] : memref<2x8x128xf32, #tpu.memory_space<vmem>>, vector<1x8x128xf32>
    %86 = vector.shape_cast %85 : vector<1x8x128xf32> to vector<8x128xf32>
    %87 = vector.shape_cast %84 : vector<8x128xf32> to vector<1x8x128xf32>
    tpu.vector_store %arg8[%c1_41, %c0_42, %c0_43], %87 {strides = array<i32>} : memref<2x8x128xf32, #tpu.memory_space<vmem>>, vector<1x8x128xf32>,
    %c1_44 = arith.constant 1 : index
    %c0_45 = arith.constant 0 : index
    %c0_46 = arith.constant 0 : index
    %88 = vector.load %arg9[%c1_44, %c0_45, %c0_46] : memref<2x8x128xf32, #tpu.memory_space<vmem>>, vector<1x8x128xf32>
    %89 = vector.shape_cast %88 : vector<1x8x128xf32> to vector<8x128xf32>
    %90 = vector.shape_cast %82 : vector<8x128xf32> to vector<1x8x128xf32>
    tpu.vector_store %arg9[%c1_44, %c0_45, %c0_46], %90 {strides = array<i32>} : memref<2x8x128xf32, #tpu.memory_space<vmem>>, vector<1x8x128xf32>,
    return
  }
  func.func @transform_0(%arg0: i32) -> (i32, i32, i32) {
    %c0_i32 = arith.constant 0 : i32
    %c0_i32_0 = arith.constant 0 : i32
    %c0_i32_1 = arith.constant 0 : i32
    return %arg0, %c0_i32, %c0_i32_0 : i32, i32, i32
  }
  func.func @transform_1(%arg0: i32) -> (i32, i32) {
    %c0_i32 = arith.constant 0 : i32
    %c0_i32_0 = arith.constant 0 : i32
    %c0_i32_1 = arith.constant 0 : i32
    return %c0_i32, %c0_i32_0 : i32, i32
  }
  func.func @transform_2(%arg0: i32) -> (i32, i32) {
    %c0_i32 = arith.constant 0 : i32
    %c0_i32_0 = arith.constant 0 : i32
    %c0_i32_1 = arith.constant 0 : i32
    return %c0_i32, %c0_i32_0 : i32, i32
  }
  func.func @transform_3(%arg0: i32) -> (i32, i32) {
    %c0_i32 = arith.constant 0 : i32
    %c0_i32_0 = arith.constant 0 : i32
    %c0_i32_1 = arith.constant 0 : i32
    return %c0_i32, %c0_i32_0 : i32, i32
  }
  func.func @transform_4(%arg0: i32) -> (i32, i32) {
    %c0_i32 = arith.constant 0 : i32
    %c0_i32_0 = arith.constant 0 : i32
    %c0_i32_1 = arith.constant 0 : i32
    return %c0_i32, %c0_i32_0 : i32, i32
  }
  func.func @transform_5(%arg0: i32) -> (i32, i32) {
    %c0_i32 = arith.constant 0 : i32
    %c0_i32_0 = arith.constant 0 : i32
    %c0_i32_1 = arith.constant 0 : i32
    return %c0_i32, %c0_i32_0 : i32, i32
  }
  func.func @transform_6(%arg0: i32) -> (i32, i32) {
    %c0_i32 = arith.constant 0 : i32
    %c0_i32_0 = arith.constant 0 : i32
    %c0_i32_1 = arith.constant 0 : i32
    return %c0_i32, %c0_i32_0 : i32, i32
  }
  func.func @transform_7(%arg0: i32) -> (i32, i32, i32) {
    %c0_i32 = arith.constant 0 : i32
    %c0_i32_0 = arith.constant 0 : i32
    %c0_i32_1 = arith.constant 0 : i32
    %c0_i32_2 = arith.constant 0 : i32
    return %c0_i32, %c0_i32_0, %c0_i32_1 : i32, i32, i32
  }
  func.func @transform_8(%arg0: i32) -> (i32, i32, i32) {
    %c0_i32 = arith.constant 0 : i32
    %c0_i32_0 = arith.constant 0 : i32
    %c0_i32_1 = arith.constant 0 : i32
    %c0_i32_2 = arith.constant 0 : i32
    return %c0_i32, %c0_i32_0, %c0_i32_1 : i32, i32, i32
  }
}

module attributes {stable_mosaic.version = 11 : i64} {
  func.func @_decoder_seq_kernel(%arg0: i32, %arg1: memref<8xi32, #tpu.memory_space<smem>>, %arg2: memref<8x128xf32, #tpu.memory_space<vmem>>, %arg3: memref<1x8x128xf32, #tpu.memory_space<vmem>>, %arg4: memref<2x8x128xf32, #tpu.memory_space<vmem>>, %arg5: memref<2x8x128xf32, #tpu.memory_space<vmem>>, %arg6: memref<128x512xf32, #tpu.memory_space<vmem>>, %arg7: memref<128x512xf32, #tpu.memory_space<vmem>>, %arg8: memref<1x512xf32, #tpu.memory_space<vmem>>, %arg9: memref<128x512xf32, #tpu.memory_space<vmem>>, %arg10: memref<128x512xf32, #tpu.memory_space<vmem>>, %arg11: memref<1x512xf32, #tpu.memory_space<vmem>>, %arg12: memref<128x128xf32, #tpu.memory_space<vmem>>, %arg13: memref<1x128xf32, #tpu.memory_space<vmem>>, %arg14: memref<128x128xf32, #tpu.memory_space<vmem>>, %arg15: memref<1x8x128xf32, #tpu.memory_space<vmem>>, %arg16: memref<2x8x128xf32, #tpu.memory_space<vmem>>, %arg17: memref<2x8x128xf32, #tpu.memory_space<vmem>>, %arg18: memref<8x128xf32, #tpu.memory_space<vmem>>) attributes {dimension_semantics = [#tpu.dimension_semantics<arbitrary>], iteration_bounds = array<i64: 7>, scalar_prefetch = 1 : i64, scratch_operands = 3 : i64, tpu.core_type = #tpu.core_type<tc>, window_params = [{pipeline_mode = #tpu.pipeline_mode<synchronous>, transform_indices = @transform_0, window_bounds = array<i64: 8, 128>}, {transform_indices = @transform_1, window_bounds = array<i64: 1, 8, 128>}, {pipeline_mode = #tpu.pipeline_mode<synchronous>, transform_indices = @transform_2, window_bounds = array<i64: 2, 8, 128>}, {pipeline_mode = #tpu.pipeline_mode<synchronous>, transform_indices = @transform_3, window_bounds = array<i64: 2, 8, 128>}, {pipeline_mode = #tpu.pipeline_mode<synchronous>, transform_indices = @transform_4, window_bounds = array<i64: 128, 512>}, {pipeline_mode = #tpu.pipeline_mode<synchronous>, transform_indices = @transform_5, window_bounds = array<i64: 128, 512>}, {pipeline_mode = #tpu.pipeline_mode<synchronous>, transform_indices = @transform_6, window_bounds = array<i64: 1, 512>}, {pipeline_mode = #tpu.pipeline_mode<synchronous>, transform_indices = @transform_7, window_bounds = array<i64: 128, 512>}, {pipeline_mode = #tpu.pipeline_mode<synchronous>, transform_indices = @transform_8, window_bounds = array<i64: 128, 512>}, {pipeline_mode = #tpu.pipeline_mode<synchronous>, transform_indices = @transform_9, window_bounds = array<i64: 1, 512>}, {pipeline_mode = #tpu.pipeline_mode<synchronous>, transform_indices = @transform_10, window_bounds = array<i64: 128, 128>}, {pipeline_mode = #tpu.pipeline_mode<synchronous>, transform_indices = @transform_11, window_bounds = array<i64: 1, 128>}, {pipeline_mode = #tpu.pipeline_mode<synchronous>, transform_indices = @transform_12, window_bounds = array<i64: 128, 128>}, {transform_indices = @transform_13, window_bounds = array<i64: 1, 8, 128>}]} {
    %c0_i32 = arith.constant 0 : i32
    %0 = arith.cmpi eq, %arg0, %c0_i32 : i32
    %1 = arith.extui %0 : i1 to i32
    %c0_i32_0 = arith.constant 0 : i32
    %2 = arith.cmpi ne, %1, %c0_i32_0 : i32
    scf.if %2 {
      %c0_67 = arith.constant 0 : index
      %c0_68 = arith.constant 0 : index
      %c0_69 = arith.constant 0 : index
      %136 = vector.load %arg4[%c0_67, %c0_68, %c0_69] : memref<2x8x128xf32, #tpu.memory_space<vmem>>, vector<2x8x128xf32>
      %c0_70 = arith.constant 0 : index
      %c0_71 = arith.constant 0 : index
      %c0_72 = arith.constant 0 : index
      %137 = vector.load %arg16[%c0_70, %c0_71, %c0_72] : memref<2x8x128xf32, #tpu.memory_space<vmem>>, vector<2x8x128xf32>
      tpu.vector_store %arg16[%c0_70, %c0_71, %c0_72], %136 {strides = array<i32>} : memref<2x8x128xf32, #tpu.memory_space<vmem>>, vector<2x8x128xf32>,
      %c0_73 = arith.constant 0 : index
      %c0_74 = arith.constant 0 : index
      %c0_75 = arith.constant 0 : index
      %138 = vector.load %arg5[%c0_73, %c0_74, %c0_75] : memref<2x8x128xf32, #tpu.memory_space<vmem>>, vector<2x8x128xf32>
      %c0_76 = arith.constant 0 : index
      %c0_77 = arith.constant 0 : index
      %c0_78 = arith.constant 0 : index
      %139 = vector.load %arg17[%c0_76, %c0_77, %c0_78] : memref<2x8x128xf32, #tpu.memory_space<vmem>>, vector<2x8x128xf32>
      tpu.vector_store %arg17[%c0_76, %c0_77, %c0_78], %138 {strides = array<i32>} : memref<2x8x128xf32, #tpu.memory_space<vmem>>, vector<2x8x128xf32>,
      %c0_79 = arith.constant 0 : index
      %c0_80 = arith.constant 0 : index
      %140 = vector.load %arg2[%c0_79, %c0_80] : memref<8x128xf32, #tpu.memory_space<vmem>>, vector<8x128xf32>
      %c0_81 = arith.constant 0 : index
      %c0_82 = arith.constant 0 : index
      %141 = vector.load %arg18[%c0_81, %c0_82] : memref<8x128xf32, #tpu.memory_space<vmem>>, vector<8x128xf32>
      tpu.vector_store %arg18[%c0_81, %c0_82], %140 {strides = array<i32>} : memref<8x128xf32, #tpu.memory_space<vmem>>, vector<8x128xf32>,
    } else {
    }
    %c0 = arith.constant 0 : index
    %c0_1 = arith.constant 0 : index
    %3 = vector.load %arg18[%c0, %c0_1] : memref<8x128xf32, #tpu.memory_space<vmem>>, vector<8x128xf32>
    %c0_2 = arith.constant 0 : index
    %c0_3 = arith.constant 0 : index
    %c0_4 = arith.constant 0 : index
    %4 = vector.load %arg16[%c0_2, %c0_3, %c0_4] : memref<2x8x128xf32, #tpu.memory_space<vmem>>, vector<1x8x128xf32>
    %5 = vector.shape_cast %4 : vector<1x8x128xf32> to vector<8x128xf32>
    %c0_5 = arith.constant 0 : index
    %c0_6 = arith.constant 0 : index
    %c0_7 = arith.constant 0 : index
    %6 = vector.load %arg17[%c0_5, %c0_6, %c0_7] : memref<2x8x128xf32, #tpu.memory_space<vmem>>, vector<1x8x128xf32>
    %7 = vector.shape_cast %6 : vector<1x8x128xf32> to vector<8x128xf32>
    %c0_8 = arith.constant 0 : index
    %c0_9 = arith.constant 0 : index
    %8 = vector.load %arg6[%c0_8, %c0_9] : memref<128x512xf32, #tpu.memory_space<vmem>>, vector<128x512xf32>
    %c0_10 = arith.constant 0 : index
    %c0_11 = arith.constant 0 : index
    %9 = vector.load %arg7[%c0_10, %c0_11] : memref<128x512xf32, #tpu.memory_space<vmem>>, vector<128x512xf32>
    %c0_12 = arith.constant 0 : index
    %c0_13 = arith.constant 0 : index
    %10 = vector.load %arg8[%c0_12, %c0_13] : memref<1x512xf32, #tpu.memory_space<vmem>>, vector<1x512xf32>
    %cst = arith.constant dense<0.000000e+00> : vector<8x512xf32>
    %11 = tpu.matmul %3, %8, %cst {dimension_numbers = #tpu.dot_dimension_numbers<[1], [0], [0], [1], [0, 0, 1, 1], [], []>} : vector<8x128xf32>, vector<128x512xf32>, vector<8x512xf32> -> vector<8x512xf32>
    %cst_14 = arith.constant dense<0.000000e+00> : vector<8x512xf32>
    %12 = tpu.matmul %5, %9, %cst_14 {dimension_numbers = #tpu.dot_dimension_numbers<[1], [0], [0], [1], [0, 0, 1, 1], [], []>} : vector<8x128xf32>, vector<128x512xf32>, vector<8x512xf32> -> vector<8x512xf32>
    %13 = arith.addf %11, %12 : vector<8x512xf32>
    %14 = vector.broadcast %10 : vector<1x512xf32> to vector<8x512xf32>
    %15 = arith.addf %13, %14 : vector<8x512xf32>
    %16 = vector.extract_strided_slice %15 {offsets = [0, 0], sizes = [8, 128], strides = [1, 1]} : vector<8x512xf32> to vector<8x128xf32>
    %17 = arith.negf %16 : vector<8x128xf32>
    %18 = math.exp %17 : vector<8x128xf32>
    %cst_15 = arith.constant 1.000000e+00 : f32
    %19 = vector.broadcast %cst_15 : f32 to vector<8x128xf32>
    %20 = arith.addf %19, %18 : vector<8x128xf32>
    %21 = arith.divf %19, %20 : vector<8x128xf32>
    %22 = vector.extract_strided_slice %15 {offsets = [0, 128], sizes = [8, 128], strides = [1, 1]} : vector<8x512xf32> to vector<8x128xf32>
    %23 = arith.negf %22 : vector<8x128xf32>
    %24 = math.exp %23 : vector<8x128xf32>
    %cst_16 = arith.constant 1.000000e+00 : f32
    %25 = vector.broadcast %cst_16 : f32 to vector<8x128xf32>
    %26 = arith.addf %25, %24 : vector<8x128xf32>
    %27 = arith.divf %25, %26 : vector<8x128xf32>
    %28 = vector.extract_strided_slice %15 {offsets = [0, 256], sizes = [8, 128], strides = [1, 1]} : vector<8x512xf32> to vector<8x128xf32>
    %29 = math.tanh %28 : vector<8x128xf32>
    %30 = vector.extract_strided_slice %15 {offsets = [0, 384], sizes = [8, 128], strides = [1, 1]} : vector<8x512xf32> to vector<8x128xf32>
    %31 = arith.negf %30 : vector<8x128xf32>
    %32 = math.exp %31 : vector<8x128xf32>
    %cst_17 = arith.constant 1.000000e+00 : f32
    %33 = vector.broadcast %cst_17 : f32 to vector<8x128xf32>
    %34 = arith.addf %33, %32 : vector<8x128xf32>
    %35 = arith.divf %33, %34 : vector<8x128xf32>
    %36 = arith.mulf %27, %7 : vector<8x128xf32>
    %37 = arith.mulf %21, %29 : vector<8x128xf32>
    %38 = arith.addf %36, %37 : vector<8x128xf32>
    %39 = math.tanh %38 : vector<8x128xf32>
    %40 = arith.mulf %35, %39 : vector<8x128xf32>
    %c0_18 = arith.constant 0 : index
    %c0_19 = arith.constant 0 : index
    %c0_20 = arith.constant 0 : index
    %41 = vector.load %arg16[%c0_18, %c0_19, %c0_20] : memref<2x8x128xf32, #tpu.memory_space<vmem>>, vector<1x8x128xf32>
    %42 = vector.shape_cast %41 : vector<1x8x128xf32> to vector<8x128xf32>
    %43 = vector.shape_cast %40 : vector<8x128xf32> to vector<1x8x128xf32>
    tpu.vector_store %arg16[%c0_18, %c0_19, %c0_20], %43 {strides = array<i32>} : memref<2x8x128xf32, #tpu.memory_space<vmem>>, vector<1x8x128xf32>,
    %c0_21 = arith.constant 0 : index
    %c0_22 = arith.constant 0 : index
    %c0_23 = arith.constant 0 : index
    %44 = vector.load %arg17[%c0_21, %c0_22, %c0_23] : memref<2x8x128xf32, #tpu.memory_space<vmem>>, vector<1x8x128xf32>
    %45 = vector.shape_cast %44 : vector<1x8x128xf32> to vector<8x128xf32>
    %46 = vector.shape_cast %38 : vector<8x128xf32> to vector<1x8x128xf32>
    tpu.vector_store %arg17[%c0_21, %c0_22, %c0_23], %46 {strides = array<i32>} : memref<2x8x128xf32, #tpu.memory_space<vmem>>, vector<1x8x128xf32>,
    %c1 = arith.constant 1 : index
    %c0_24 = arith.constant 0 : index
    %c0_25 = arith.constant 0 : index
    %47 = vector.load %arg16[%c1, %c0_24, %c0_25] : memref<2x8x128xf32, #tpu.memory_space<vmem>>, vector<1x8x128xf32>
    %48 = vector.shape_cast %47 : vector<1x8x128xf32> to vector<8x128xf32>
    %c1_26 = arith.constant 1 : index
    %c0_27 = arith.constant 0 : index
    %c0_28 = arith.constant 0 : index
    %49 = vector.load %arg17[%c1_26, %c0_27, %c0_28] : memref<2x8x128xf32, #tpu.memory_space<vmem>>, vector<1x8x128xf32>
    %50 = vector.shape_cast %49 : vector<1x8x128xf32> to vector<8x128xf32>
    %c0_29 = arith.constant 0 : index
    %c0_30 = arith.constant 0 : index
    %51 = vector.load %arg9[%c0_29, %c0_30] : memref<128x512xf32, #tpu.memory_space<vmem>>, vector<128x512xf32>
    %c0_31 = arith.constant 0 : index
    %c0_32 = arith.constant 0 : index
    %52 = vector.load %arg10[%c0_31, %c0_32] : memref<128x512xf32, #tpu.memory_space<vmem>>, vector<128x512xf32>
    %c0_33 = arith.constant 0 : index
    %c0_34 = arith.constant 0 : index
    %53 = vector.load %arg11[%c0_33, %c0_34] : memref<1x512xf32, #tpu.memory_space<vmem>>, vector<1x512xf32>
    %cst_35 = arith.constant dense<0.000000e+00> : vector<8x512xf32>
    %54 = tpu.matmul %40, %51, %cst_35 {dimension_numbers = #tpu.dot_dimension_numbers<[1], [0], [0], [1], [0, 0, 1, 1], [], []>} : vector<8x128xf32>, vector<128x512xf32>, vector<8x512xf32> -> vector<8x512xf32>
    %cst_36 = arith.constant dense<0.000000e+00> : vector<8x512xf32>
    %55 = tpu.matmul %48, %52, %cst_36 {dimension_numbers = #tpu.dot_dimension_numbers<[1], [0], [0], [1], [0, 0, 1, 1], [], []>} : vector<8x128xf32>, vector<128x512xf32>, vector<8x512xf32> -> vector<8x512xf32>
    %56 = arith.addf %54, %55 : vector<8x512xf32>
    %57 = vector.broadcast %53 : vector<1x512xf32> to vector<8x512xf32>
    %58 = arith.addf %56, %57 : vector<8x512xf32>
    %59 = vector.extract_strided_slice %58 {offsets = [0, 0], sizes = [8, 128], strides = [1, 1]} : vector<8x512xf32> to vector<8x128xf32>
    %60 = arith.negf %59 : vector<8x128xf32>
    %61 = math.exp %60 : vector<8x128xf32>
    %cst_37 = arith.constant 1.000000e+00 : f32
    %62 = vector.broadcast %cst_37 : f32 to vector<8x128xf32>
    %63 = arith.addf %62, %61 : vector<8x128xf32>
    %64 = arith.divf %62, %63 : vector<8x128xf32>
    %65 = vector.extract_strided_slice %58 {offsets = [0, 128], sizes = [8, 128], strides = [1, 1]} : vector<8x512xf32> to vector<8x128xf32>
    %66 = arith.negf %65 : vector<8x128xf32>
    %67 = math.exp %66 : vector<8x128xf32>
    %cst_38 = arith.constant 1.000000e+00 : f32
    %68 = vector.broadcast %cst_38 : f32 to vector<8x128xf32>
    %69 = arith.addf %68, %67 : vector<8x128xf32>
    %70 = arith.divf %68, %69 : vector<8x128xf32>
    %71 = vector.extract_strided_slice %58 {offsets = [0, 256], sizes = [8, 128], strides = [1, 1]} : vector<8x512xf32> to vector<8x128xf32>
    %72 = math.tanh %71 : vector<8x128xf32>
    %73 = vector.extract_strided_slice %58 {offsets = [0, 384], sizes = [8, 128], strides = [1, 1]} : vector<8x512xf32> to vector<8x128xf32>
    %74 = arith.negf %73 : vector<8x128xf32>
    %75 = math.exp %74 : vector<8x128xf32>
    %cst_39 = arith.constant 1.000000e+00 : f32
    %76 = vector.broadcast %cst_39 : f32 to vector<8x128xf32>
    %77 = arith.addf %76, %75 : vector<8x128xf32>
    %78 = arith.divf %76, %77 : vector<8x128xf32>
    %79 = arith.mulf %70, %50 : vector<8x128xf32>
    %80 = arith.mulf %64, %72 : vector<8x128xf32>
    %81 = arith.addf %79, %80 : vector<8x128xf32>
    %82 = math.tanh %81 : vector<8x128xf32>
    %83 = arith.mulf %78, %82 : vector<8x128xf32>
    %c1_40 = arith.constant 1 : index
    %c0_41 = arith.constant 0 : index
    %c0_42 = arith.constant 0 : index
    %84 = vector.load %arg16[%c1_40, %c0_41, %c0_42] : memref<2x8x128xf32, #tpu.memory_space<vmem>>, vector<1x8x128xf32>
    %85 = vector.shape_cast %84 : vector<1x8x128xf32> to vector<8x128xf32>
    %86 = vector.shape_cast %83 : vector<8x128xf32> to vector<1x8x128xf32>
    tpu.vector_store %arg16[%c1_40, %c0_41, %c0_42], %86 {strides = array<i32>} : memref<2x8x128xf32, #tpu.memory_space<vmem>>, vector<1x8x128xf32>,
    %c1_43 = arith.constant 1 : index
    %c0_44 = arith.constant 0 : index
    %c0_45 = arith.constant 0 : index
    %87 = vector.load %arg17[%c1_43, %c0_44, %c0_45] : memref<2x8x128xf32, #tpu.memory_space<vmem>>, vector<1x8x128xf32>
    %88 = vector.shape_cast %87 : vector<1x8x128xf32> to vector<8x128xf32>
    %89 = vector.shape_cast %81 : vector<8x128xf32> to vector<1x8x128xf32>
    tpu.vector_store %arg17[%c1_43, %c0_44, %c0_45], %89 {strides = array<i32>} : memref<2x8x128xf32, #tpu.memory_space<vmem>>, vector<1x8x128xf32>,
    %c0_46 = arith.constant 0 : index
    %c0_47 = arith.constant 0 : index
    %90 = vector.load %arg12[%c0_46, %c0_47] : memref<128x128xf32, #tpu.memory_space<vmem>>, vector<128x128xf32>
    %cst_48 = arith.constant dense<0.000000e+00> : vector<8x128xf32>
    %91 = tpu.matmul %83, %90, %cst_48 {dimension_numbers = #tpu.dot_dimension_numbers<[1], [0], [0], [1], [0, 0, 1, 1], [], []>} : vector<8x128xf32>, vector<128x128xf32>, vector<8x128xf32> -> vector<8x128xf32>
    %c0_49 = arith.constant 0 : index
    %c0_50 = arith.constant 0 : index
    %92 = vector.load %arg13[%c0_49, %c0_50] : memref<1x128xf32, #tpu.memory_space<vmem>>, vector<1x128xf32>
    %93 = vector.broadcast %92 : vector<1x128xf32> to vector<8x128xf32>
    %94 = arith.addf %91, %93 : vector<8x128xf32>
    %cst_51 = arith.constant dense<0xFF800000> : vector<8xf32>
    %95 = vector.multi_reduction <maximumf>, %94, %cst_51 [1] : vector<8x128xf32> to vector<8xf32>
    %96 = vector.shape_cast %95 : vector<8xf32> to vector<8x1xf32>
    %97 = vector.broadcast %96 : vector<8x1xf32> to vector<8x128xf32>
    %98 = arith.subf %94, %97 : vector<8x128xf32>
    %99 = math.exp %98 : vector<8x128xf32>
    %cst_52 = arith.constant dense<0.000000e+00> : vector<8xf32>
    %100 = vector.multi_reduction <add>, %99, %cst_52 [1] : vector<8x128xf32> to vector<8xf32>
    %101 = vector.shape_cast %100 : vector<8xf32> to vector<8x1xf32>
    %102 = math.log %101 : vector<8x1xf32>
    %103 = vector.broadcast %102 : vector<8x1xf32> to vector<8x128xf32>
    %104 = arith.subf %98, %103 : vector<8x128xf32>
    %c0_53 = arith.constant 0 : index
    %c0_54 = arith.constant 0 : index
    %c0_55 = arith.constant 0 : index
    %105 = vector.load %arg15[%c0_53, %c0_54, %c0_55] : memref<1x8x128xf32, #tpu.memory_space<vmem>>, vector<1x8x128xf32>
    %106 = vector.shape_cast %105 : vector<1x8x128xf32> to vector<8x128xf32>
    %107 = vector.shape_cast %104 : vector<8x128xf32> to vector<1x8x128xf32>
    tpu.vector_store %arg15[%c0_53, %c0_54, %c0_55], %107 {strides = array<i32>} : memref<1x8x128xf32, #tpu.memory_space<vmem>>, vector<1x8x128xf32>,
    %108 = tpu.iota {dimensions = array<i32: 1>} : vector<8x128xi32>
    %109 = vector.broadcast %96 : vector<8x1xf32> to vector<8x128xf32>
    %110 = arith.cmpf oge, %94, %109 : vector<8x128xf32>
    %c128_i32 = arith.constant 128 : i32
    %111 = vector.broadcast %c128_i32 : i32 to vector<8x128xi32>
    %112 = arith.select %110, %108, %111 : vector<8x128xi1>, vector<8x128xi32>
    %cst_56 = arith.constant dense<2147483647> : vector<8xi32>
    %113 = vector.multi_reduction <minsi>, %112, %cst_56 [1] : vector<8x128xi32> to vector<8xi32>
    %114 = vector.shape_cast %113 : vector<8xi32> to vector<8x1xi32>
    %115 = vector.broadcast %114 : vector<8x1xi32> to vector<8x128xi32>
    %116 = arith.cmpi eq, %108, %115 : vector<8x128xi32>
    %117 = arith.extui %116 : vector<8x128xi1> to vector<8x128xi32>
    %118 = arith.sitofp %117 : vector<8x128xi32> to vector<8x128xf32>
    %c0_57 = arith.constant 0 : index
    %c0_58 = arith.constant 0 : index
    %119 = vector.load %arg14[%c0_57, %c0_58] : memref<128x128xf32, #tpu.memory_space<vmem>>, vector<128x128xf32>
    %cst_59 = arith.constant dense<0.000000e+00> : vector<8x128xf32>
    %120 = tpu.matmul %118, %119, %cst_59 {dimension_numbers = #tpu.dot_dimension_numbers<[1], [0], [0], [1], [0, 0, 1, 1], [], []>} : vector<8x128xf32>, vector<128x128xf32>, vector<8x128xf32> -> vector<8x128xf32>
    %c1_i32 = arith.constant 1 : i32
    %121 = arith.addi %arg0, %c1_i32 : i32
    %122 = arith.index_cast %121 : i32 to index
    %123 = memref.load %arg1[%122] : memref<8xi32, #tpu.memory_space<smem>>
    %c0_i32_60 = arith.constant 0 : i32
    %124 = arith.cmpi sgt, %123, %c0_i32_60 : i32
    %125 = arith.extui %124 : i1 to i32
    %126 = arith.sitofp %125 : i32 to f32
    %c0_61 = arith.constant 0 : index
    %c0_62 = arith.constant 0 : index
    %c0_63 = arith.constant 0 : index
    %127 = vector.load %arg3[%c0_61, %c0_62, %c0_63] : memref<1x8x128xf32, #tpu.memory_space<vmem>>, vector<1x8x128xf32>
    %128 = vector.shape_cast %127 : vector<1x8x128xf32> to vector<8x128xf32>
    %129 = vector.broadcast %126 : f32 to vector<8x128xf32>
    %130 = arith.mulf %129, %128 : vector<8x128xf32>
    %cst_64 = arith.constant 1.000000e+00 : f32
    %131 = arith.subf %cst_64, %126 : f32
    %132 = vector.broadcast %131 : f32 to vector<8x128xf32>
    %133 = arith.mulf %132, %120 : vector<8x128xf32>
    %134 = arith.addf %130, %133 : vector<8x128xf32>
    %c0_65 = arith.constant 0 : index
    %c0_66 = arith.constant 0 : index
    %135 = vector.load %arg18[%c0_65, %c0_66] : memref<8x128xf32, #tpu.memory_space<vmem>>, vector<8x128xf32>
    tpu.vector_store %arg18[%c0_65, %c0_66], %134 {strides = array<i32>} : memref<8x128xf32, #tpu.memory_space<vmem>>, vector<8x128xf32>,
    return
  }
  func.func @transform_0(%arg0: i32, %arg1: memref<8xi32, #tpu.memory_space<smem>>) -> (i32, i32) {
    %c0_i32 = arith.constant 0 : i32
    %c0_i32_0 = arith.constant 0 : i32
    %c0_i32_1 = arith.constant 0 : i32
    return %c0_i32, %c0_i32_0 : i32, i32
  }
  func.func @transform_1(%arg0: i32, %arg1: memref<8xi32, #tpu.memory_space<smem>>) -> (i32, i32, i32) {
    %c0_i32 = arith.constant 0 : i32
    %c0_i32_0 = arith.constant 0 : i32
    %c0_i32_1 = arith.constant 0 : i32
    return %arg0, %c0_i32, %c0_i32_0 : i32, i32, i32
  }
  func.func @transform_2(%arg0: i32, %arg1: memref<8xi32, #tpu.memory_space<smem>>) -> (i32, i32, i32) {
    %c0_i32 = arith.constant 0 : i32
    %c0_i32_0 = arith.constant 0 : i32
    %c0_i32_1 = arith.constant 0 : i32
    %c0_i32_2 = arith.constant 0 : i32
    return %c0_i32, %c0_i32_0, %c0_i32_1 : i32, i32, i32
  }
  func.func @transform_3(%arg0: i32, %arg1: memref<8xi32, #tpu.memory_space<smem>>) -> (i32, i32, i32) {
    %c0_i32 = arith.constant 0 : i32
    %c0_i32_0 = arith.constant 0 : i32
    %c0_i32_1 = arith.constant 0 : i32
    %c0_i32_2 = arith.constant 0 : i32
    return %c0_i32, %c0_i32_0, %c0_i32_1 : i32, i32, i32
  }
  func.func @transform_4(%arg0: i32, %arg1: memref<8xi32, #tpu.memory_space<smem>>) -> (i32, i32) {
    %c0_i32 = arith.constant 0 : i32
    %c0_i32_0 = arith.constant 0 : i32
    %c0_i32_1 = arith.constant 0 : i32
    return %c0_i32, %c0_i32_0 : i32, i32
  }
  func.func @transform_5(%arg0: i32, %arg1: memref<8xi32, #tpu.memory_space<smem>>) -> (i32, i32) {
    %c0_i32 = arith.constant 0 : i32
    %c0_i32_0 = arith.constant 0 : i32
    %c0_i32_1 = arith.constant 0 : i32
    return %c0_i32, %c0_i32_0 : i32, i32
  }
  func.func @transform_6(%arg0: i32, %arg1: memref<8xi32, #tpu.memory_space<smem>>) -> (i32, i32) {
    %c0_i32 = arith.constant 0 : i32
    %c0_i32_0 = arith.constant 0 : i32
    %c0_i32_1 = arith.constant 0 : i32
    return %c0_i32, %c0_i32_0 : i32, i32
  }
  func.func @transform_7(%arg0: i32, %arg1: memref<8xi32, #tpu.memory_space<smem>>) -> (i32, i32) {
    %c0_i32 = arith.constant 0 : i32
    %c0_i32_0 = arith.constant 0 : i32
    %c0_i32_1 = arith.constant 0 : i32
    return %c0_i32, %c0_i32_0 : i32, i32
  }
  func.func @transform_8(%arg0: i32, %arg1: memref<8xi32, #tpu.memory_space<smem>>) -> (i32, i32) {
    %c0_i32 = arith.constant 0 : i32
    %c0_i32_0 = arith.constant 0 : i32
    %c0_i32_1 = arith.constant 0 : i32
    return %c0_i32, %c0_i32_0 : i32, i32
  }
  func.func @transform_9(%arg0: i32, %arg1: memref<8xi32, #tpu.memory_space<smem>>) -> (i32, i32) {
    %c0_i32 = arith.constant 0 : i32
    %c0_i32_0 = arith.constant 0 : i32
    %c0_i32_1 = arith.constant 0 : i32
    return %c0_i32, %c0_i32_0 : i32, i32
  }
  func.func @transform_10(%arg0: i32, %arg1: memref<8xi32, #tpu.memory_space<smem>>) -> (i32, i32) {
    %c0_i32 = arith.constant 0 : i32
    %c0_i32_0 = arith.constant 0 : i32
    %c0_i32_1 = arith.constant 0 : i32
    return %c0_i32, %c0_i32_0 : i32, i32
  }
  func.func @transform_11(%arg0: i32, %arg1: memref<8xi32, #tpu.memory_space<smem>>) -> (i32, i32) {
    %c0_i32 = arith.constant 0 : i32
    %c0_i32_0 = arith.constant 0 : i32
    %c0_i32_1 = arith.constant 0 : i32
    return %c0_i32, %c0_i32_0 : i32, i32
  }
  func.func @transform_12(%arg0: i32, %arg1: memref<8xi32, #tpu.memory_space<smem>>) -> (i32, i32) {
    %c0_i32 = arith.constant 0 : i32
    %c0_i32_0 = arith.constant 0 : i32
    %c0_i32_1 = arith.constant 0 : i32
    return %c0_i32, %c0_i32_0 : i32, i32
  }
  func.func @transform_13(%arg0: i32, %arg1: memref<8xi32, #tpu.memory_space<smem>>) -> (i32, i32, i32) {
    %c0_i32 = arith.constant 0 : i32
    %c0_i32_0 = arith.constant 0 : i32
    %c0_i32_1 = arith.constant 0 : i32
    return %arg0, %c0_i32, %c0_i32_0 : i32, i32, i32
  }
}

</mosaic_0001>

<bundles_post_ra>
// kernel: _seq2seq_forward.2
= control target key start
LH: loop header
LB: loop body
LE: loop exit
PB: predicated region body
PF: predicated region fallthrough
CT: control target
= control target key end

     0   :  { %14 = vsyncpa [#allocation3], 0  ;;  %s2231_s0 = inlined_call_operand.vmem [shape: f32[8,8,128], index: 0, kind: input, shape index: {}]   ;;  %s2232_s1 = inlined_call_operand.vmem [shape: f32[128,512], index: 1, kind: input, shape index: {}]   ;;  %s2233_s2 = inlined_call_operand.hbm [shape: f32[128,512], index: 2, kind: input, shape index: {}]   ;;  %s2234_s3 = inlined_call_operand.vmem [shape: f32[1,512], index: 3, kind: input, shape index: {}]   ;;  %s2235_s4 = inlined_call_operand.hbm [shape: f32[128,512], index: 4, kind: input, shape index: {}]   ;;  %s2236_s5 = inlined_call_operand.hbm [shape: f32[128,512], index: 5, kind: input, shape index: {}]   ;;  %s2237_s6 = inlined_call_operand.vmem [shape: f32[1,512], index: 6, kind: input, shape index: {}]   ;;  %s2238_s7 = inlined_call_operand.vmem [shape: f32[2,8,128], index: 7, kind: output, shape index: {0}]   ;;  %s2239_s8 = inlined_call_operand.vmem [shape: f32[2,8,128], index: 8, kind: output, shape index: {1}]  }
   0x1   :  { %15 = vsyncpa [#allocation5], 0  ;;  %s1853_s27 = smov 0  }
   0x2 LB: > { %s1859_s28 = sadd.s32 4294967295, %s1799_s27   ;;  %p1339_p0 = scmp.ge.s32.totalorder %s1799_s27, 1  ;;  %s1799_s27 = sphi %s1853_s27, %s21_s27  }
   0x3   : > { %p220_p1 = scmp.lt.s32.totalorder %s1799_s27, 9  ;;  %p2240_p3 = scmp.eq.s32.totalorder %s1859_s28, 0 }
   0x4   : > { %s1801_s30 = smov [#allocation4]   ;;  %s1802_s10 = smov [#allocation2]  }
   0x5   : > { %p1865_p4 = pnand %p1339_p0, %p220_p1  ;;  %s251_s9 = sshll.u32 %s1801_s30, 4  ;;  %s252_s9 = int_to_ptr.vmem [resolvable:$true] %s251_s9 }
   0x6   : > { %s235_s11 = sshll.u32 %s1802_s10, 4  ;;  %s1803_s13 = smov [#allocation6]   ;;  %s1877_s11 = int_to_ptr.vmem [resolvable:$true] %s235_s11 }
   0x7   : > { %s2242_s29 = scalar_select %p1865_p4, 1, 0 }
   0x8   : > { %p1638_p5 = pneg %p1865_p4  ;;  %s264_s14 = sshll.u32 %s1803_s13, 4  ;;  %s1879_s14 = int_to_ptr.vmem [resolvable:$true] %s264_s14 }
   0x9   : > { %s1701_s17 = scalar_lea.hbm %s2235_s4, 8192 }
   0xa   : > { %p1873_p6 = pnand %p2240_p3, %p1638_p5  ;;  %p1702_p7 = scmp.ne.s32.totalorder %s2235_s4, %s1701_s17 }
   0xb   : > { %p1708_p11 = scmp.lt.u32.totalorder %s1701_s17, %s2235_s4 }
   0xc   : > { %p1889_p8 = pneg %p1873_p6 }
   0xe   : > { %p1704_p9 = pnand %p1889_p8, %p1702_p7 }
  0x10   : > { %p1705_p10 = pneg %p1704_p9 }
  0x12   : > { %p1710_p12 = pnand %p1708_p11, %p1705_p10 }
  0x14   : > { %1713 = shalt.err (!%p1710_p12)
}
  0x15   : > { %s1714_s23 = scalar_lea.vmem %s252_s9, 8192  ;;  %p1722_p5 = scmp.lt.s32.totalorder %s252_s9, %s252_s9 }
  0x16   : > { %p1715_p13 = scmp.ne.s32.totalorder %s252_s9, %s1714_s23  ;;  %p1723_p2 = scmp.lt.s32.totalorder %s1714_s23, %s1714_s23 }
  0x18   : > { %p1717_p0 = pnand %p1715_p13, %p1889_p8  ;;  %p1724_p3 = por %p1723_p2, %p1722_p5 }
  0x1a   : > { %p1718_p1 = pneg %p1717_p0 }
  0x1c   : > { %p1725_p4 = pnand %p1724_p3, %p1718_p1 }
  0x1e   : > { %1728 = shalt.err (!%p1725_p4)
}
  0x1f   : > { %s1804_s24 = smov 512   ;;  %s1805_s25 = smov 32  }
  0x20   : > { %1644 = dma.hbm_to_vmem [thread:$0]  (!%p1873_p6), %s2235_s4, 8192, %s252_s9, [#allocation5], %s1804_s24, %s1804_s24, %s1805_s25  }
  0x21   : > { %s1729_s15 = scalar_lea.hbm %s2233_s2, 8192 }
  0x22   : > { %p1730_p2 = scmp.ne.s32.totalorder %s2233_s2, %s1729_s15  ;;  %p1736_p7 = scmp.lt.u32.totalorder %s1729_s15, %s2233_s2 }
  0x24   : > { %p1732_p3 = pnand %p1730_p2, %p1889_p8 }
  0x26   : > { %p1733_p4 = pneg %p1732_p3 }
  0x28   : > { %p1738_p9 = pnand %p1736_p7, %p1733_p4 }
  0x2a   : > { %1741 = shalt.err (!%p1738_p9)
}
  0x2b   : > { %s1742_s9 = scalar_lea.vmem %s1877_s11, 8192  ;;  %p1750_p13 = scmp.lt.s32.totalorder %s1877_s11, %s1877_s11 }
  0x2c   : > { %p1743_p10 = scmp.ne.s32.totalorder %s1877_s11, %s1742_s9  ;;  %p1751_p0 = scmp.lt.s32.totalorder %s1742_s9, %s1742_s9 }
  0x2e   : > { %p1745_p11 = pnand %p1743_p10, %p1889_p8  ;;  %p1752_p1 = por %p1751_p0, %p1750_p13 }
  0x30   : > { %p1746_p12 = pneg %p1745_p11 }
  0x32   : > { %p1753_p5 = pnand %p1752_p1, %p1746_p12 }
  0x34   : > { %1756 = shalt.err (!%p1753_p5)
}
  0x35   : > { %1641 = dma.hbm_to_vmem [thread:$0]  (!%p1873_p6), %s2233_s2, 8192, %s1877_s11, [#allocation3], %s1804_s24, %s1804_s24, %s1805_s25  }
  0x36   : > { %s1757_s30 = scalar_lea.hbm %s2236_s5, 8192 }
  0x37   : > { %p1758_p2 = scmp.ne.s32.totalorder %s2236_s5, %s1757_s30  ;;  %p1764_p7 = scmp.lt.u32.totalorder %s1757_s30, %s2236_s5 }
  0x39   : > { %p1760_p3 = pnand %p1758_p2, %p1889_p8 }
  0x3b   : > { %p1761_p4 = pneg %p1760_p3 }
  0x3d   : > { %p1766_p9 = pnand %p1764_p7, %p1761_p4 }
  0x3f   : > { %1769 = shalt.err (!%p1766_p9)
}
  0x40   : > { %s1770_s11 = scalar_lea.vmem %s1879_s14, 8192  ;;  %p1778_p13 = scmp.lt.s32.totalorder %s1879_s14, %s1879_s14 }
  0x41   : > { %p1771_p10 = scmp.ne.s32.totalorder %s1879_s14, %s1770_s11  ;;  %p1779_p0 = scmp.lt.s32.totalorder %s1770_s11, %s1770_s11 }
  0x43   : > { %p1773_p11 = pnand %p1771_p10, %p1889_p8  ;;  %p1780_p1 = por %p1779_p0, %p1778_p13 }
  0x45   : > { %p1774_p12 = pneg %p1773_p11 }
  0x47   : > { %p1781_p5 = pnand %p1780_p1, %p1774_p12 }
  0x49   : > { %1784 = shalt.err (!%p1781_p5)
}
  0x4a   : > { %1647 = dma.hbm_to_vmem [thread:$0]  (!%p1873_p6), %s2236_s5, 8192, %s1879_s14, [#allocation5], %s1804_s24, %s1804_s24, %s1805_s25  }
  0x4b   : > { %p2245_p2 = scmp.ne.s32.totalorder %s2242_s29, 0 }
  0x4c   : > { %p2246_p8 = scmp.eq.s32.totalorder (!%p2245_p2), %s1859_s28, 0 }
  0x4d   : > { %290 = sbr.rel (%p2245_p2) target bundleno = 684 (0x2ac), region = 48 }
  0x54   : > { %1790 = dma.done.wait (%p2246_p8), [#allocation3], 8192   ;;  %p2247_p3 = pmov %p2246_p8 }
  0x56   : > { %1792 = vsyncadd (%p2247_p3), [#allocation3], 4294959104  ;;  %p2248_p4 = pmov %p2247_p3 }
  0x57   : > { %p2249_p7 = pmov %p2247_p3 }
  0x58   : > { %1794 = dma.done.wait (%p2248_p4), [#allocation5], 16384  }
  0x59   : > { %1796 = vsyncadd (%p2249_p7), [#allocation5], 4294950912  ;;  %p326_p9 = scmp.lt.s32.totalorder %s1859_s28, 7  ;;  %p2250_p6 = scmp.ne.s32.totalorder %s1859_s28, 0 }
  0x5a   : > { %v1806_v0 = vmov (!%p2250_p6), 0.0  }
  0x5b   : > { %s327_s12 = scalar_select %p326_p9, %s1859_s28, 7 }
  0x5c   : > { %333 = sbr.rel (%p2250_p6) target bundleno = 99 (0x63), region = 64  ;;  %334 = vst [vmem:[%s2238_s7] sm:$0xff] (!%p2250_p6), %v1806_v0  ;;  %335 = vst [vmem:[%s2238_s7 + $0x8] sm:$0xff] (!%p2250_p6), %v1806_v0 }
  0x5d   : > { %s1348_s14 = sshll.u32 %s327_s12, 3  ;;  %336 = vst [vmem:[%s2239_s8] sm:$0xff] (!%p2250_p6), %v1806_v0  ;;  %337 = vst [vmem:[%s2239_s8 + $0x8] sm:$0xff] (!%p2250_p6), %v1806_v0 }
  0x5e   : > { %s1975_s24 = scalar_lea.vmem %s2231_s0, %s1348_s14 }
  0x63 PF: > { %v406_v1 = vld [vmem:[#allocation2 + $0x8] sm:$0xff]  ;;  %v408_v3 = vld [vmem:[#allocation2 + $0x18] sm:$0xff]  ;;  %v405_v6 = vld [vmem:[#allocation2] sm:$0xff]  ;;  %v1807_v8 = vmov 0.0  }
  0x64   : > { %v410_v2 = vld [vmem:[#allocation2 + $0x28] sm:$0xff]  ;;  %v412_v5 = vld [vmem:[#allocation2 + $0x38] sm:$0xff]  ;;  %v409_v7 = vld [vmem:[#allocation2 + $0x20] sm:$0xff]  ;;  %534 = vmatprep.mubr.f32.mxu0 %v1807_v8  ;;  %605 = vmatprep.mubr.f32.mxu1 %v1807_v8 }
  0x65   : > { %v1362_v4 = vpack.c.bf16 %v410_v2, %v406_v1  ;;  %v1394_v9 = vpack.c.bf16 %v412_v5, %v408_v3  ;;  %v1364_v10 = vpack.c.bf16 %v409_v7, %v405_v6  ;;  %v407_v11 = vld [vmem:[#allocation2 + $0x10] sm:$0xff]  ;;  %v414_v13 = vld [vmem:[#allocation2 + $0x48] sm:$0xff]  ;;  %v416_v16 = vld [vmem:[#allocation2 + $0x58] sm:$0xff] }
  0x66   : > { %v411_v12 = vld [vmem:[#allocation2 + $0x30] sm:$0xff]  ;;  %v418_v15 = vld [vmem:[#allocation2 + $0x68] sm:$0xff]  ;;  %v420_v17 = vld [vmem:[#allocation2 + $0x78] sm:$0xff] }
  0x67   : > { %1363 = vmatprep.subr.bf16.mxu0 %v1362_v4  ;;  %v1396_v14 = vpack.c.bf16 %v411_v12, %v407_v11  ;;  %1395 = vmatprep.subr.bf16.mxu1 %v1394_v9  ;;  %v1366_v18 = vpack.c.bf16 %v418_v15, %v414_v13  ;;  %v1398_v19 = vpack.c.bf16 %v420_v17, %v416_v16  ;;  %v413_v20 = vld [vmem:[#allocation2 + $0x40] sm:$0xff]  ;;  %v415_v22 = vld [vmem:[#allocation2 + $0x50] sm:$0xff]  ;;  %v422_v25 = vld [vmem:[#allocation2 + $0x88] sm:$0xff] }
  0x68   : > { %1365 = vmatpush1.bf16.msra.mxu0 %v1364_v10  ;;  %v417_v21 = vld [vmem:[#allocation2 + $0x60] sm:$0xff]  ;;  %v419_v24 = vld [vmem:[#allocation2 + $0x70] sm:$0xff]  ;;  %v426_v26 = vld [vmem:[#allocation2 + $0xa8] sm:$0xff] }
  0x69   : > { %1397 = vmatpush1.bf16.msra.mxu1 %v1396_v14  ;;  %v1368_v23 = vpack.c.bf16 %v417_v21, %v413_v20  ;;  %1367 = vmatprep.subr.bf16.mxu0 %v1366_v18  ;;  %v1400_v27 = vpack.c.bf16 %v419_v24, %v415_v22  ;;  %v1370_v28 = vpack.c.bf16 %v426_v26, %v422_v25  ;;  %v424_v29 = vld [vmem:[#allocation2 + $0x98] sm:$0xff]  ;;  %v421_v31 = vld [vmem:[#allocation2 + $0x80] sm:$0xff]  ;;  %v423_v34 = vld [vmem:[#allocation2 + $0x90] sm:$0xff] }
  0x6a   : > { %1399 = vmatprep.subr.bf16.mxu1 %v1398_v19  ;;  %v428_v30 = vld [vmem:[#allocation2 + $0xb8] sm:$0xff]  ;;  %v425_v33 = vld [vmem:[#allocation2 + $0xa0] sm:$0xff]  ;;  %v427_v35 = vld [vmem:[#allocation2 + $0xb0] sm:$0xff] }
  0x6b   : > { %v1402_v32 = vpack.c.bf16 %v428_v30, %v424_v29  ;;  %v1372_v36 = vpack.c.bf16 %v425_v33, %v421_v31  ;;  %v430_v37 = vld [vmem:[#allocation2 + $0xc8] sm:$0xff]  ;;  %v432_v39 = vld [vmem:[#allocation2 + $0xd8] sm:$0xff]  ;;  %v1404_v40 = vpack.c.bf16 %v427_v35, %v423_v34  ;;  %v429_v43 = vld [vmem:[#allocation2 + $0xc0] sm:$0xff] }
  0x6c   : > { %1369 = vmatpush1.bf16.msra.mxu0 %v1368_v23  ;;  %v434_v38 = vld [vmem:[#allocation2 + $0xe8] sm:$0xff]  ;;  %v436_v42 = vld [vmem:[#allocation2 + $0xf8] sm:$0xff]  ;;  %v433_v44 = vld [vmem:[#allocation2 + $0xe0] sm:$0xff] }
  0x6d   : > { %1401 = vmatpush1.bf16.msra.mxu1 %v1400_v27  ;;  %1371 = vmatprep.subr.bf16.mxu0 %v1370_v28  ;;  %v1374_v41 = vpack.c.bf16 %v434_v38, %v430_v37  ;;  %v1406_v45 = vpack.c.bf16 %v436_v42, %v432_v39  ;;  %v431_v46 = vld [vmem:[#allocation2 + $0xd0] sm:$0xff]  ;;  %v438_v48 = vld [vmem:[#allocation2 + $0x108] sm:$0xff]  ;;  %v440_v50 = vld [vmem:[#allocation2 + $0x118] sm:$0xff]  ;;  %v1376_v52 = vpack.c.bf16 %v433_v44, %v429_v43 }
  0x6e   : > { %1403 = vmatprep.subr.bf16.mxu1 %v1402_v32  ;;  %v435_v47 = vld [vmem:[#allocation2 + $0xf0] sm:$0xff]  ;;  %v442_v49 = vld [vmem:[#allocation2 + $0x128] sm:$0xff]  ;;  %v444_v51 = vld [vmem:[#allocation2 + $0x138] sm:$0xff] }
  0x6f   : > { %v1408_v53 = vpack.c.bf16 %v435_v47, %v431_v46  ;;  %v1378_v54 = vpack.c.bf16 %v442_v49, %v438_v48  ;;  %v437_v55 = vld [vmem:[#allocation2 + $0x100] sm:$0xff]  ;;  %v439_v57 = vld [vmem:[#allocation2 + $0x110] sm:$0xff]  ;;  %v1410_v58 = vpack.c.bf16 %v444_v51, %v440_v50  ;;  %v446_v60 = vld [vmem:[#allocation2 + $0x148] sm:$0xff] }
  0x70   : > { %1373 = vmatpush1.bf16.msra.mxu0 %v1372_v36  ;;  %v441_v56 = vld [vmem:[#allocation2 + $0x120] sm:$0xff]  ;;  %v443_v59 = vld [vmem:[#allocation2 + $0x130] sm:$0xff]  ;;  %v450_v61 = vld [vmem:[#allocation2 + $0x168] sm:$0xff] }
  0x71   : > { %1405 = vmatpush1.bf16.msra.mxu1 %v1404_v40  ;;  %1375 = vmatprep.subr.bf16.mxu0 %v1374_v41  ;;  %v448_v62 = vld [vmem:[#allocation2 + $0x158] sm:$0xff]  ;;  %v1380_v0 = vpack.c.bf16 %v441_v56, %v437_v55  ;;  %v1412_v1 = vpack.c.bf16 %v443_v59, %v439_v57  ;;  %v1382_v2 = vpack.c.bf16 %v450_v61, %v446_v60  ;;  %v445_v3 = vld [vmem:[#allocation2 + $0x140] sm:$0xff]  ;;  %v447_v5 = vld [vmem:[#allocation2 + $0x150] sm:$0xff] }
  0x72   : > { %1407 = vmatprep.subr.bf16.mxu1 %v1406_v45  ;;  %v452_v63 = vld [vmem:[#allocation2 + $0x178] sm:$0xff]  ;;  %v449_v4 = vld [vmem:[#allocation2 + $0x160] sm:$0xff]  ;;  %v451_v7 = vld [vmem:[#allocation2 + $0x170] sm:$0xff] }
  0x73   : > { %v1414_v6 = vpack.c.bf16 %v452_v63, %v448_v62  ;;  %v454_v9 = vld [vmem:[#allocation2 + $0x188] sm:$0xff]  ;;  %v456_v11 = vld [vmem:[#allocation2 + $0x198] sm:$0xff]  ;;  %v1384_v13 = vpack.c.bf16 %v449_v4, %v445_v3  ;;  %v1416_v14 = vpack.c.bf16 %v451_v7, %v447_v5  ;;  %v453_v16 = vld [vmem:[#allocation2 + $0x180] sm:$0xff] }
  0x74   : > { %1377 = vmatpush1.bf16.msra.mxu0 %v1376_v52  ;;  %v458_v10 = vld [vmem:[#allocation2 + $0x1a8] sm:$0xff]  ;;  %v460_v12 = vld [vmem:[#allocation2 + $0x1b8] sm:$0xff]  ;;  %v457_v17 = vld [vmem:[#allocation2 + $0x1a0] sm:$0xff] }
  0x75   : > { %1409 = vmatpush1.bf16.msra.mxu1 %v1408_v53  ;;  %1379 = vmatprep.subr.bf16.mxu0 %v1378_v54  ;;  %v1386_v15 = vpack.c.bf16 %v458_v10, %v454_v9  ;;  %v455_v18 = vld [vmem:[#allocation2 + $0x190] sm:$0xff]  ;;  %v1418_v19 = vpack.c.bf16 %v460_v12, %v456_v11  ;;  %v462_v21 = vld [vmem:[#allocation2 + $0x1c8] sm:$0xff]  ;;  %v464_v23 = vld [vmem:[#allocation2 + $0x1d8] sm:$0xff]  ;;  %v1388_v25 = vpack.c.bf16 %v457_v17, %v453_v16 }
  0x76   : > { %1411 = vmatprep.subr.bf16.mxu1 %v1410_v58  ;;  %v459_v20 = vld [vmem:[#allocation2 + $0x1b0] sm:$0xff]  ;;  %v466_v22 = vld [vmem:[#allocation2 + $0x1e8] sm:$0xff]  ;;  %v468_v24 = vld [vmem:[#allocation2 + $0x1f8] sm:$0xff] }
  0x77   : > { %v1420_v26 = vpack.c.bf16 %v459_v20, %v455_v18  ;;  %v1390_v27 = vpack.c.bf16 %v466_v22, %v462_v21  ;;  %v461_v28 = vld [vmem:[#allocation2 + $0x1c0] sm:$0xff]  ;;  %v463_v30 = vld [vmem:[#allocation2 + $0x1d0] sm:$0xff]  ;;  %v1422_v31 = vpack.c.bf16 %v468_v24, %v464_v23  ;;  %v342_v33 = vld [vmem:[%s2232_s1 + $0x8] sm:$0xff] }
  0x78   : > { %1381 = vmatpush1.bf16.msra.mxu0 %v1380_v0  ;;  %v465_v29 = vld [vmem:[#allocation2 + $0x1e0] sm:$0xff]  ;;  %v467_v32 = vld [vmem:[#allocation2 + $0x1f0] sm:$0xff]  ;;  %v346_v34 = vld [vmem:[%s2232_s1 + $0x28] sm:$0xff] }
  0x79   : > { %1413 = vmatpush1.bf16.msra.mxu1 %v1412_v1  ;;  %1383 = vmatprep.subr.bf16.mxu0 %v1382_v2  ;;  %v344_v35 = vld [vmem:[%s2232_s1 + $0x18] sm:$0xff]  ;;  %v1392_v37 = vpack.c.bf16 %v465_v29, %v461_v28  ;;  %v1424_v38 = vpack.c.bf16 %v467_v32, %v463_v30  ;;  %v1426_v39 = vpack.c.bf16 %v346_v34, %v342_v33  ;;  %v341_v40 = vld [vmem:[%s2232_s1] sm:$0xff]  ;;  %v343_v42 = vld [vmem:[%s2232_s1 + $0x10] sm:$0xff] }
  0x7a   : > { %1415 = vmatprep.subr.bf16.mxu1 %v1414_v6  ;;  %v348_v36 = vld [vmem:[%s2232_s1 + $0x38] sm:$0xff]  ;;  %v345_v41 = vld [vmem:[%s2232_s1 + $0x20] sm:$0xff]  ;;  %v347_v44 = vld [vmem:[%s2232_s1 + $0x30] sm:$0xff] }
  0x7b   : > { %v1458_v43 = vpack.c.bf16 %v348_v36, %v344_v35  ;;  %v350_v45 = vld [vmem:[%s2232_s1 + $0x48] sm:$0xff]  ;;  %v352_v47 = vld [vmem:[%s2232_s1 + $0x58] sm:$0xff]  ;;  %v339_v49 = vld [vmem:[%s2238_s7] sm:$0xff]  ;;  %v1428_v50 = vpack.c.bf16 %v345_v41, %v341_v40  ;;  %v1460_v51 = vpack.c.bf16 %v347_v44, %v343_v42 }
  0x7c   : > { %1385 = vmatpush1.bf16.msra.mxu0 %v1384_v13  ;;  %v354_v46 = vld [vmem:[%s2232_s1 + $0x68] sm:$0xff]  ;;  %v356_v48 = vld [vmem:[%s2232_s1 + $0x78] sm:$0xff]  ;;  %v349_v53 = vld [vmem:[%s2232_s1 + $0x40] sm:$0xff] }
  0x7d   : > { %1417 = vmatpush1.bf16.msra.mxu1 %v1416_v14  ;;  %1387 = vmatprep.subr.bf16.mxu0 %v1386_v15  ;;  %v1430_v52 = vpack.c.bf16 %v354_v46, %v350_v45  ;;  %v353_v54 = vld [vmem:[%s2232_s1 + $0x60] sm:$0xff]  ;;  %v351_v55 = vld [vmem:[%s2232_s1 + $0x50] sm:$0xff]  ;;  %v1462_v56 = vpack.c.bf16 %v356_v48, %v352_v47  ;;  %v358_v58 = vld [vmem:[%s2232_s1 + $0x88] sm:$0xff] }
  0x7e   : > { %1419 = vmatprep.subr.bf16.mxu1 %v1418_v19  ;;  %v355_v57 = vld [vmem:[%s2232_s1 + $0x70] sm:$0xff]  ;;  %v362_v59 = vld [vmem:[%s2232_s1 + $0xa8] sm:$0xff]  ;;  %v360_v60 = vld [vmem:[%s2232_s1 + $0x98] sm:$0xff]  ;;  %v1432_v62 = vpack.c.bf16 %v353_v54, %v349_v53 }
  0x7f   : > { %v364_v61 = vld [vmem:[%s2232_s1 + $0xb8] sm:$0xff]  ;;  %v1464_v63 = vpack.c.bf16 %v355_v57, %v351_v55  ;;  %v1434_v0 = vpack.c.bf16 %v362_v59, %v358_v58  ;;  %v357_v1 = vld [vmem:[%s2232_s1 + $0x80] sm:$0xff]  ;;  %v359_v3 = vld [vmem:[%s2232_s1 + $0x90] sm:$0xff] }
  0x80   : > { %1389 = vmatpush1.bf16.msra.mxu0 %v1388_v25  ;;  %v361_v2 = vld [vmem:[%s2232_s1 + $0xa0] sm:$0xff]  ;;  %v1466_v4 = vpack.c.bf16 %v364_v61, %v360_v60  ;;  %v363_v5 = vld [vmem:[%s2232_s1 + $0xb0] sm:$0xff]  ;;  %v366_v6 = vld [vmem:[%s2232_s1 + $0xc8] sm:$0xff] }
  0x81   : > { %1421 = vmatpush1.bf16.msra.mxu1 %v1420_v26  ;;  %1391 = vmatprep.subr.bf16.mxu0 %v1390_v27  ;;  %v370_v7 = vld [vmem:[%s2232_s1 + $0xe8] sm:$0xff]  ;;  %v368_v9 = vld [vmem:[%s2232_s1 + $0xd8] sm:$0xff]  ;;  %v1436_v11 = vpack.c.bf16 %v361_v2, %v357_v1  ;;  %v1468_v12 = vpack.c.bf16 %v363_v5, %v359_v3  ;;  %v365_v14 = vld [vmem:[%s2232_s1 + $0xc0] sm:$0xff] }
  0x82   : > { %1423 = vmatprep.subr.bf16.mxu1 %v1422_v31  ;;  %v372_v10 = vld [vmem:[%s2232_s1 + $0xf8] sm:$0xff]  ;;  %v1438_v13 = vpack.c.bf16 %v370_v7, %v366_v6  ;;  %v369_v15 = vld [vmem:[%s2232_s1 + $0xe0] sm:$0xff]  ;;  %v367_v16 = vld [vmem:[%s2232_s1 + $0xd0] sm:$0xff] }
  0x83   : > { %v1470_v17 = vpack.c.bf16 %v372_v10, %v368_v9  ;;  %v371_v18 = vld [vmem:[%s2232_s1 + $0xf0] sm:$0xff]  ;;  %v374_v19 = vld [vmem:[%s2232_s1 + $0x108] sm:$0xff]  ;;  %v376_v21 = vld [vmem:[%s2232_s1 + $0x118] sm:$0xff]  ;;  %v1440_v23 = vpack.c.bf16 %v369_v15, %v365_v14 }
  0x84   : > { %1393 = vmatpush1.bf16.msra.mxu0 %v1392_v37  ;;  %v378_v20 = vld [vmem:[%s2232_s1 + $0x128] sm:$0xff]  ;;  %v380_v22 = vld [vmem:[%s2232_s1 + $0x138] sm:$0xff]  ;;  %v1472_v24 = vpack.c.bf16 %v371_v18, %v367_v16  ;;  %v373_v26 = vld [vmem:[%s2232_s1 + $0x100] sm:$0xff] }
  0x85   : > { %1425 = vmatpush1.bf16.msra.mxu1 %v1424_v38  ;;  %1427 = vmatprep.subr.bf16.mxu0 %v1426_v39  ;;  %v1442_v25 = vpack.c.bf16 %v378_v20, %v374_v19  ;;  %v377_v27 = vld [vmem:[%s2232_s1 + $0x120] sm:$0xff]  ;;  %v375_v28 = vld [vmem:[%s2232_s1 + $0x110] sm:$0xff]  ;;  %v1474_v29 = vpack.c.bf16 %v380_v22, %v376_v21  ;;  %v382_v31 = vld [vmem:[%s2232_s1 + $0x148] sm:$0xff] }
  0x86   : > { %1459 = vmatprep.subr.bf16.mxu1 %v1458_v43  ;;  %v379_v30 = vld [vmem:[%s2232_s1 + $0x130] sm:$0xff]  ;;  %v386_v32 = vld [vmem:[%s2232_s1 + $0x168] sm:$0xff]  ;;  %v384_v33 = vld [vmem:[%s2232_s1 + $0x158] sm:$0xff]  ;;  %v1444_v35 = vpack.c.bf16 %v377_v27, %v373_v26 }
  0x87   : > { %535 = vmatmul.mubr.f32.vlgmr.msra.gmra.mrb[0].mxu0 %v339_v49  ;;  %v388_v34 = vld [vmem:[%s2232_s1 + $0x178] sm:$0xff]  ;;  %v1476_v36 = vpack.c.bf16 %v379_v30, %v375_v28  ;;  %v1446_v37 = vpack.c.bf16 %v386_v32, %v382_v31  ;;  %v381_v38 = vld [vmem:[%s2232_s1 + $0x140] sm:$0xff]  ;;  %v383_v40 = vld [vmem:[%s2232_s1 + $0x150] sm:$0xff] }
  0x88   : > { %606 = vmatmul.mubr.f32.vlgmr.msra.gmra.mrb[0].mxu1 %v339_v49  ;;  %1429 = vmatpush1.bf16.msra.mxu0 %v1428_v50  ;;  %v385_v39 = vld [vmem:[%s2232_s1 + $0x160] sm:$0xff]  ;;  %v1478_v41 = vpack.c.bf16 %v388_v34, %v384_v33  ;;  %v387_v42 = vld [vmem:[%s2232_s1 + $0x170] sm:$0xff]  ;;  %v390_v43 = vld [vmem:[%s2232_s1 + $0x188] sm:$0xff] }
  0x89   : > { %1461 = vmatpush1.bf16.msra.mxu1 %v1460_v51  ;;  %1431 = vmatprep.subr.bf16.mxu0 %v1430_v52  ;;  %v394_v44 = vld [vmem:[%s2232_s1 + $0x1a8] sm:$0xff]  ;;  %v392_v45 = vld [vmem:[%s2232_s1 + $0x198] sm:$0xff]  ;;  %v1448_v47 = vpack.c.bf16 %v385_v39, %v381_v38  ;;  %v1480_v48 = vpack.c.bf16 %v387_v42, %v383_v40  ;;  %v389_v50 = vld [vmem:[%s2232_s1 + $0x180] sm:$0xff] }
  0x8a   : > { %1463 = vmatprep.subr.bf16.mxu1 %v1462_v56  ;;  %676 = vmatprep.mubr.f32.mxu0 %v1807_v8  ;;  %v396_v46 = vld [vmem:[%s2232_s1 + $0x1b8] sm:$0xff]  ;;  %v1450_v49 = vpack.c.bf16 %v394_v44, %v390_v43  ;;  %v393_v51 = vld [vmem:[%s2232_s1 + $0x1a0] sm:$0xff]  ;;  %v391_v52 = vld [vmem:[%s2232_s1 + $0x190] sm:$0xff] }
  0x8b   : > { %747 = vmatprep.mubr.f32.mxu1 %v1807_v8  ;;  %v1482_v53 = vpack.c.bf16 %v396_v46, %v392_v45  ;;  %v395_v54 = vld [vmem:[%s2232_s1 + $0x1b0] sm:$0xff]  ;;  %v398_v55 = vld [vmem:[%s2232_s1 + $0x1c8] sm:$0xff]  ;;  %v400_v57 = vld [vmem:[%s2232_s1 + $0x1d8] sm:$0xff]  ;;  %v1452_v59 = vpack.c.bf16 %v393_v51, %v389_v50 }
  0x8c   : > { %1433 = vmatpush1.bf16.msra.mxu0 %v1432_v62  ;;  %v402_v56 = vld [vmem:[%s2232_s1 + $0x1e8] sm:$0xff]  ;;  %v404_v58 = vld [vmem:[%s2232_s1 + $0x1f8] sm:$0xff]  ;;  %v1484_v60 = vpack.c.bf16 %v395_v54, %v391_v52  ;;  %v397_v62 = vld [vmem:[%s2232_s1 + $0x1c0] sm:$0xff] }
  0x8d   : > { %1465 = vmatpush1.bf16.msra.mxu1 %v1464_v63  ;;  %1435 = vmatprep.subr.bf16.mxu0 %v1434_v0  ;;  %v1454_v61 = vpack.c.bf16 %v402_v56, %v398_v55  ;;  %v401_v63 = vld [vmem:[%s2232_s1 + $0x1e0] sm:$0xff]  ;;  %v399_v0 = vld [vmem:[%s2232_s1 + $0x1d0] sm:$0xff]  ;;  %v1486_v1 = vpack.c.bf16 %v404_v58, %v400_v57  ;;  %v874_v3 = vld [vmem:[#allocation6 + $0x8] sm:$0xff] }
  0x8e   : > { %1467 = vmatprep.subr.bf16.mxu1 %v1466_v4  ;;  %v403_v2 = vld [vmem:[%s2232_s1 + $0x1f0] sm:$0xff]  ;;  %v878_v4 = vld [vmem:[#allocation6 + $0x28] sm:$0xff]  ;;  %v876_v5 = vld [vmem:[#allocation6 + $0x18] sm:$0xff]  ;;  %v1456_v7 = vpack.c.bf16 %v401_v63, %v397_v62 }
  0x8f   : > { %v880_v6 = vld [vmem:[#allocation6 + $0x38] sm:$0xff]  ;;  %v1488_v9 = vpack.c.bf16 %v403_v2, %v399_v0  ;;  %v1490_v10 = vpack.c.bf16 %v878_v4, %v874_v3  ;;  %v879_v15 = vld [vmem:[#allocation6 + $0x30] sm:$0xff]  ;;  %v882_v16 = vld [vmem:[#allocation6 + $0x48] sm:$0xff] }
  0x90   : > { %1437 = vmatpush1.bf16.msra.mxu0 %v1436_v11  ;;  %v873_v11 = vld [vmem:[#allocation6] sm:$0xff]  ;;  %v1522_v14 = vpack.c.bf16 %v880_v6, %v876_v5  ;;  %v884_v18 = vld [vmem:[#allocation6 + $0x58] sm:$0xff]  ;;  %v883_v26 = vld [vmem:[#allocation6 + $0x50] sm:$0xff] }
  0x91   : > { %1469 = vmatpush1.bf16.msra.mxu1 %v1468_v12  ;;  %1439 = vmatprep.subr.bf16.mxu0 %v1438_v13  ;;  %v877_v12 = vld [vmem:[#allocation6 + $0x20] sm:$0xff]  ;;  %v875_v13 = vld [vmem:[#allocation6 + $0x10] sm:$0xff]  ;;  %v888_v19 = vld [vmem:[#allocation6 + $0x78] sm:$0xff] }
  0x92   : > { %1471 = vmatprep.subr.bf16.mxu1 %v1470_v17  ;;  %v886_v17 = vld [vmem:[#allocation6 + $0x68] sm:$0xff]  ;;  %v338_v20 = vld [vmem:[%s1975_s24] sm:$0xff]  ;;  %v1492_v21 = vpack.c.bf16 %v877_v12, %v873_v11  ;;  %v1524_v22 = vpack.c.bf16 %v879_v15, %v875_v13  ;;  %v1526_v27 = vpack.c.bf16 %v888_v19, %v884_v18  ;;  %v887_v28 = vld [vmem:[#allocation6 + $0x70] sm:$0xff] }
  0x93   : > { %v894_v30 = vld [vmem:[#allocation6 + $0xa8] sm:$0xff]  ;;  %v892_v31 = vld [vmem:[#allocation6 + $0x98] sm:$0xff]  ;;  %v1528_v34 = vpack.c.bf16 %v887_v28, %v883_v26  ;;  %v891_v38 = vld [vmem:[#allocation6 + $0x90] sm:$0xff] }
  0x94   : > { %1441 = vmatpush1.bf16.msra.mxu0 %v1440_v23  ;;  %v1494_v23 = vpack.c.bf16 %v886_v17, %v882_v16  ;;  %v896_v32 = vld [vmem:[#allocation6 + $0xb8] sm:$0xff]  ;;  %v895_v40 = vld [vmem:[#allocation6 + $0xb0] sm:$0xff]  ;;  %v902_v42 = vld [vmem:[#allocation6 + $0xe8] sm:$0xff] }
  0x95   : > { %1473 = vmatpush1.bf16.msra.mxu1 %v1472_v24  ;;  %1443 = vmatprep.subr.bf16.mxu0 %v1442_v25  ;;  %v881_v24 = vld [vmem:[#allocation6 + $0x40] sm:$0xff]  ;;  %v1530_v39 = vpack.c.bf16 %v896_v32, %v892_v31  ;;  %v900_v43 = vld [vmem:[#allocation6 + $0xd8] sm:$0xff]  ;;  %v1532_v46 = vpack.c.bf16 %v895_v40, %v891_v38  ;;  %v899_v50 = vld [vmem:[#allocation6 + $0xd0] sm:$0xff] }
  0x96   : > { %1475 = vmatprep.subr.bf16.mxu1 %v1474_v29  ;;  %v885_v25 = vld [vmem:[#allocation6 + $0x60] sm:$0xff]  ;;  %v890_v29 = vld [vmem:[#allocation6 + $0x88] sm:$0xff]  ;;  %v904_v44 = vld [vmem:[#allocation6 + $0xf8] sm:$0xff] }
  0x97   : > { %v1496_v33 = vpack.c.bf16 %v885_v25, %v881_v24  ;;  %v1534_v51 = vpack.c.bf16 %v904_v44, %v900_v43  ;;  %v903_v52 = vld [vmem:[#allocation6 + $0xf0] sm:$0xff]  ;;  %v910_v54 = vld [vmem:[#allocation6 + $0x128] sm:$0xff]  ;;  %v908_v55 = vld [vmem:[#allocation6 + $0x118] sm:$0xff] }
  0x98   : > { %1445 = vmatpush1.bf16.msra.mxu0 %v1444_v35  ;;  %v1498_v35 = vpack.c.bf16 %v894_v30, %v890_v29  ;;  %v912_v56 = vld [vmem:[#allocation6 + $0x138] sm:$0xff]  ;;  %v1536_v58 = vpack.c.bf16 %v903_v52, %v899_v50  ;;  %v909_v62 = vld [vmem:[#allocation6 + $0x120] sm:$0xff]  ;;  %v907_v63 = vld [vmem:[#allocation6 + $0x110] sm:$0xff] }
  0x99   : > { %1477 = vmatpush1.bf16.msra.mxu1 %v1476_v36  ;;  %1447 = vmatprep.subr.bf16.mxu0 %v1446_v37  ;;  %v889_v36 = vld [vmem:[#allocation6 + $0x80] sm:$0xff]  ;;  %v914_v3 = vld [vmem:[#allocation6 + $0x148] sm:$0xff]  ;;  %v916_v5 = vld [vmem:[#allocation6 + $0x158] sm:$0xff] }
  0x9a   : > { %1479 = vmatprep.subr.bf16.mxu1 %v1478_v41  ;;  %v893_v37 = vld [vmem:[#allocation6 + $0xa0] sm:$0xff]  ;;  %v898_v41 = vld [vmem:[#allocation6 + $0xc8] sm:$0xff]  ;;  %v915_v13 = vld [vmem:[#allocation6 + $0x150] sm:$0xff] }
  0x9b   : > { %v1500_v45 = vpack.c.bf16 %v893_v37, %v889_v36  ;;  %v918_v4 = vld [vmem:[#allocation6 + $0x168] sm:$0xff]  ;;  %v924_v18 = vld [vmem:[#allocation6 + $0x198] sm:$0xff]  ;;  %v923_v25 = vld [vmem:[#allocation6 + $0x190] sm:$0xff] }
  0x9c   : > { %1449 = vmatpush1.bf16.msra.mxu0 %v1448_v47  ;;  %v1502_v47 = vpack.c.bf16 %v902_v42, %v898_v41  ;;  %v1510_v6 = vpack.c.bf16 %v918_v4, %v914_v3  ;;  %v922_v16 = vld [vmem:[#allocation6 + $0x188] sm:$0xff]  ;;  %v927_v26 = vld [vmem:[#allocation6 + $0x1b0] sm:$0xff]  ;;  %v932_v30 = vld [vmem:[#allocation6 + $0x1d8] sm:$0xff] }
  0x9d   : > { %1481 = vmatpush1.bf16.msra.mxu1 %v1480_v48  ;;  %1451 = vmatprep.subr.bf16.mxu0 %v1450_v49  ;;  %v897_v48 = vld [vmem:[#allocation6 + $0xc0] sm:$0xff]  ;;  %v926_v17 = vld [vmem:[#allocation6 + $0x1a8] sm:$0xff]  ;;  %v936_v32 = vld [vmem:[#allocation6 + $0x1f8] sm:$0xff] }
  0x9e   : > { %1483 = vmatprep.subr.bf16.mxu1 %v1482_v53  ;;  %v901_v49 = vld [vmem:[#allocation6 + $0xe0] sm:$0xff]  ;;  %v906_v53 = vld [vmem:[#allocation6 + $0x108] sm:$0xff]  ;;  %v1514_v19 = vpack.c.bf16 %v926_v17, %v922_v16  ;;  %v931_v37 = vld [vmem:[#allocation6 + $0x1d0] sm:$0xff] }
  0x9f   : > { %v1504_v57 = vpack.c.bf16 %v901_v49, %v897_v48  ;;  %v930_v28 = vld [vmem:[#allocation6 + $0x1c8] sm:$0xff]  ;;  %v935_v38 = vld [vmem:[#allocation6 + $0x1f0] sm:$0xff]  ;;  %v812_v42 = vld [vmem:[#allocation4 + $0x18] sm:$0xff] }
  0xa0   : > { %1453 = vmatpush1.bf16.msra.mxu0 %v1452_v59  ;;  %v1506_v59 = vpack.c.bf16 %v910_v54, %v906_v53  ;;  %v934_v29 = vld [vmem:[#allocation6 + $0x1e8] sm:$0xff]  ;;  %v816_v44 = vld [vmem:[#allocation4 + $0x38] sm:$0xff]  ;;  %v811_v49 = vld [vmem:[#allocation4 + $0x10] sm:$0xff] }
  0xa1   : > { %1485 = vmatpush1.bf16.msra.mxu1 %v1484_v60  ;;  %1455 = vmatprep.subr.bf16.mxu0 %v1454_v61  ;;  %v1538_v60 = vpack.c.bf16 %v912_v56, %v908_v55  ;;  %v905_v61 = vld [vmem:[#allocation6 + $0x100] sm:$0xff]  ;;  %v1518_v31 = vpack.c.bf16 %v934_v29, %v930_v28  ;;  %v810_v40 = vld [vmem:[#allocation4 + $0x8] sm:$0xff]  ;;  %v815_v50 = vld [vmem:[#allocation4 + $0x30] sm:$0xff] }
  0xa2   : > { %1487 = vmatprep.subr.bf16.mxu1 %v1486_v1  ;;  %v1508_v0 = vpack.c.bf16 %v909_v62, %v905_v61  ;;  %v911_v1 = vld [vmem:[#allocation6 + $0x130] sm:$0xff]  ;;  %v814_v41 = vld [vmem:[#allocation4 + $0x28] sm:$0xff]  ;;  %v1588_v52 = vpack.c.bf16 %v815_v50, %v811_v49  ;;  %v820_v55 = vld [vmem:[#allocation4 + $0x58] sm:$0xff] }
  0xa3   : > { %v1540_v2 = vpack.c.bf16 %v911_v1, %v907_v63  ;;  %v1554_v43 = vpack.c.bf16 %v814_v41, %v810_v40  ;;  %v818_v53 = vld [vmem:[#allocation4 + $0x48] sm:$0xff]  ;;  %v819_v62 = vld [vmem:[#allocation4 + $0x50] sm:$0xff]  ;;  %v828_v3 = vld [vmem:[#allocation4 + $0x98] sm:$0xff] }
  0xa4   : > { %1457 = vmatpush1.bf16.msra.mxu0 %v1456_v7  ;;  %v920_v7 = vld [vmem:[#allocation6 + $0x178] sm:$0xff]  ;;  %v822_v54 = vld [vmem:[#allocation4 + $0x68] sm:$0xff]  ;;  %v823_v63 = vld [vmem:[#allocation4 + $0x70] sm:$0xff] }
  0xa5   : > { %1489 = vmatpush1.bf16.msra.mxu1 %v1488_v9  ;;  %1491 = vmatprep.subr.bf16.mxu0 %v1490_v10  ;;  %v913_v9 = vld [vmem:[#allocation6 + $0x140] sm:$0xff]  ;;  %v1542_v11 = vpack.c.bf16 %v920_v7, %v916_v5  ;;  %v1558_v56 = vpack.c.bf16 %v822_v54, %v818_v53  ;;  %v826_v1 = vld [vmem:[#allocation4 + $0x88] sm:$0xff]  ;;  %v832_v5 = vld [vmem:[#allocation4 + $0xb8] sm:$0xff] }
  0xa6   : > { %1523 = vmatprep.subr.bf16.mxu1 %v1522_v14  ;;  %v917_v10 = vld [vmem:[#allocation6 + $0x160] sm:$0xff]  ;;  %v919_v14 = vld [vmem:[#allocation6 + $0x170] sm:$0xff]  ;;  %v840_v17 = vld [vmem:[#allocation4 + $0xf8] sm:$0xff] }
  0xa7   : > { %677 = vmatmul.mubr.f32.vlgmr.msra.gmra.mrb[0].mxu0 %v338_v20  ;;  %v1512_v12 = vpack.c.bf16 %v917_v10, %v913_v9  ;;  %v1544_v15 = vpack.c.bf16 %v919_v14, %v915_v13  ;;  %v829_v7 = vld [vmem:[#allocation4 + $0xa0] sm:$0xff]  ;;  %v1594_v9 = vpack.c.bf16 %v832_v5, %v828_v3  ;;  %v834_v14 = vld [vmem:[#allocation4 + $0xc8] sm:$0xff]  ;;  %v844_v28 = vld [vmem:[#allocation4 + $0x118] sm:$0xff] }
  0xa8   : > { %748 = vmatmul.mubr.f32.vlgmr.msra.gmra.mrb[0].mxu1 %v338_v20  ;;  %1493 = vmatpush1.bf16.msra.mxu0 %v1492_v21  ;;  %v928_v20 = vld [vmem:[#allocation6 + $0x1b8] sm:$0xff]  ;;  %v921_v21 = vld [vmem:[#allocation6 + $0x180] sm:$0xff]  ;;  %v862_v50 = vld [vmem:[#allocation4 + $0x1a8] sm:$0xff] }
  0xa9   : > { %1525 = vmatpush1.bf16.msra.mxu1 %v1524_v22  ;;  %1495 = vmatprep.subr.bf16.mxu0 %v1494_v23  ;;  %v925_v22 = vld [vmem:[#allocation6 + $0x1a0] sm:$0xff]  ;;  %v1546_v23 = vpack.c.bf16 %v928_v20, %v924_v18  ;;  %v848_v29 = vld [vmem:[#allocation4 + $0x138] sm:$0xff]  ;;  %v867_v5 = vld [vmem:[#allocation4 + $0x1d0] sm:$0xff] }
  0xaa   : > { %1527 = vmatprep.subr.bf16.mxu1 %v1526_v27  ;;  %1002 = vmatprep.mubr.f32.mxu0 %v1807_v8  ;;  %v1516_v24 = vpack.c.bf16 %v925_v22, %v921_v21  ;;  %v1548_v27 = vpack.c.bf16 %v927_v26, %v923_v25  ;;  %v833_v18 = vld [vmem:[#allocation4 + $0xc0] sm:$0xff]  ;;  %v835_v22 = vld [vmem:[#allocation4 + $0xd0] sm:$0xff]  ;;  %v842_v25 = vld [vmem:[#allocation4 + $0x108] sm:$0xff] }
  0xab   : > { %1073 = vmatprep.mubr.f32.mxu1 %v1807_v8  ;;  %v846_v26 = vld [vmem:[#allocation4 + $0x128] sm:$0xff]  ;;  %v856_v41 = vld [vmem:[#allocation4 + $0x178] sm:$0xff] }
  0xac   : > { %1497 = vmatpush1.bf16.msra.mxu0 %v1496_v33  ;;  %v929_v33 = vld [vmem:[#allocation6 + $0x1c0] sm:$0xff] }
  0xad   : > { %1529 = vmatpush1.bf16.msra.mxu1 %v1528_v34  ;;  %1499 = vmatprep.subr.bf16.mxu0 %v1498_v35  ;;  %v933_v34 = vld [vmem:[#allocation6 + $0x1e0] sm:$0xff]  ;;  %v1550_v35 = vpack.c.bf16 %v936_v32, %v932_v30 }
  0xae   : > { %1531 = vmatprep.subr.bf16.mxu1 %v1530_v39  ;;  %v1520_v36 = vpack.c.bf16 %v933_v34, %v929_v33  ;;  %v1552_v39 = vpack.c.bf16 %v935_v38, %v931_v37  ;;  %v841_v30 = vld [vmem:[#allocation4 + $0x100] sm:$0xff]  ;;  %v843_v33 = vld [vmem:[#allocation4 + $0x110] sm:$0xff]  ;;  %v850_v37 = vld [vmem:[#allocation4 + $0x148] sm:$0xff] }
  0xaf   : > { %v845_v32 = vld [vmem:[#allocation4 + $0x120] sm:$0xff]  ;;  %v847_v34 = vld [vmem:[#allocation4 + $0x130] sm:$0xff]  ;;  %v854_v38 = vld [vmem:[#allocation4 + $0x168] sm:$0xff] }
  0xb0   : > { %1501 = vmatpush1.bf16.msra.mxu0 %v1500_v45  ;;  %v809_v45 = vld [vmem:[#allocation4] sm:$0xff]  ;;  %v1574_v40 = vpack.c.bf16 %v854_v38, %v850_v37 }
  0xb1   : > { %1533 = vmatpush1.bf16.msra.mxu1 %v1532_v46  ;;  %1503 = vmatprep.subr.bf16.mxu0 %v1502_v47  ;;  %v813_v46 = vld [vmem:[#allocation4 + $0x20] sm:$0xff]  ;;  %v1586_v47 = vpack.c.bf16 %v816_v44, %v812_v42 }
  0xb2   : > { %1535 = vmatprep.subr.bf16.mxu1 %v1534_v51  ;;  %v1556_v48 = vpack.c.bf16 %v813_v46, %v809_v45  ;;  %v1353_v51 = vld [vmem:[%s2238_s7 + $0x8] sm:$0xff]  ;;  %v849_v42 = vld [vmem:[#allocation4 + $0x140] sm:$0xff]  ;;  %v851_v46 = vld [vmem:[#allocation4 + $0x150] sm:$0xff] }
  0xb3   : > { %v340_v37 = vld [vmem:[%s2239_s8] sm:$0xff] }
  0xb4   : > { %1505 = vmatpush1.bf16.msra.mxu0 %v1504_v57  ;;  %v824_v57 = vld [vmem:[#allocation4 + $0x78] sm:$0xff] }
  0xb5   : > { %1537 = vmatpush1.bf16.msra.mxu1 %v1536_v58  ;;  %1507 = vmatprep.subr.bf16.mxu0 %v1506_v59  ;;  %v817_v58 = vld [vmem:[#allocation4 + $0x40] sm:$0xff] }
  0xb6   : > { %1539 = vmatprep.subr.bf16.mxu1 %v1538_v60  ;;  %v821_v59 = vld [vmem:[#allocation4 + $0x60] sm:$0xff]  ;;  %v1590_v60 = vpack.c.bf16 %v824_v57, %v820_v55  ;;  %v859_v57 = vld [vmem:[#allocation4 + $0x190] sm:$0xff] }
  0xb7   : > { %v1560_v61 = vpack.c.bf16 %v821_v59, %v817_v58  ;;  %v857_v55 = vld [vmem:[#allocation4 + $0x180] sm:$0xff]  ;;  %v863_v59 = vld [vmem:[#allocation4 + $0x1b0] sm:$0xff] }
  0xb8   : > { %1509 = vmatpush1.bf16.msra.mxu0 %v1508_v0  ;;  %v1592_v0 = vpack.c.bf16 %v823_v63, %v819_v62  ;;  %v1612_v62 = vpack.c.bf16 %v863_v59, %v859_v57 }
  0xb9   : > { %1541 = vmatpush1.bf16.msra.mxu1 %v1540_v2  ;;  %1511 = vmatprep.subr.bf16.mxu0 %v1510_v6  ;;  %v830_v2 = vld [vmem:[#allocation4 + $0xa8] sm:$0xff]  ;;  %v825_v6 = vld [vmem:[#allocation4 + $0x80] sm:$0xff] }
  0xba   : > { %1543 = vmatprep.subr.bf16.mxu1 %v1542_v11  ;;  %v1562_v4 = vpack.c.bf16 %v830_v2, %v826_v1  ;;  %v1564_v10 = vpack.c.bf16 %v829_v7, %v825_v6  ;;  %v827_v11 = vld [vmem:[#allocation4 + $0x90] sm:$0xff]  ;;  %v872_v1 = vld [vmem:[#allocation4 + $0x1f8] sm:$0xff]  ;;  %v865_v2 = vld [vmem:[#allocation4 + $0x1c0] sm:$0xff] }
  0xbb   : > { %v871_v6 = vld [vmem:[#allocation4 + $0x1f0] sm:$0xff] }
  0xbc   : > { %1513 = vmatpush1.bf16.msra.mxu0 %v1512_v12  ;;  %v831_v12 = vld [vmem:[#allocation4 + $0xb0] sm:$0xff] }
  0xbd   : > { %1545 = vmatpush1.bf16.msra.mxu1 %v1544_v15  ;;  %1515 = vmatprep.subr.bf16.mxu0 %v1514_v19  ;;  %v1596_v13 = vpack.c.bf16 %v831_v12, %v827_v11  ;;  %v838_v15 = vld [vmem:[#allocation4 + $0xe8] sm:$0xff]  ;;  %v837_v19 = vld [vmem:[#allocation4 + $0xe0] sm:$0xff] }
  0xbe   : > { %1547 = vmatprep.subr.bf16.mxu1 %v1546_v23  ;;  %v1566_v16 = vpack.c.bf16 %v838_v15, %v834_v14  ;;  %v1568_v21 = vpack.c.bf16 %v837_v19, %v833_v18  ;;  %v839_v23 = vld [vmem:[#allocation4 + $0xf0] sm:$0xff] }
  0xc0   : > { %1517 = vmatpush1.bf16.msra.mxu0 %v1516_v24  ;;  %v1600_v24 = vpack.c.bf16 %v839_v23, %v835_v22 }
  0xc1   : > { %1549 = vmatpush1.bf16.msra.mxu1 %v1548_v27  ;;  %1519 = vmatprep.subr.bf16.mxu0 %v1518_v31  ;;  %v1570_v27 = vpack.c.bf16 %v846_v26, %v842_v25  ;;  %v1602_v31 = vpack.c.bf16 %v848_v29, %v844_v28 }
  0xc2   : > { %1551 = vmatprep.subr.bf16.mxu1 %v1550_v35  ;;  %v1572_v35 = vpack.c.bf16 %v845_v32, %v841_v30 }
  0xc4   : > { %1521 = vmatpush1.bf16.msra.mxu0 %v1520_v36  ;;  %v1604_v36 = vpack.c.bf16 %v847_v34, %v843_v33 }
  0xc5   : > { %1553 = vmatpush1.bf16.msra.mxu1 %v1552_v39  ;;  %1555 = vmatprep.subr.bf16.mxu0 %v1554_v43  ;;  %v852_v39 = vld [vmem:[#allocation4 + $0x158] sm:$0xff]  ;;  %v853_v43 = vld [vmem:[#allocation4 + $0x160] sm:$0xff] }
  0xc6   : > { %1587 = vmatprep.subr.bf16.mxu1 %v1586_v47  ;;  %v1606_v44 = vpack.c.bf16 %v856_v41, %v852_v39  ;;  %v1576_v45 = vpack.c.bf16 %v853_v43, %v849_v42  ;;  %v855_v47 = vld [vmem:[#allocation4 + $0x170] sm:$0xff] }
  0xc7   : > { %1003 = vmatmul.mubr.f32.vlgmr.msra.gmra.mrb[2].mxu0 %v1353_v51  ;;  %v1608_v49 = vpack.c.bf16 %v855_v47, %v851_v46  ;;  %v937_v47 = vld [vmem:[%s2237_s6] sm:$0xf] }
  0xc8   : > { %1074 = vmatmul.mubr.f32.vlgmr.msra.gmra.mrb[2].mxu1 %v1353_v51  ;;  %1557 = vmatpush1.bf16.msra.mxu0 %v1556_v48  ;;  %v858_v48 = vld [vmem:[#allocation4 + $0x188] sm:$0xff]  ;;  %v860_v51 = vld [vmem:[#allocation4 + $0x198] sm:$0xff] }
  0xc9   : > { %1589 = vmatpush1.bf16.msra.mxu1 %v1588_v52  ;;  %1144 = vmatprep.mubr.f32.mxu0 %v1807_v8  ;;  %v864_v52 = vld [vmem:[#allocation4 + $0x1b8] sm:$0xff]  ;;  %v1578_v53 = vpack.c.bf16 %v862_v50, %v858_v48 }
  0xca   : > { %1559 = vmatprep.subr.bf16.mxu0 %v1558_v56  ;;  %1215 = vmatprep.mubr.f32.mxu1 %v1807_v8  ;;  %v836_v8 = vld [vmem:[#allocation4 + $0xd8] sm:$0xff]  ;;  %v1610_v54 = vpack.c.bf16 %v864_v52, %v860_v51  ;;  %v861_v56 = vld [vmem:[#allocation4 + $0x1a0] sm:$0xff] }
  0xcb   : > { %1591 = vmatprep.subr.bf16.mxu1 %v1590_v60  ;;  %v1598_v20 = vpack.c.bf16 %v840_v17, %v836_v8  ;;  %v1580_v58 = vpack.c.bf16 %v861_v56, %v857_v55  ;;  %v866_v60 = vld [vmem:[#allocation4 + $0x1c8] sm:$0xff] }
  0xcc   : > { %1561 = vmatpush1.bf16.msra.mxu0 %v1560_v61  ;;  %v870_v61 = vld [vmem:[#allocation4 + $0x1e8] sm:$0xff] }
  0xcd   : > { %1593 = vmatpush1.bf16.msra.mxu1 %v1592_v0  ;;  %1563 = vmatprep.subr.bf16.mxu0 %v1562_v4  ;;  %v1582_v63 = vpack.c.bf16 %v870_v61, %v866_v60  ;;  %v868_v0 = vld [vmem:[#allocation4 + $0x1d8] sm:$0xff]  ;;  %v869_v4 = vld [vmem:[#allocation4 + $0x1e0] sm:$0xff] }
  0xce   : > { %1595 = vmatprep.subr.bf16.mxu1 %v1594_v9  ;;  %v1614_v3 = vpack.c.bf16 %v872_v1, %v868_v0  ;;  %v1584_v7 = vpack.c.bf16 %v869_v4, %v865_v2  ;;  %v1616_v9 = vpack.c.bf16 %v871_v6, %v867_v5  ;;  %v1354_v5 = vld [vmem:[%s2239_s8 + $0x8] sm:$0xff] }
  0xd0   : > { %1565 = vmatpush1.bf16.msra.mxu0 %v1564_v10  ;;  %v755_v10 = vlaneseq }
  0xd1   : > { %1597 = vmatpush1.bf16.msra.mxu1 %v1596_v13  ;;  %1567 = vmatprep.subr.bf16.mxu0 %v1566_v16  ;;  %v469_v13 = vld [vmem:[%s2234_s3] sm:$0xf] }
  0xd2   : > { %1599 = vmatprep.subr.bf16.mxu1 %v1598_v20  ;;  %v2198_v11 = vshrl.u32 %v755_v10, 7 }
  0xd4   : > { %1569 = vmatpush1.bf16.msra.mxu0 %v1568_v21  ;;  %v757_v12 = vsub.s32 0, %v2198_v11  ;;  %v761_v14 = vsub.s32 1, %v2198_v11  ;;  %v769_v17 = vsub.s32 3, %v2198_v11  ;;  %v765_v26 = vsub.s32 2, %v2198_v11 }
  0xd5   : > { %1601 = vmatpush1.bf16.msra.mxu1 %v1600_v24  ;;  %1571 = vmatprep.subr.bf16.mxu0 %v1570_v27 }
  0xd6   : > { %1603 = vmatprep.subr.bf16.mxu1 %v1602_v31  ;;  %v758_v15 = vrot.slane %v469_v13, %v757_v12  ;;  %v762_v8 = vrot.slane %v469_v13, %v761_v14  ;;  %v770_v25 = vrot.slane %v469_v13, %v769_v17  ;;  %v766_v28 = vrot.slane %v469_v13, %v765_v26 }
  0xd7   : > { %v1226_v48 = vrot.slane %v937_v47, %v757_v12  ;;  %v1234_v60 = vrot.slane %v937_v47, %v765_v26 }
  0xd8   : > { %1573 = vmatpush1.bf16.msra.mxu0 %v1572_v35 }
  0xd9   : > { %1605 = vmatpush1.bf16.msra.mxu1 %v1604_v36  ;;  %1575 = vmatprep.subr.bf16.mxu0 %v1574_v40 }
  0xda   : > { %1607 = vmatprep.subr.bf16.mxu1 %v1606_v44 }
  0xdc   : > { %1577 = vmatpush1.bf16.msra.mxu0 %v1576_v45 }
  0xdd   : > { %1609 = vmatpush1.bf16.msra.mxu1 %v1608_v49  ;;  %1579 = vmatprep.subr.bf16.mxu0 %v1578_v53  ;;  %v1230_v49 = vrot.slane %v937_v47, %v761_v14 }
  0xde   : > { %1611 = vmatprep.subr.bf16.mxu1 %v1610_v54 }
  0xe0   : > { %1581 = vmatpush1.bf16.msra.mxu0 %v1580_v58  ;;  %v1238_v58 = vrot.slane %v937_v47, %v769_v17 }
  0xe1   : > { %1613 = vmatpush1.bf16.msra.mxu1 %v1612_v62  ;;  %1583 = vmatprep.subr.bf16.mxu0 %v1582_v63 }
  0xe2   : > { %1615 = vmatprep.subr.bf16.mxu1 %v1614_v3 }
  0xe4   : > { %1585 = vmatpush1.bf16.msra.mxu0 %v1584_v7 }
  0xe5   : > { %1617 = vmatpush1.bf16.msra.mxu1 %v1616_v9 }
 0x17a   : > { %v678_v16 = vpop.f32.mrb[0].mxu0 }
 0x17b   : > { %v775_v18 = vadd.f32 %v758_v15, %v678_v16  ;;  %v749_v19 = vpop.f32.mrb[0].mxu1  ;;  %v680_v20 = vpop.f32.mrb[1].mxu0 }
 0x17c   : > { %v776_v21 = vadd.f32 %v762_v8, %v680_v20  ;;  %v751_v22 = vpop.f32.mrb[1].mxu1  ;;  %v777_v30 = vadd.f32 %v766_v28, %v749_v19 }
 0x17d   : > { %v1350_v23 = vmul.f32 -1.442695, %v775_v18  ;;  %v778_v27 = vadd.f32 %v770_v25, %v751_v22 }
 0x17e   : > { %v1351_v24 = vmul.f32 -1.442695, %v776_v21 }
 0x17f   : > { %1669 = vpow2.f32 %v1350_v23  ;;  %v1352_v29 = vmul.f32 -1.442695, %v778_v27 }
 0x180   : > { %1671 = vpow2.f32 %v1351_v24 }
 0x181   : > { %1673 = vpow2.f32 %v1352_v29 }
 0x182   : > { %1675 = vtanh.f32 %v777_v30 }
 0x189   : > { %v1670_v31 = vpop.eup %1669 }
 0x18a   : > { %v1672_v32 = vpop.eup %1671  ;;  %v782_v33 = vadd.f32 1.0, %v1670_v31 }
 0x18b   : > { %v788_v34 = vadd.f32 1.0, %v1672_v32  ;;  %v1674_v35 = vpop.eup %1673 }
 0x18c   : > { %1677 = vrcp.f32 %v782_v33  ;;  %v1676_v36 = vpop.eup %1675  ;;  %v795_v41 = vadd.f32 1.0, %v1674_v35 }
 0x18d   : > { %1679 = vrcp.f32 %v788_v34 }
 0x18e   : > { %1681 = vrcp.f32 %v795_v41 }
 0x196   : > { %v1678_v38 = vpop.eup %1677 }
 0x197   : > { %v1680_v39 = vpop.eup %1679  ;;  %v799_v40 = vmul.f32 %v1678_v38, %v1676_v36 }
 0x198   : > { %v798_v42 = vmul.f32 %v1680_v39, %v340_v37  ;;  %v1682_v44 = vpop.eup %1681 }
 0x19a   : > { %v800_v43 = vadd.f32 %v799_v40, %v798_v42 }
 0x19c   : > { %804 = vst [vmem:[%s2239_s8] sm:$0xff] %v800_v43  ;;  %1683 = vtanh.f32 %v800_v43 }
 0x1a6   : > { %v1684_v45 = vpop.eup %1683 }
 0x1a7   : > { %v802_v46 = vmul.f32 %v1684_v45, %v1682_v44 }
 0x1a9   : > { %803 = vst [vmem:[%s2238_s7] sm:$0xff] %v802_v46  ;;  %1145 = vmatmul.mubr.f32.vlgmr.msra.gmra.mrb[2].mxu0 %v802_v46  ;;  %1216 = vmatmul.mubr.f32.vlgmr.msra.gmra.mrb[2].mxu1 %v802_v46 }
 0x27c   : > { %v1146_v50 = vpop.f32.mrb[2].mxu0  ;;  %v1217_v51 = vpop.f32.mrb[2].mxu1 }
 0x27d   : > { %v1243_v52 = vadd.f32 %v1226_v48, %v1146_v50  ;;  %v1148_v53 = vpop.f32.mrb[3].mxu0  ;;  %v1219_v54 = vpop.f32.mrb[3].mxu1  ;;  %v1245_v62 = vadd.f32 %v1234_v60, %v1217_v51 }
 0x27e   : > { %v1244_v55 = vadd.f32 %v1230_v49, %v1148_v53  ;;  %v1246_v59 = vadd.f32 %v1238_v58, %v1219_v54 }
 0x27f   : > { %v1355_v56 = vmul.f32 -1.442695, %v1243_v52 }
 0x280   : > { %v1356_v57 = vmul.f32 -1.442695, %v1244_v55  ;;  %v1357_v61 = vmul.f32 -1.442695, %v1246_v59 }
 0x281   : > { %1685 = vpow2.f32 %v1355_v56 }
 0x282   : > { %1687 = vpow2.f32 %v1356_v57 }
 0x283   : > { %1689 = vpow2.f32 %v1357_v61 }
 0x284   : > { %1691 = vtanh.f32 %v1245_v62 }
 0x28b   : > { %v1686_v63 = vpop.eup %1685 }
 0x28c   : > { %v1688_v0 = vpop.eup %1687  ;;  %v1250_v1 = vadd.f32 1.0, %v1686_v63 }
 0x28d   : > { %v1256_v2 = vadd.f32 1.0, %v1688_v0  ;;  %v1690_v3 = vpop.eup %1689 }
 0x28e   : > { %1693 = vrcp.f32 %v1250_v1  ;;  %v1692_v4 = vpop.eup %1691  ;;  %v1263_v10 = vadd.f32 1.0, %v1690_v3 }
 0x28f   : > { %1695 = vrcp.f32 %v1256_v2 }
 0x290   : > { %1697 = vrcp.f32 %v1263_v10 }
 0x298   : > { %v1694_v6 = vpop.eup %1693 }
 0x299   : > { %v1696_v7 = vpop.eup %1695  ;;  %v1267_v9 = vmul.f32 %v1694_v6, %v1692_v4 }
 0x29a   : > { %v1266_v11 = vmul.f32 %v1696_v7, %v1354_v5  ;;  %v1698_v13 = vpop.eup %1697 }
 0x29c   : > { %v1268_v12 = vadd.f32 %v1267_v9, %v1266_v11 }
 0x29e   : > { %1699 = vtanh.f32 %v1268_v12  ;;  %1359 = vst [vmem:[%s2239_s8 + $0x8] sm:$0xff] %v1268_v12 }
 0x2a8   : > { %v1700_v14 = vpop.eup %1699 }
 0x2a9   : > { %v1270_v15 = vmul.f32 %v1700_v14, %v1698_v13 }
 0x2ab   : > { %1358 = vst [vmem:[%s2238_s7 + $0x8] sm:$0xff] %v1270_v15 }
 0x2ac PF: > { %s21_s27 = sadd.s32 1, %s1799_s27  }
 0x2ad   : > { %p18_p10 = scmp.ge.s32.totalorder %s21_s27, 10  }
 0x2af   :  { %20 = sbr.rel (!%p18_p10) target bundleno = 2 (0x2), region = 101 }
 0x2b6   :  { %1290 = vsyncpa [#allocation3], 1 }
 0x2b7   :  { %1292 = vsyncpa [#allocation3 + $0x1], 1 }
 0x2b8   :  { %1293 = vsyncpa [#allocation5], 1 }

// kernel: _seq2seq_forward.3
= control target key start
LH: loop header
LB: loop body
LE: loop exit
PB: predicated region body
PF: predicated region fallthrough
CT: control target
= control target key end

     0   :  { %s3229_s0 = inlined_call_operand.vmem [shape: s32[8], index: 0, kind: input, shape index: {}]   ;;  %s3230_s1 = inlined_call_operand.vmem [shape: f32[8,128], index: 1, kind: input, shape index: {}]   ;;  %s3231_s2 = inlined_call_operand.vmem [shape: f32[7,8,128], index: 2, kind: input, shape index: {}]   ;;  %s3232_s3 = inlined_call_operand.vmem [shape: f32[2,8,128], index: 3, kind: input, shape index: {}]   ;;  %s3233_s4 = inlined_call_operand.vmem [shape: f32[2,8,128], index: 4, kind: input, shape index: {}]   ;;  %s3234_s5 = inlined_call_operand.vmem [shape: f32[128,512], index: 5, kind: input, shape index: {}]   ;;  %s3235_s6 = inlined_call_operand.vmem [shape: f32[128,512], index: 6, kind: input, shape index: {}]   ;;  %s3236_s7 = inlined_call_operand.vmem [shape: f32[1,512], index: 7, kind: input, shape index: {}]   ;;  %s3237_s8 = inlined_call_operand.vmem [shape: f32[128,512], index: 8, kind: input, shape index: {}]   ;;  %s3238_s9 = inlined_call_operand.vmem [shape: f32[128,512], index: 9, kind: input, shape index: {}]   ;;  %s3239_s10 = inlined_call_operand.vmem [shape: f32[1,512], index: 10, kind: input, shape index: {}]   ;;  %s3240_s11 = inlined_call_operand.vmem [shape: f32[128,128], index: 11, kind: input, shape index: {}]   ;;  %s3241_s12 = inlined_call_operand.vmem [shape: f32[1,128], index: 12, kind: input, shape index: {}]   ;;  %s3242_s13 = inlined_call_operand.vmem [shape: f32[128,128], index: 13, kind: input, shape index: {}]   ;;  %s3243_s14 = inlined_call_operand.vmem [shape: f32[7,8,128], index: 14, kind: output, shape index: {}]  }
   0x1   :  { %s19_s15 = sshll.u32 %s3229_s0, 4  ;;  %s20_s15 = int_to_ptr.vmem [resolvable:$true] %s19_s15 }
   0x2   :  { %s2153_s16 = scalar_lea.vmem %s20_s15, 16  ;;  %p2158_p1 = scmp.lt.s32.totalorder %s20_s15, %s20_s15 }
   0x3   :  { %p2154_p0 = scmp.ne.s32.totalorder %s20_s15, %s2153_s16  ;;  %p2159_p2 = scmp.lt.s32.totalorder %s2153_s16, %s2153_s16 }
   0x5   :  { %p2160_p3 = por %p2159_p2, %p2158_p1 }
   0x7   :  { %p2161_p4 = pnand %p2160_p3, %p2154_p0 }
   0x9   :  { %2164 = shalt.err (!%p2161_p4)  }
   0xa   :  { %s2175_s17 = smov [#allocation6]  }
   0xb   :  { %22 = dma.vmem_to_smem %s20_s15, 16, %s2175_s17, [#allocation5] }
   0xc   :  { %2169 = dma.done.wait [#allocation5], 16 }
   0xd   :  { %2170 = vsyncadd [#allocation5], 4294967280 }
   0xe   :  { %24 = sfence }
   0xf   :  { %s2258_s18 = smov 0  }
  0x10 LB: > { %s2264_s0 = sadd.s32 4294967295, %s2173_s18   ;;  %p1673_p5 = scmp.ge.s32.totalorder %s2173_s18, 1  ;;  %s2173_s18 = sphi %s2258_s18, %s30_s18  }
  0x11   : > { %p393_p6 = scmp.lt.s32.totalorder %s2173_s18, 8 }
  0x13   : > { %p394_p7 = pnand %p1673_p5, %p393_p6 }
  0x14   : > { %p435_p8 = scmp.lt.s32.totalorder (!%p394_p7), %s2264_s0, 6  ;;  %p1676_p9 = scmp.ne.s32.totalorder (!%p394_p7), %s2264_s0, 0 }
  0x15   : > { %397 = sbr.rel (%p394_p7) target bundleno = 1490 (0x5d2), region = 72 }
  0x1c   : > { %s436_s19 = scalar_select %p435_p8, %s2264_s0, 6 }
  0x1d   : > { %446 = sbr.rel (%p1676_p9) target bundleno = 36 (0x24), region = 76  ;;  %v447_v0 = vld [vmem:[%s3232_s3] sm:$0xff] (!%p1676_p9)  ;;  %v448_v1 = vld [vmem:[%s3232_s3 + $0x8] sm:$0xff] (!%p1676_p9) }
  0x1e   : > { %s1674_s20 = sshll.u32 %s436_s19, 3  ;;  %v451_v2 = vld [vmem:[%s3233_s4] sm:$0xff] (!%p1676_p9)  ;;  %449 = vst [vmem:[#allocation2] sm:$0xff] (!%p1676_p9), %v447_v0  ;;  %450 = vst [vmem:[#allocation2 + $0x8] sm:$0xff] (!%p1676_p9), %v448_v1  ;;  %v452_v3 = vld [vmem:[%s3233_s4 + $0x8] sm:$0xff] (!%p1676_p9) }
  0x1f   : > { %s2273_s23 = scalar_lea.vmem %s3231_s2, %s1674_s20  ;;  %s2278_s26 = scalar_lea.vmem %s3243_s14, %s1674_s20  ;;  %453 = vst [vmem:[#allocation3] sm:$0xff] (!%p1676_p9), %v451_v2  ;;  %v455_v4 = vld [vmem:[%s3230_s1] sm:$0xff] (!%p1676_p9)  ;;  %454 = vst [vmem:[#allocation3 + $0x8] sm:$0xff] (!%p1676_p9), %v452_v3 }
  0x20   : > { %456 = vst [vmem:[#allocation4] sm:$0xff] (!%p1676_p9), %v455_v4 }
  0x24 PF: > { %v525_v5 = vld [vmem:[%s3235_s6 + $0x8] sm:$0xff]  ;;  %v527_v7 = vld [vmem:[%s3235_s6 + $0x18] sm:$0xff]  ;;  %v524_v10 = vld [vmem:[%s3235_s6] sm:$0xff]  ;;  %v2176_v12 = vmov 0.0   ;;  %vm2178_vm0 = vmmov 0   ;;  %s1603_s19 = sadd.s32 1, %s2264_s0 }
  0x25   : > { %v529_v6 = vld [vmem:[%s3235_s6 + $0x28] sm:$0xff]  ;;  %v531_v9 = vld [vmem:[%s3235_s6 + $0x38] sm:$0xff]  ;;  %v528_v11 = vld [vmem:[%s3235_s6 + $0x20] sm:$0xff]  ;;  %653 = vmatprep.mubr.f32.mxu0 %v2176_v12  ;;  %724 = vmatprep.mubr.f32.mxu1 %v2176_v12  ;;  %s1604_s20 = sld [smem:[#allocation6 + %s1603_s19]] }
  0x26   : > { %v1792_v8 = vpack.c.bf16 %v529_v6, %v525_v5  ;;  %v1824_v13 = vpack.c.bf16 %v531_v9, %v527_v7  ;;  %v1794_v14 = vpack.c.bf16 %v528_v11, %v524_v10  ;;  %v526_v15 = vld [vmem:[%s3235_s6 + $0x10] sm:$0xff]  ;;  %v533_v17 = vld [vmem:[%s3235_s6 + $0x48] sm:$0xff]  ;;  %v535_v20 = vld [vmem:[%s3235_s6 + $0x58] sm:$0xff] }
  0x27   : > { %v530_v16 = vld [vmem:[%s3235_s6 + $0x30] sm:$0xff]  ;;  %v537_v19 = vld [vmem:[%s3235_s6 + $0x68] sm:$0xff]  ;;  %v539_v21 = vld [vmem:[%s3235_s6 + $0x78] sm:$0xff] }
  0x28   : > { %1793 = vmatprep.subr.bf16.mxu0 %v1792_v8  ;;  %v1826_v18 = vpack.c.bf16 %v530_v16, %v526_v15  ;;  %1825 = vmatprep.subr.bf16.mxu1 %v1824_v13  ;;  %v1796_v22 = vpack.c.bf16 %v537_v19, %v533_v17  ;;  %v1828_v23 = vpack.c.bf16 %v539_v21, %v535_v20  ;;  %v532_v24 = vld [vmem:[%s3235_s6 + $0x40] sm:$0xff]  ;;  %v534_v26 = vld [vmem:[%s3235_s6 + $0x50] sm:$0xff]  ;;  %v541_v29 = vld [vmem:[%s3235_s6 + $0x88] sm:$0xff] }
  0x29   : > { %1795 = vmatpush1.bf16.msra.mxu0 %v1794_v14  ;;  %v536_v25 = vld [vmem:[%s3235_s6 + $0x60] sm:$0xff]  ;;  %v538_v28 = vld [vmem:[%s3235_s6 + $0x70] sm:$0xff]  ;;  %v545_v30 = vld [vmem:[%s3235_s6 + $0xa8] sm:$0xff] }
  0x2a   : > { %1827 = vmatpush1.bf16.msra.mxu1 %v1826_v18  ;;  %v1798_v27 = vpack.c.bf16 %v536_v25, %v532_v24  ;;  %1797 = vmatprep.subr.bf16.mxu0 %v1796_v22  ;;  %v1830_v31 = vpack.c.bf16 %v538_v28, %v534_v26  ;;  %v1800_v32 = vpack.c.bf16 %v545_v30, %v541_v29  ;;  %v543_v33 = vld [vmem:[%s3235_s6 + $0x98] sm:$0xff]  ;;  %v540_v35 = vld [vmem:[%s3235_s6 + $0x80] sm:$0xff]  ;;  %v542_v38 = vld [vmem:[%s3235_s6 + $0x90] sm:$0xff] }
  0x2b   : > { %1829 = vmatprep.subr.bf16.mxu1 %v1828_v23  ;;  %v547_v34 = vld [vmem:[%s3235_s6 + $0xb8] sm:$0xff]  ;;  %v544_v37 = vld [vmem:[%s3235_s6 + $0xa0] sm:$0xff]  ;;  %v546_v39 = vld [vmem:[%s3235_s6 + $0xb0] sm:$0xff]  ;;  %p1605_p10 = scmp.gt.s32.totalorder %s1604_s20, 0 }
  0x2c   : > { %v1832_v36 = vpack.c.bf16 %v547_v34, %v543_v33  ;;  %v1802_v40 = vpack.c.bf16 %v544_v37, %v540_v35  ;;  %v549_v41 = vld [vmem:[%s3235_s6 + $0xc8] sm:$0xff]  ;;  %v551_v43 = vld [vmem:[%s3235_s6 + $0xd8] sm:$0xff]  ;;  %v1834_v44 = vpack.c.bf16 %v546_v39, %v542_v38  ;;  %v548_v47 = vld [vmem:[%s3235_s6 + $0xc0] sm:$0xff] }
  0x2d   : > { %1799 = vmatpush1.bf16.msra.mxu0 %v1798_v27  ;;  %v553_v42 = vld [vmem:[%s3235_s6 + $0xe8] sm:$0xff]  ;;  %v555_v46 = vld [vmem:[%s3235_s6 + $0xf8] sm:$0xff]  ;;  %v552_v48 = vld [vmem:[%s3235_s6 + $0xe0] sm:$0xff]  ;;  %s1606_s21 = scalar_select %p1605_p10, 1, 0 }
  0x2e   : > { %1831 = vmatpush1.bf16.msra.mxu1 %v1830_v31  ;;  %1801 = vmatprep.subr.bf16.mxu0 %v1800_v32  ;;  %v1804_v45 = vpack.c.bf16 %v553_v42, %v549_v41  ;;  %v1836_v49 = vpack.c.bf16 %v555_v46, %v551_v43  ;;  %v550_v50 = vld [vmem:[%s3235_s6 + $0xd0] sm:$0xff]  ;;  %v557_v52 = vld [vmem:[%s3235_s6 + $0x108] sm:$0xff]  ;;  %v559_v54 = vld [vmem:[%s3235_s6 + $0x118] sm:$0xff]  ;;  %v1806_v56 = vpack.c.bf16 %v552_v48, %v548_v47 }
  0x2f   : > { %1833 = vmatprep.subr.bf16.mxu1 %v1832_v36  ;;  %v554_v51 = vld [vmem:[%s3235_s6 + $0xf0] sm:$0xff]  ;;  %v561_v53 = vld [vmem:[%s3235_s6 + $0x128] sm:$0xff]  ;;  %v563_v55 = vld [vmem:[%s3235_s6 + $0x138] sm:$0xff]  ;;  %s1607_s22 = scvt.s32.f32 %s1606_s21 }
  0x30   : > { %v1838_v57 = vpack.c.bf16 %v554_v51, %v550_v50  ;;  %v1808_v58 = vpack.c.bf16 %v561_v53, %v557_v52  ;;  %v556_v59 = vld [vmem:[%s3235_s6 + $0x100] sm:$0xff]  ;;  %v558_v61 = vld [vmem:[%s3235_s6 + $0x110] sm:$0xff]  ;;  %v1840_v62 = vpack.c.bf16 %v563_v55, %v559_v54  ;;  %v565_v0 = vld [vmem:[%s3235_s6 + $0x148] sm:$0xff] }
  0x31   : > { %1803 = vmatpush1.bf16.msra.mxu0 %v1802_v40  ;;  %v560_v60 = vld [vmem:[%s3235_s6 + $0x120] sm:$0xff]  ;;  %v562_v63 = vld [vmem:[%s3235_s6 + $0x130] sm:$0xff]  ;;  %v569_v1 = vld [vmem:[%s3235_s6 + $0x168] sm:$0xff]  ;;  %s1611_s24 = ssub.f32 1.0, %s1607_s22 }
  0x32   : > { %1835 = vmatpush1.bf16.msra.mxu1 %v1834_v44  ;;  %1805 = vmatprep.subr.bf16.mxu0 %v1804_v45  ;;  %v567_v2 = vld [vmem:[%s3235_s6 + $0x158] sm:$0xff]  ;;  %v1810_v4 = vpack.c.bf16 %v560_v60, %v556_v59  ;;  %v1842_v5 = vpack.c.bf16 %v562_v63, %v558_v61  ;;  %v1812_v6 = vpack.c.bf16 %v569_v1, %v565_v0  ;;  %v564_v7 = vld [vmem:[%s3235_s6 + $0x140] sm:$0xff]  ;;  %v566_v9 = vld [vmem:[%s3235_s6 + $0x150] sm:$0xff] }
  0x33   : > { %1837 = vmatprep.subr.bf16.mxu1 %v1836_v49  ;;  %v571_v3 = vld [vmem:[%s3235_s6 + $0x178] sm:$0xff]  ;;  %v568_v8 = vld [vmem:[%s3235_s6 + $0x160] sm:$0xff]  ;;  %v570_v11 = vld [vmem:[%s3235_s6 + $0x170] sm:$0xff] }
  0x34   : > { %v1844_v10 = vpack.c.bf16 %v571_v3, %v567_v2  ;;  %v573_v13 = vld [vmem:[%s3235_s6 + $0x188] sm:$0xff]  ;;  %v575_v15 = vld [vmem:[%s3235_s6 + $0x198] sm:$0xff]  ;;  %v1814_v17 = vpack.c.bf16 %v568_v8, %v564_v7  ;;  %v1846_v18 = vpack.c.bf16 %v570_v11, %v566_v9  ;;  %v572_v20 = vld [vmem:[%s3235_s6 + $0x180] sm:$0xff] }
  0x35   : > { %1807 = vmatpush1.bf16.msra.mxu0 %v1806_v56  ;;  %v577_v14 = vld [vmem:[%s3235_s6 + $0x1a8] sm:$0xff]  ;;  %v579_v16 = vld [vmem:[%s3235_s6 + $0x1b8] sm:$0xff]  ;;  %v576_v21 = vld [vmem:[%s3235_s6 + $0x1a0] sm:$0xff] }
  0x36   : > { %1839 = vmatpush1.bf16.msra.mxu1 %v1838_v57  ;;  %1809 = vmatprep.subr.bf16.mxu0 %v1808_v58  ;;  %v1816_v19 = vpack.c.bf16 %v577_v14, %v573_v13  ;;  %v574_v22 = vld [vmem:[%s3235_s6 + $0x190] sm:$0xff]  ;;  %v1848_v23 = vpack.c.bf16 %v579_v16, %v575_v15  ;;  %v581_v25 = vld [vmem:[%s3235_s6 + $0x1c8] sm:$0xff]  ;;  %v583_v27 = vld [vmem:[%s3235_s6 + $0x1d8] sm:$0xff]  ;;  %v1818_v29 = vpack.c.bf16 %v576_v21, %v572_v20 }
  0x37   : > { %1841 = vmatprep.subr.bf16.mxu1 %v1840_v62  ;;  %v578_v24 = vld [vmem:[%s3235_s6 + $0x1b0] sm:$0xff]  ;;  %v585_v26 = vld [vmem:[%s3235_s6 + $0x1e8] sm:$0xff]  ;;  %v587_v28 = vld [vmem:[%s3235_s6 + $0x1f8] sm:$0xff] }
  0x38   : > { %v1850_v30 = vpack.c.bf16 %v578_v24, %v574_v22  ;;  %v1820_v31 = vpack.c.bf16 %v585_v26, %v581_v25  ;;  %v580_v32 = vld [vmem:[%s3235_s6 + $0x1c0] sm:$0xff]  ;;  %v582_v34 = vld [vmem:[%s3235_s6 + $0x1d0] sm:$0xff]  ;;  %v1852_v35 = vpack.c.bf16 %v587_v28, %v583_v27  ;;  %v461_v37 = vld [vmem:[%s3234_s5 + $0x8] sm:$0xff] }
  0x39   : > { %1811 = vmatpush1.bf16.msra.mxu0 %v1810_v4  ;;  %v584_v33 = vld [vmem:[%s3235_s6 + $0x1e0] sm:$0xff]  ;;  %v586_v36 = vld [vmem:[%s3235_s6 + $0x1f0] sm:$0xff]  ;;  %v465_v38 = vld [vmem:[%s3234_s5 + $0x28] sm:$0xff] }
  0x3a   : > { %1843 = vmatpush1.bf16.msra.mxu1 %v1842_v5  ;;  %1813 = vmatprep.subr.bf16.mxu0 %v1812_v6  ;;  %v463_v39 = vld [vmem:[%s3234_s5 + $0x18] sm:$0xff]  ;;  %v1822_v41 = vpack.c.bf16 %v584_v33, %v580_v32  ;;  %v1854_v42 = vpack.c.bf16 %v586_v36, %v582_v34  ;;  %v1856_v43 = vpack.c.bf16 %v465_v38, %v461_v37  ;;  %v460_v44 = vld [vmem:[%s3234_s5] sm:$0xff]  ;;  %v462_v46 = vld [vmem:[%s3234_s5 + $0x10] sm:$0xff] }
  0x3b   : > { %1845 = vmatprep.subr.bf16.mxu1 %v1844_v10  ;;  %v467_v40 = vld [vmem:[%s3234_s5 + $0x38] sm:$0xff]  ;;  %v464_v45 = vld [vmem:[%s3234_s5 + $0x20] sm:$0xff]  ;;  %v466_v48 = vld [vmem:[%s3234_s5 + $0x30] sm:$0xff] }
  0x3c   : > { %v1888_v47 = vpack.c.bf16 %v467_v40, %v463_v39  ;;  %v469_v49 = vld [vmem:[%s3234_s5 + $0x48] sm:$0xff]  ;;  %v471_v51 = vld [vmem:[%s3234_s5 + $0x58] sm:$0xff]  ;;  %v458_v53 = vld [vmem:[#allocation2] sm:$0xff]  ;;  %v1858_v54 = vpack.c.bf16 %v464_v45, %v460_v44  ;;  %v1890_v55 = vpack.c.bf16 %v466_v48, %v462_v46 }
  0x3d   : > { %1815 = vmatpush1.bf16.msra.mxu0 %v1814_v17  ;;  %v473_v50 = vld [vmem:[%s3234_s5 + $0x68] sm:$0xff]  ;;  %v475_v52 = vld [vmem:[%s3234_s5 + $0x78] sm:$0xff]  ;;  %v468_v57 = vld [vmem:[%s3234_s5 + $0x40] sm:$0xff] }
  0x3e   : > { %1847 = vmatpush1.bf16.msra.mxu1 %v1846_v18  ;;  %1817 = vmatprep.subr.bf16.mxu0 %v1816_v19  ;;  %v1860_v56 = vpack.c.bf16 %v473_v50, %v469_v49  ;;  %v472_v58 = vld [vmem:[%s3234_s5 + $0x60] sm:$0xff]  ;;  %v470_v59 = vld [vmem:[%s3234_s5 + $0x50] sm:$0xff]  ;;  %v1892_v60 = vpack.c.bf16 %v475_v52, %v471_v51  ;;  %v477_v62 = vld [vmem:[%s3234_s5 + $0x88] sm:$0xff] }
  0x3f   : > { %1849 = vmatprep.subr.bf16.mxu1 %v1848_v23  ;;  %v474_v61 = vld [vmem:[%s3234_s5 + $0x70] sm:$0xff]  ;;  %v481_v63 = vld [vmem:[%s3234_s5 + $0xa8] sm:$0xff]  ;;  %v479_v0 = vld [vmem:[%s3234_s5 + $0x98] sm:$0xff]  ;;  %v1862_v2 = vpack.c.bf16 %v472_v58, %v468_v57 }
  0x40   : > { %v483_v1 = vld [vmem:[%s3234_s5 + $0xb8] sm:$0xff]  ;;  %v1894_v3 = vpack.c.bf16 %v474_v61, %v470_v59  ;;  %v1864_v4 = vpack.c.bf16 %v481_v63, %v477_v62  ;;  %v476_v5 = vld [vmem:[%s3234_s5 + $0x80] sm:$0xff]  ;;  %v478_v7 = vld [vmem:[%s3234_s5 + $0x90] sm:$0xff] }
  0x41   : > { %1819 = vmatpush1.bf16.msra.mxu0 %v1818_v29  ;;  %v480_v6 = vld [vmem:[%s3234_s5 + $0xa0] sm:$0xff]  ;;  %v1896_v8 = vpack.c.bf16 %v483_v1, %v479_v0  ;;  %v482_v9 = vld [vmem:[%s3234_s5 + $0xb0] sm:$0xff]  ;;  %v485_v10 = vld [vmem:[%s3234_s5 + $0xc8] sm:$0xff] }
  0x42   : > { %1851 = vmatpush1.bf16.msra.mxu1 %v1850_v30  ;;  %1821 = vmatprep.subr.bf16.mxu0 %v1820_v31  ;;  %v489_v11 = vld [vmem:[%s3234_s5 + $0xe8] sm:$0xff]  ;;  %v487_v13 = vld [vmem:[%s3234_s5 + $0xd8] sm:$0xff]  ;;  %v1866_v15 = vpack.c.bf16 %v480_v6, %v476_v5  ;;  %v1898_v16 = vpack.c.bf16 %v482_v9, %v478_v7  ;;  %v484_v18 = vld [vmem:[%s3234_s5 + $0xc0] sm:$0xff] }
  0x43   : > { %1853 = vmatprep.subr.bf16.mxu1 %v1852_v35  ;;  %v491_v14 = vld [vmem:[%s3234_s5 + $0xf8] sm:$0xff]  ;;  %v1868_v17 = vpack.c.bf16 %v489_v11, %v485_v10  ;;  %v488_v19 = vld [vmem:[%s3234_s5 + $0xe0] sm:$0xff]  ;;  %v486_v20 = vld [vmem:[%s3234_s5 + $0xd0] sm:$0xff] }
  0x44   : > { %v1900_v21 = vpack.c.bf16 %v491_v14, %v487_v13  ;;  %v490_v22 = vld [vmem:[%s3234_s5 + $0xf0] sm:$0xff]  ;;  %v493_v23 = vld [vmem:[%s3234_s5 + $0x108] sm:$0xff]  ;;  %v495_v25 = vld [vmem:[%s3234_s5 + $0x118] sm:$0xff]  ;;  %v1870_v27 = vpack.c.bf16 %v488_v19, %v484_v18 }
  0x45   : > { %1823 = vmatpush1.bf16.msra.mxu0 %v1822_v41  ;;  %v497_v24 = vld [vmem:[%s3234_s5 + $0x128] sm:$0xff]  ;;  %v499_v26 = vld [vmem:[%s3234_s5 + $0x138] sm:$0xff]  ;;  %v1902_v28 = vpack.c.bf16 %v490_v22, %v486_v20  ;;  %v492_v30 = vld [vmem:[%s3234_s5 + $0x100] sm:$0xff] }
  0x46   : > { %1855 = vmatpush1.bf16.msra.mxu1 %v1854_v42  ;;  %1857 = vmatprep.subr.bf16.mxu0 %v1856_v43  ;;  %v1872_v29 = vpack.c.bf16 %v497_v24, %v493_v23  ;;  %v496_v31 = vld [vmem:[%s3234_s5 + $0x120] sm:$0xff]  ;;  %v494_v32 = vld [vmem:[%s3234_s5 + $0x110] sm:$0xff]  ;;  %v1904_v33 = vpack.c.bf16 %v499_v26, %v495_v25  ;;  %v501_v35 = vld [vmem:[%s3234_s5 + $0x148] sm:$0xff] }
  0x47   : > { %1889 = vmatprep.subr.bf16.mxu1 %v1888_v47  ;;  %v498_v34 = vld [vmem:[%s3234_s5 + $0x130] sm:$0xff]  ;;  %v505_v36 = vld [vmem:[%s3234_s5 + $0x168] sm:$0xff]  ;;  %v503_v37 = vld [vmem:[%s3234_s5 + $0x158] sm:$0xff]  ;;  %v1874_v39 = vpack.c.bf16 %v496_v31, %v492_v30 }
  0x48   : > { %654 = vmatmul.mubr.f32.vlgmr.msra.gmra.mrb[0].mxu0 %v458_v53  ;;  %v507_v38 = vld [vmem:[%s3234_s5 + $0x178] sm:$0xff]  ;;  %v1906_v40 = vpack.c.bf16 %v498_v34, %v494_v32  ;;  %v1876_v41 = vpack.c.bf16 %v505_v36, %v501_v35  ;;  %v500_v42 = vld [vmem:[%s3234_s5 + $0x140] sm:$0xff]  ;;  %v502_v44 = vld [vmem:[%s3234_s5 + $0x150] sm:$0xff] }
  0x49   : > { %725 = vmatmul.mubr.f32.vlgmr.msra.gmra.mrb[0].mxu1 %v458_v53  ;;  %1859 = vmatpush1.bf16.msra.mxu0 %v1858_v54  ;;  %v504_v43 = vld [vmem:[%s3234_s5 + $0x160] sm:$0xff]  ;;  %v1908_v45 = vpack.c.bf16 %v507_v38, %v503_v37  ;;  %v506_v46 = vld [vmem:[%s3234_s5 + $0x170] sm:$0xff]  ;;  %v509_v47 = vld [vmem:[%s3234_s5 + $0x188] sm:$0xff] }
  0x4a   : > { %1891 = vmatpush1.bf16.msra.mxu1 %v1890_v55  ;;  %1861 = vmatprep.subr.bf16.mxu0 %v1860_v56  ;;  %v513_v48 = vld [vmem:[%s3234_s5 + $0x1a8] sm:$0xff]  ;;  %v511_v49 = vld [vmem:[%s3234_s5 + $0x198] sm:$0xff]  ;;  %v1878_v51 = vpack.c.bf16 %v504_v43, %v500_v42  ;;  %v1910_v52 = vpack.c.bf16 %v506_v46, %v502_v44  ;;  %v508_v54 = vld [vmem:[%s3234_s5 + $0x180] sm:$0xff] }
  0x4b   : > { %1893 = vmatprep.subr.bf16.mxu1 %v1892_v60  ;;  %795 = vmatprep.mubr.f32.mxu0 %v2176_v12  ;;  %v515_v50 = vld [vmem:[%s3234_s5 + $0x1b8] sm:$0xff]  ;;  %v1880_v53 = vpack.c.bf16 %v513_v48, %v509_v47  ;;  %v512_v55 = vld [vmem:[%s3234_s5 + $0x1a0] sm:$0xff]  ;;  %v510_v56 = vld [vmem:[%s3234_s5 + $0x190] sm:$0xff] }
  0x4c   : > { %866 = vmatprep.mubr.f32.mxu1 %v2176_v12  ;;  %v1912_v57 = vpack.c.bf16 %v515_v50, %v511_v49  ;;  %v514_v58 = vld [vmem:[%s3234_s5 + $0x1b0] sm:$0xff]  ;;  %v517_v59 = vld [vmem:[%s3234_s5 + $0x1c8] sm:$0xff]  ;;  %v519_v61 = vld [vmem:[%s3234_s5 + $0x1d8] sm:$0xff]  ;;  %v1882_v63 = vpack.c.bf16 %v512_v55, %v508_v54 }
  0x4d   : > { %1863 = vmatpush1.bf16.msra.mxu0 %v1862_v2  ;;  %v521_v60 = vld [vmem:[%s3234_s5 + $0x1e8] sm:$0xff]  ;;  %v523_v62 = vld [vmem:[%s3234_s5 + $0x1f8] sm:$0xff]  ;;  %v1914_v0 = vpack.c.bf16 %v514_v58, %v510_v56  ;;  %v516_v2 = vld [vmem:[%s3234_s5 + $0x1c0] sm:$0xff] }
  0x4e   : > { %1895 = vmatpush1.bf16.msra.mxu1 %v1894_v3  ;;  %1865 = vmatprep.subr.bf16.mxu0 %v1864_v4  ;;  %v1884_v1 = vpack.c.bf16 %v521_v60, %v517_v59  ;;  %v520_v3 = vld [vmem:[%s3234_s5 + $0x1e0] sm:$0xff]  ;;  %v518_v4 = vld [vmem:[%s3234_s5 + $0x1d0] sm:$0xff]  ;;  %v1916_v5 = vpack.c.bf16 %v523_v62, %v519_v61  ;;  %v993_v7 = vld [vmem:[%s3238_s9 + $0x8] sm:$0xff] }
  0x4f   : > { %1897 = vmatprep.subr.bf16.mxu1 %v1896_v8  ;;  %v522_v6 = vld [vmem:[%s3234_s5 + $0x1f0] sm:$0xff]  ;;  %v997_v8 = vld [vmem:[%s3238_s9 + $0x28] sm:$0xff]  ;;  %v995_v9 = vld [vmem:[%s3238_s9 + $0x18] sm:$0xff]  ;;  %v1886_v11 = vpack.c.bf16 %v520_v3, %v516_v2 }
  0x50   : > { %v999_v10 = vld [vmem:[%s3238_s9 + $0x38] sm:$0xff]  ;;  %v1918_v13 = vpack.c.bf16 %v522_v6, %v518_v4  ;;  %v1920_v14 = vpack.c.bf16 %v997_v8, %v993_v7  ;;  %v998_v19 = vld [vmem:[%s3238_s9 + $0x30] sm:$0xff]  ;;  %v1001_v20 = vld [vmem:[%s3238_s9 + $0x48] sm:$0xff] }
  0x51   : > { %1867 = vmatpush1.bf16.msra.mxu0 %v1866_v15  ;;  %v992_v15 = vld [vmem:[%s3238_s9] sm:$0xff]  ;;  %v1952_v18 = vpack.c.bf16 %v999_v10, %v995_v9  ;;  %v1003_v22 = vld [vmem:[%s3238_s9 + $0x58] sm:$0xff]  ;;  %v1002_v30 = vld [vmem:[%s3238_s9 + $0x50] sm:$0xff] }
  0x52   : > { %1899 = vmatpush1.bf16.msra.mxu1 %v1898_v16  ;;  %1869 = vmatprep.subr.bf16.mxu0 %v1868_v17  ;;  %v996_v16 = vld [vmem:[%s3238_s9 + $0x20] sm:$0xff]  ;;  %v994_v17 = vld [vmem:[%s3238_s9 + $0x10] sm:$0xff]  ;;  %v1007_v23 = vld [vmem:[%s3238_s9 + $0x78] sm:$0xff] }
  0x53   : > { %1901 = vmatprep.subr.bf16.mxu1 %v1900_v21  ;;  %v1005_v21 = vld [vmem:[%s3238_s9 + $0x68] sm:$0xff]  ;;  %v457_v24 = vld [vmem:[#allocation4] sm:$0xff]  ;;  %v1922_v25 = vpack.c.bf16 %v996_v16, %v992_v15  ;;  %v1954_v26 = vpack.c.bf16 %v998_v19, %v994_v17  ;;  %v1956_v31 = vpack.c.bf16 %v1007_v23, %v1003_v22  ;;  %v1006_v32 = vld [vmem:[%s3238_s9 + $0x70] sm:$0xff] }
  0x54   : > { %v1013_v34 = vld [vmem:[%s3238_s9 + $0xa8] sm:$0xff]  ;;  %v1011_v35 = vld [vmem:[%s3238_s9 + $0x98] sm:$0xff]  ;;  %v1958_v38 = vpack.c.bf16 %v1006_v32, %v1002_v30  ;;  %v1010_v42 = vld [vmem:[%s3238_s9 + $0x90] sm:$0xff] }
  0x55   : > { %1871 = vmatpush1.bf16.msra.mxu0 %v1870_v27  ;;  %v1924_v27 = vpack.c.bf16 %v1005_v21, %v1001_v20  ;;  %v1015_v36 = vld [vmem:[%s3238_s9 + $0xb8] sm:$0xff]  ;;  %v1014_v44 = vld [vmem:[%s3238_s9 + $0xb0] sm:$0xff]  ;;  %v1021_v46 = vld [vmem:[%s3238_s9 + $0xe8] sm:$0xff] }
  0x56   : > { %1903 = vmatpush1.bf16.msra.mxu1 %v1902_v28  ;;  %1873 = vmatprep.subr.bf16.mxu0 %v1872_v29  ;;  %v1000_v28 = vld [vmem:[%s3238_s9 + $0x40] sm:$0xff]  ;;  %v1960_v43 = vpack.c.bf16 %v1015_v36, %v1011_v35  ;;  %v1019_v47 = vld [vmem:[%s3238_s9 + $0xd8] sm:$0xff]  ;;  %v1962_v50 = vpack.c.bf16 %v1014_v44, %v1010_v42  ;;  %v1018_v54 = vld [vmem:[%s3238_s9 + $0xd0] sm:$0xff] }
  0x57   : > { %1905 = vmatprep.subr.bf16.mxu1 %v1904_v33  ;;  %v1004_v29 = vld [vmem:[%s3238_s9 + $0x60] sm:$0xff]  ;;  %v1009_v33 = vld [vmem:[%s3238_s9 + $0x88] sm:$0xff]  ;;  %v1023_v48 = vld [vmem:[%s3238_s9 + $0xf8] sm:$0xff] }
  0x58   : > { %v1926_v37 = vpack.c.bf16 %v1004_v29, %v1000_v28  ;;  %v1964_v55 = vpack.c.bf16 %v1023_v48, %v1019_v47  ;;  %v1022_v56 = vld [vmem:[%s3238_s9 + $0xf0] sm:$0xff]  ;;  %v1029_v58 = vld [vmem:[%s3238_s9 + $0x128] sm:$0xff]  ;;  %v1027_v59 = vld [vmem:[%s3238_s9 + $0x118] sm:$0xff] }
  0x59   : > { %1875 = vmatpush1.bf16.msra.mxu0 %v1874_v39  ;;  %v1928_v39 = vpack.c.bf16 %v1013_v34, %v1009_v33  ;;  %v1031_v60 = vld [vmem:[%s3238_s9 + $0x138] sm:$0xff]  ;;  %v1966_v62 = vpack.c.bf16 %v1022_v56, %v1018_v54  ;;  %v1028_v2 = vld [vmem:[%s3238_s9 + $0x120] sm:$0xff]  ;;  %v1026_v3 = vld [vmem:[%s3238_s9 + $0x110] sm:$0xff] }
  0x5a   : > { %1907 = vmatpush1.bf16.msra.mxu1 %v1906_v40  ;;  %1877 = vmatprep.subr.bf16.mxu0 %v1876_v41  ;;  %v1008_v40 = vld [vmem:[%s3238_s9 + $0x80] sm:$0xff]  ;;  %v1033_v7 = vld [vmem:[%s3238_s9 + $0x148] sm:$0xff]  ;;  %v1035_v9 = vld [vmem:[%s3238_s9 + $0x158] sm:$0xff] }
  0x5b   : > { %1909 = vmatprep.subr.bf16.mxu1 %v1908_v45  ;;  %v1012_v41 = vld [vmem:[%s3238_s9 + $0xa0] sm:$0xff]  ;;  %v1017_v45 = vld [vmem:[%s3238_s9 + $0xc8] sm:$0xff]  ;;  %v1034_v17 = vld [vmem:[%s3238_s9 + $0x150] sm:$0xff] }
  0x5c   : > { %v1930_v49 = vpack.c.bf16 %v1012_v41, %v1008_v40  ;;  %v1037_v8 = vld [vmem:[%s3238_s9 + $0x168] sm:$0xff]  ;;  %v1043_v22 = vld [vmem:[%s3238_s9 + $0x198] sm:$0xff]  ;;  %v1042_v29 = vld [vmem:[%s3238_s9 + $0x190] sm:$0xff] }
  0x5d   : > { %1879 = vmatpush1.bf16.msra.mxu0 %v1878_v51  ;;  %v1932_v51 = vpack.c.bf16 %v1021_v46, %v1017_v45  ;;  %v1940_v10 = vpack.c.bf16 %v1037_v8, %v1033_v7  ;;  %v1041_v20 = vld [vmem:[%s3238_s9 + $0x188] sm:$0xff]  ;;  %v1046_v30 = vld [vmem:[%s3238_s9 + $0x1b0] sm:$0xff]  ;;  %v1051_v34 = vld [vmem:[%s3238_s9 + $0x1d8] sm:$0xff] }
  0x5e   : > { %1911 = vmatpush1.bf16.msra.mxu1 %v1910_v52  ;;  %1881 = vmatprep.subr.bf16.mxu0 %v1880_v53  ;;  %v1016_v52 = vld [vmem:[%s3238_s9 + $0xc0] sm:$0xff]  ;;  %v1045_v21 = vld [vmem:[%s3238_s9 + $0x1a8] sm:$0xff]  ;;  %v1055_v36 = vld [vmem:[%s3238_s9 + $0x1f8] sm:$0xff] }
  0x5f   : > { %1913 = vmatprep.subr.bf16.mxu1 %v1912_v57  ;;  %v1020_v53 = vld [vmem:[%s3238_s9 + $0xe0] sm:$0xff]  ;;  %v1025_v57 = vld [vmem:[%s3238_s9 + $0x108] sm:$0xff]  ;;  %v1944_v23 = vpack.c.bf16 %v1045_v21, %v1041_v20  ;;  %v1050_v41 = vld [vmem:[%s3238_s9 + $0x1d0] sm:$0xff] }
  0x60   : > { %v1934_v61 = vpack.c.bf16 %v1020_v53, %v1016_v52  ;;  %v1049_v32 = vld [vmem:[%s3238_s9 + $0x1c8] sm:$0xff]  ;;  %v1054_v42 = vld [vmem:[%s3238_s9 + $0x1f0] sm:$0xff]  ;;  %v931_v46 = vld [vmem:[%s3237_s8 + $0x18] sm:$0xff] }
  0x61   : > { %1883 = vmatpush1.bf16.msra.mxu0 %v1882_v63  ;;  %v1936_v63 = vpack.c.bf16 %v1029_v58, %v1025_v57  ;;  %v1053_v33 = vld [vmem:[%s3238_s9 + $0x1e8] sm:$0xff]  ;;  %v935_v48 = vld [vmem:[%s3237_s8 + $0x38] sm:$0xff]  ;;  %v930_v53 = vld [vmem:[%s3237_s8 + $0x10] sm:$0xff] }
  0x62   : > { %1915 = vmatpush1.bf16.msra.mxu1 %v1914_v0  ;;  %1885 = vmatprep.subr.bf16.mxu0 %v1884_v1  ;;  %v1968_v0 = vpack.c.bf16 %v1031_v60, %v1027_v59  ;;  %v1024_v1 = vld [vmem:[%s3238_s9 + $0x100] sm:$0xff]  ;;  %v1948_v35 = vpack.c.bf16 %v1053_v33, %v1049_v32  ;;  %v929_v44 = vld [vmem:[%s3237_s8 + $0x8] sm:$0xff]  ;;  %v934_v54 = vld [vmem:[%s3237_s8 + $0x30] sm:$0xff] }
  0x63   : > { %1917 = vmatprep.subr.bf16.mxu1 %v1916_v5  ;;  %v1938_v4 = vpack.c.bf16 %v1028_v2, %v1024_v1  ;;  %v1030_v5 = vld [vmem:[%s3238_s9 + $0x130] sm:$0xff]  ;;  %v933_v45 = vld [vmem:[%s3237_s8 + $0x28] sm:$0xff]  ;;  %v2018_v56 = vpack.c.bf16 %v934_v54, %v930_v53  ;;  %v939_v59 = vld [vmem:[%s3237_s8 + $0x58] sm:$0xff] }
  0x64   : > { %v1970_v6 = vpack.c.bf16 %v1030_v5, %v1026_v3  ;;  %v1984_v47 = vpack.c.bf16 %v933_v45, %v929_v44  ;;  %v937_v57 = vld [vmem:[%s3237_s8 + $0x48] sm:$0xff]  ;;  %v938_v2 = vld [vmem:[%s3237_s8 + $0x50] sm:$0xff]  ;;  %v947_v7 = vld [vmem:[%s3237_s8 + $0x98] sm:$0xff] }
  0x65   : > { %1887 = vmatpush1.bf16.msra.mxu0 %v1886_v11  ;;  %v1039_v11 = vld [vmem:[%s3238_s9 + $0x178] sm:$0xff]  ;;  %v941_v58 = vld [vmem:[%s3237_s8 + $0x68] sm:$0xff]  ;;  %v942_v3 = vld [vmem:[%s3237_s8 + $0x70] sm:$0xff] }
  0x66   : > { %1919 = vmatpush1.bf16.msra.mxu1 %v1918_v13  ;;  %1921 = vmatprep.subr.bf16.mxu0 %v1920_v14  ;;  %v1032_v13 = vld [vmem:[%s3238_s9 + $0x140] sm:$0xff]  ;;  %v1972_v15 = vpack.c.bf16 %v1039_v11, %v1035_v9  ;;  %v1988_v60 = vpack.c.bf16 %v941_v58, %v937_v57  ;;  %v945_v5 = vld [vmem:[%s3237_s8 + $0x88] sm:$0xff]  ;;  %v951_v9 = vld [vmem:[%s3237_s8 + $0xb8] sm:$0xff] }
  0x67   : > { %1953 = vmatprep.subr.bf16.mxu1 %v1952_v18  ;;  %v1036_v14 = vld [vmem:[%s3238_s9 + $0x160] sm:$0xff]  ;;  %v1038_v18 = vld [vmem:[%s3238_s9 + $0x170] sm:$0xff]  ;;  %v955_v20 = vld [vmem:[%s3237_s8 + $0xd8] sm:$0xff] }
  0x68   : > { %796 = vmatmul.mubr.f32.vlgmr.msra.gmra.mrb[0].mxu0 %v457_v24  ;;  %v1942_v16 = vpack.c.bf16 %v1036_v14, %v1032_v13  ;;  %v1974_v19 = vpack.c.bf16 %v1038_v18, %v1034_v17  ;;  %v948_v11 = vld [vmem:[%s3237_s8 + $0xa0] sm:$0xff]  ;;  %v2024_v13 = vpack.c.bf16 %v951_v9, %v947_v7  ;;  %v953_v18 = vld [vmem:[%s3237_s8 + $0xc8] sm:$0xff]  ;;  %v963_v33 = vld [vmem:[%s3237_s8 + $0x118] sm:$0xff] }
  0x69   : > { %867 = vmatmul.mubr.f32.vlgmr.msra.gmra.mrb[0].mxu1 %v457_v24  ;;  %1923 = vmatpush1.bf16.msra.mxu0 %v1922_v25  ;;  %v1047_v24 = vld [vmem:[%s3238_s9 + $0x1b8] sm:$0xff]  ;;  %v1040_v25 = vld [vmem:[%s3238_s9 + $0x180] sm:$0xff]  ;;  %v977_v53 = vld [vmem:[%s3237_s8 + $0x188] sm:$0xff] }
  0x6a   : > { %1955 = vmatpush1.bf16.msra.mxu1 %v1954_v26  ;;  %1925 = vmatprep.subr.bf16.mxu0 %v1924_v27  ;;  %v1044_v26 = vld [vmem:[%s3238_s9 + $0x1a0] sm:$0xff]  ;;  %v1976_v27 = vpack.c.bf16 %v1047_v24, %v1043_v22  ;;  %v959_v22 = vld [vmem:[%s3237_s8 + $0xf8] sm:$0xff] }
  0x6b   : > { %1957 = vmatprep.subr.bf16.mxu1 %v1956_v31  ;;  %1121 = vmatprep.mubr.f32.mxu0 %v2176_v12  ;;  %v1946_v28 = vpack.c.bf16 %v1044_v26, %v1040_v25  ;;  %v1978_v31 = vpack.c.bf16 %v1046_v30, %v1042_v29  ;;  %v956_v24 = vld [vmem:[%s3237_s8 + $0xe0] sm:$0xff]  ;;  %v2028_v25 = vpack.c.bf16 %v959_v22, %v955_v20  ;;  %v961_v30 = vld [vmem:[%s3237_s8 + $0x108] sm:$0xff]  ;;  %v971_v44 = vld [vmem:[%s3237_s8 + $0x158] sm:$0xff] }
  0x6c   : > { %1192 = vmatprep.mubr.f32.mxu1 %v2176_v12  ;;  %v983_v57 = vld [vmem:[%s3237_s8 + $0x1b8] sm:$0xff]  ;;  %v984_v7 = vld [vmem:[%s3237_s8 + $0x1c0] sm:$0xff] }
  0x6d   : > { %1927 = vmatpush1.bf16.msra.mxu0 %v1926_v37  ;;  %v1048_v37 = vld [vmem:[%s3238_s9 + $0x1c0] sm:$0xff] }
  0x6e   : > { %1959 = vmatpush1.bf16.msra.mxu1 %v1958_v38  ;;  %1929 = vmatprep.subr.bf16.mxu0 %v1928_v39  ;;  %v1052_v38 = vld [vmem:[%s3238_s9 + $0x1e0] sm:$0xff]  ;;  %v1980_v39 = vpack.c.bf16 %v1055_v36, %v1051_v34  ;;  %v967_v34 = vld [vmem:[%s3237_s8 + $0x138] sm:$0xff] }
  0x6f   : > { %1961 = vmatprep.subr.bf16.mxu1 %v1960_v43  ;;  %v1950_v40 = vpack.c.bf16 %v1052_v38, %v1048_v37  ;;  %v1982_v43 = vpack.c.bf16 %v1054_v42, %v1050_v41  ;;  %v2032_v36 = vpack.c.bf16 %v967_v34, %v963_v33  ;;  %v964_v37 = vld [vmem:[%s3237_s8 + $0x120] sm:$0xff]  ;;  %v962_v38 = vld [vmem:[%s3237_s8 + $0x110] sm:$0xff]  ;;  %v969_v42 = vld [vmem:[%s3237_s8 + $0x148] sm:$0xff] }
  0x70   : > { %v988_v9 = vld [vmem:[%s3237_s8 + $0x1e0] sm:$0xff] }
  0x71   : > { %1931 = vmatpush1.bf16.msra.mxu0 %v1930_v49  ;;  %v928_v49 = vld [vmem:[%s3237_s8] sm:$0xff] }
  0x72   : > { %1963 = vmatpush1.bf16.msra.mxu1 %v1962_v50  ;;  %1933 = vmatprep.subr.bf16.mxu0 %v1932_v51  ;;  %v932_v50 = vld [vmem:[%s3237_s8 + $0x20] sm:$0xff]  ;;  %v2016_v51 = vpack.c.bf16 %v935_v48, %v931_v46  ;;  %v975_v46 = vld [vmem:[%s3237_s8 + $0x178] sm:$0xff] }
  0x73   : > { %1965 = vmatprep.subr.bf16.mxu1 %v1964_v55  ;;  %v1986_v52 = vpack.c.bf16 %v932_v50, %v928_v49  ;;  %v925_v55 = vld [vmem:[#allocation2 + $0x8] sm:$0xff]  ;;  %v972_v48 = vld [vmem:[%s3237_s8 + $0x160] sm:$0xff]  ;;  %v2036_v49 = vpack.c.bf16 %v975_v46, %v971_v44 }
  0x75   : > { %1935 = vmatpush1.bf16.msra.mxu0 %v1934_v61  ;;  %v943_v61 = vld [vmem:[%s3237_s8 + $0x78] sm:$0xff] }
  0x76   : > { %1967 = vmatpush1.bf16.msra.mxu1 %v1966_v62  ;;  %1937 = vmatprep.subr.bf16.mxu0 %v1936_v63  ;;  %v936_v62 = vld [vmem:[%s3237_s8 + $0x40] sm:$0xff] }
  0x77   : > { %1969 = vmatprep.subr.bf16.mxu1 %v1968_v0  ;;  %v940_v63 = vld [vmem:[%s3237_s8 + $0x60] sm:$0xff]  ;;  %v2020_v0 = vpack.c.bf16 %v943_v61, %v939_v59 }
  0x78   : > { %v1990_v1 = vpack.c.bf16 %v940_v63, %v936_v62  ;;  %v980_v61 = vld [vmem:[%s3237_s8 + $0x1a0] sm:$0xff]  ;;  %v978_v62 = vld [vmem:[%s3237_s8 + $0x190] sm:$0xff] }
  0x79   : > { %1939 = vmatpush1.bf16.msra.mxu0 %v1938_v4  ;;  %v2022_v4 = vpack.c.bf16 %v942_v3, %v938_v2  ;;  %v989_v2 = vld [vmem:[%s3237_s8 + $0x1e8] sm:$0xff] }
  0x7a   : > { %1971 = vmatpush1.bf16.msra.mxu1 %v1970_v6  ;;  %1941 = vmatprep.subr.bf16.mxu0 %v1940_v10  ;;  %v949_v6 = vld [vmem:[%s3237_s8 + $0xa8] sm:$0xff]  ;;  %v944_v10 = vld [vmem:[%s3237_s8 + $0x80] sm:$0xff] }
  0x7b   : > { %1973 = vmatprep.subr.bf16.mxu1 %v1972_v15  ;;  %v1992_v8 = vpack.c.bf16 %v949_v6, %v945_v5  ;;  %v1994_v14 = vpack.c.bf16 %v948_v11, %v944_v10  ;;  %v946_v15 = vld [vmem:[%s3237_s8 + $0x90] sm:$0xff]  ;;  %v987_v5 = vld [vmem:[%s3237_s8 + $0x1d8] sm:$0xff] }
  0x7c   : > { %v991_v6 = vld [vmem:[%s3237_s8 + $0x1f8] sm:$0xff]  ;;  %v986_v10 = vld [vmem:[%s3237_s8 + $0x1d0] sm:$0xff] }
  0x7d   : > { %1943 = vmatpush1.bf16.msra.mxu0 %v1942_v16  ;;  %v950_v16 = vld [vmem:[%s3237_s8 + $0xb0] sm:$0xff] }
  0x7e   : > { %1975 = vmatpush1.bf16.msra.mxu1 %v1974_v19  ;;  %1945 = vmatprep.subr.bf16.mxu0 %v1944_v23  ;;  %v2026_v17 = vpack.c.bf16 %v950_v16, %v946_v15  ;;  %v957_v19 = vld [vmem:[%s3237_s8 + $0xe8] sm:$0xff]  ;;  %v952_v23 = vld [vmem:[%s3237_s8 + $0xc0] sm:$0xff]  ;;  %v990_v11 = vld [vmem:[%s3237_s8 + $0x1f0] sm:$0xff]  ;;  %v874_v15 = vlaneseq }
  0x7f   : > { %1977 = vmatprep.subr.bf16.mxu1 %v1976_v27  ;;  %v1996_v21 = vpack.c.bf16 %v957_v19, %v953_v18  ;;  %v1998_v26 = vpack.c.bf16 %v956_v24, %v952_v23  ;;  %v954_v27 = vld [vmem:[%s3237_s8 + $0xd0] sm:$0xff]  ;;  %v588_v18 = vld [vmem:[%s3236_s7] sm:$0xf] }
  0x80   : > { %v3073_v16 = vshrl.u32 %v874_v15, 7 }
  0x81   : > { %1947 = vmatpush1.bf16.msra.mxu0 %v1946_v28  ;;  %v958_v28 = vld [vmem:[%s3237_s8 + $0xf0] sm:$0xff] }
  0x82   : > { %1979 = vmatpush1.bf16.msra.mxu1 %v1978_v31  ;;  %1949 = vmatprep.subr.bf16.mxu0 %v1948_v35  ;;  %v2030_v29 = vpack.c.bf16 %v958_v28, %v954_v27  ;;  %v965_v31 = vld [vmem:[%s3237_s8 + $0x128] sm:$0xff]  ;;  %v960_v35 = vld [vmem:[%s3237_s8 + $0x100] sm:$0xff]  ;;  %v880_v19 = vsub.s32 1, %v3073_v16  ;;  %v888_v23 = vsub.s32 3, %v3073_v16 }
  0x83   : > { %1981 = vmatprep.subr.bf16.mxu1 %v1980_v39  ;;  %v2000_v32 = vpack.c.bf16 %v965_v31, %v961_v30  ;;  %v966_v39 = vld [vmem:[%s3237_s8 + $0x130] sm:$0xff] }
  0x84   : > { %v2034_v41 = vpack.c.bf16 %v966_v39, %v962_v38  ;;  %v889_v31 = vrot.slane %v588_v18, %v888_v23 }
  0x85   : > { %1951 = vmatpush1.bf16.msra.mxu0 %v1950_v40  ;;  %v2002_v40 = vpack.c.bf16 %v964_v37, %v960_v35 }
  0x86   : > { %1983 = vmatpush1.bf16.msra.mxu1 %v1982_v43  ;;  %1985 = vmatprep.subr.bf16.mxu0 %v1984_v47  ;;  %v973_v43 = vld [vmem:[%s3237_s8 + $0x168] sm:$0xff]  ;;  %v968_v47 = vld [vmem:[%s3237_s8 + $0x140] sm:$0xff] }
  0x87   : > { %2017 = vmatprep.subr.bf16.mxu1 %v2016_v51  ;;  %v2004_v45 = vpack.c.bf16 %v973_v43, %v969_v42  ;;  %v2006_v50 = vpack.c.bf16 %v972_v48, %v968_v47  ;;  %v970_v51 = vld [vmem:[%s3237_s8 + $0x150] sm:$0xff] }
  0x88   : > { %1122 = vmatmul.mubr.f32.vlgmr.msra.gmra.mrb[2].mxu0 %v925_v55  ;;  %v459_v43 = vld [vmem:[#allocation3] sm:$0xff] }
  0x89   : > { %1193 = vmatmul.mubr.f32.vlgmr.msra.gmra.mrb[2].mxu1 %v925_v55  ;;  %1987 = vmatpush1.bf16.msra.mxu0 %v1986_v52  ;;  %v974_v52 = vld [vmem:[%s3237_s8 + $0x170] sm:$0xff]  ;;  %v981_v55 = vld [vmem:[%s3237_s8 + $0x1a8] sm:$0xff] }
  0x8a   : > { %2019 = vmatpush1.bf16.msra.mxu1 %v2018_v56  ;;  %1263 = vmatprep.mubr.f32.mxu0 %v2176_v12  ;;  %v2038_v54 = vpack.c.bf16 %v974_v52, %v970_v51  ;;  %v979_v56 = vld [vmem:[%s3237_s8 + $0x198] sm:$0xff]  ;;  %v2008_v58 = vpack.c.bf16 %v981_v55, %v977_v53  ;;  %v1392_v53 = vld [vmem:[%s3240_s11] sm:$0xff] }
  0x8b   : > { %1989 = vmatprep.subr.bf16.mxu0 %v1988_v60  ;;  %1334 = vmatprep.mubr.f32.mxu1 %v2176_v12  ;;  %v2040_v59 = vpack.c.bf16 %v983_v57, %v979_v56  ;;  %v976_v60 = vld [vmem:[%s3237_s8 + $0x180] sm:$0xff]  ;;  %v2177_v56 = vmov 0.0|0.0   ;;  %v1394_v57 = vld [vmem:[%s3240_s11 + $0x10] sm:$0xff] }
  0x8c   : > { %2021 = vmatprep.subr.bf16.mxu1 %v2020_v0  ;;  %v2010_v63 = vpack.c.bf16 %v980_v61, %v976_v60  ;;  %v982_v0 = vld [vmem:[%s3237_s8 + $0x1b0] sm:$0xff]  ;;  %v1396_v60 = vld [vmem:[%s3240_s11 + $0x20] sm:$0xff]  ;;  %v1397_v61 = vld [vmem:[%s3240_s11 + $0x28] sm:$0xff] }
  0x8d   : > { %1991 = vmatpush1.bf16.msra.mxu0 %v1990_v1  ;;  %v985_v1 = vld [vmem:[%s3237_s8 + $0x1c8] sm:$0xff]  ;;  %v2042_v3 = vpack.c.bf16 %v982_v0, %v978_v62  ;;  %v2055_v62 = vpack.c.bf16 %v1397_v61, %v1396_v60  ;;  %v1399_v0 = vld [vmem:[%s3240_s11 + $0x38] sm:$0xff] }
  0x8e   : > { %2023 = vmatpush1.bf16.msra.mxu1 %v2022_v4  ;;  %1993 = vmatprep.subr.bf16.mxu0 %v1992_v8  ;;  %v2012_v4 = vpack.c.bf16 %v989_v2, %v985_v1  ;;  %v2044_v8 = vpack.c.bf16 %v991_v6, %v987_v5  ;;  %v1400_v2 = vld [vmem:[%s3240_s11 + $0x40] sm:$0xff]  ;;  %v1402_v5 = vld [vmem:[%s3240_s11 + $0x50] sm:$0xff]  ;;  %v1403_v6 = vld [vmem:[%s3240_s11 + $0x58] sm:$0xff] }
  0x8f   : > { %2025 = vmatprep.subr.bf16.mxu1 %v2024_v13  ;;  %v2014_v13 = vpack.c.bf16 %v988_v9, %v984_v7  ;;  %v1404_v7 = vld [vmem:[%s3240_s11 + $0x60] sm:$0xff]  ;;  %v1405_v9 = vld [vmem:[%s3240_s11 + $0x68] sm:$0xff]  ;;  %v1520_v60 = vld [vmem:[%s3242_s13 + $0x18] sm:$0xff] }
  0x91   : > { %1995 = vmatpush1.bf16.msra.mxu0 %v1994_v14  ;;  %v2046_v14 = vpack.c.bf16 %v990_v11, %v986_v10  ;;  %v2067_v10 = vpack.c.bf16 %v1405_v9, %v1404_v7  ;;  %v1406_v11 = vld [vmem:[%s3240_s11 + $0x70] sm:$0xff] }
  0x92   : > { %2027 = vmatpush1.bf16.msra.mxu1 %v2026_v17  ;;  %1997 = vmatprep.subr.bf16.mxu0 %v1996_v21  ;;  %v876_v17 = vsub.s32 0, %v3073_v16  ;;  %v881_v21 = vrot.slane %v588_v18, %v880_v19  ;;  %v1527_v7 = vld [vmem:[%s3242_s13 + $0x50] sm:$0xff] }
  0x93   : > { %2029 = vmatprep.subr.bf16.mxu1 %v2028_v25 }
  0x94   : > { %v877_v20 = vrot.slane %v588_v18, %v876_v17 }
  0x95   : > { %1999 = vmatpush1.bf16.msra.mxu0 %v1998_v26 }
  0x96   : > { %2031 = vmatpush1.bf16.msra.mxu1 %v2030_v29  ;;  %2001 = vmatprep.subr.bf16.mxu0 %v2000_v32  ;;  %v884_v32 = vsub.s32 2, %v3073_v16 }
  0x97   : > { %2033 = vmatprep.subr.bf16.mxu1 %v2032_v36 }
  0x98   : > { %v885_v34 = vrot.slane %v588_v18, %v884_v32 }
  0x99   : > { %2003 = vmatpush1.bf16.msra.mxu0 %v2002_v40 }
  0x9a   : > { %2035 = vmatpush1.bf16.msra.mxu1 %v2034_v41  ;;  %2005 = vmatprep.subr.bf16.mxu0 %v2004_v45 }
  0x9b   : > { %2037 = vmatprep.subr.bf16.mxu1 %v2036_v49 }
  0x9d   : > { %2007 = vmatpush1.bf16.msra.mxu0 %v2006_v50 }
  0x9e   : > { %2039 = vmatpush1.bf16.msra.mxu1 %v2038_v54  ;;  %2009 = vmatprep.subr.bf16.mxu0 %v2008_v58  ;;  %v1393_v54 = vld [vmem:[%s3240_s11 + $0x8] sm:$0xff]  ;;  %v1395_v58 = vld [vmem:[%s3240_s11 + $0x18] sm:$0xff] }
  0x9f   : > { %2041 = vmatprep.subr.bf16.mxu1 %v2040_v59  ;;  %v2049_v55 = vpack.c.bf16 %v1393_v54, %v1392_v53  ;;  %v2052_v59 = vpack.c.bf16 %v1395_v58, %v1394_v57  ;;  %v1517_v57 = vld [vmem:[%s3242_s13] sm:$0xff]  ;;  %v1518_v58 = vld [vmem:[%s3242_s13 + $0x8] sm:$0xff] }
  0xa1   : > { %2011 = vmatpush1.bf16.msra.mxu0 %v2010_v63  ;;  %v1398_v63 = vld [vmem:[%s3240_s11 + $0x30] sm:$0xff] }
  0xa2   : > { %2043 = vmatpush1.bf16.msra.mxu1 %v2042_v3  ;;  %2013 = vmatprep.subr.bf16.mxu0 %v2012_v4  ;;  %v2058_v1 = vpack.c.bf16 %v1399_v0, %v1398_v63  ;;  %v1401_v3 = vld [vmem:[%s3240_s11 + $0x48] sm:$0xff] }
  0xa3   : > { %2045 = vmatprep.subr.bf16.mxu1 %v2044_v8  ;;  %v2061_v4 = vpack.c.bf16 %v1401_v3, %v1400_v2  ;;  %v2064_v8 = vpack.c.bf16 %v1403_v6, %v1402_v5  ;;  %v1522_v63 = vld [vmem:[%s3242_s13 + $0x28] sm:$0xff]  ;;  %v1524_v2 = vld [vmem:[%s3242_s13 + $0x38] sm:$0xff] }
  0xa4   : > { %v1526_v5 = vld [vmem:[%s3242_s13 + $0x48] sm:$0xff] }
  0xa5   : > { %2015 = vmatpush1.bf16.msra.mxu0 %v2014_v13  ;;  %v1407_v13 = vld [vmem:[%s3240_s11 + $0x78] sm:$0xff] }
  0xa6   : > { %2047 = vmatpush1.bf16.msra.mxu1 %v2046_v14  ;;  %2048 = vmatprep.subr.bf16.mxu0 %v2177_v56  ;;  %v2070_v14 = vpack.c.bf16 %v1407_v13, %v1406_v11  ;;  %v1530_v11 = vld [vmem:[%s3242_s13 + $0x68] sm:$0xff] }
  0xa7   : > { %2072 = vmatprep.subr.bf16.mxu1 %v2177_v56 }
 0x13b   : > { %v797_v22 = vpop.f32.mrb[0].mxu0 }
 0x13c   : > { %v894_v24 = vadd.f32 %v877_v20, %v797_v22  ;;  %v868_v25 = vpop.f32.mrb[0].mxu1  ;;  %v799_v26 = vpop.f32.mrb[1].mxu0 }
 0x13d   : > { %v895_v27 = vadd.f32 %v881_v21, %v799_v26  ;;  %v870_v28 = vpop.f32.mrb[1].mxu1  ;;  %v896_v36 = vadd.f32 %v885_v34, %v868_v25 }
 0x13e   : > { %v1677_v29 = vmul.f32 -1.442695, %v894_v24  ;;  %v897_v33 = vadd.f32 %v889_v31, %v870_v28 }
 0x13f   : > { %v1678_v30 = vmul.f32 -1.442695, %v895_v27 }
 0x140   : > { %2117 = vpow2.f32 %v1677_v29  ;;  %v1679_v35 = vmul.f32 -1.442695, %v897_v33 }
 0x141   : > { %2119 = vpow2.f32 %v1678_v30 }
 0x142   : > { %2121 = vpow2.f32 %v1679_v35 }
 0x143   : > { %2123 = vtanh.f32 %v896_v36 }
 0x14a   : > { %v2118_v37 = vpop.eup %2117 }
 0x14b   : > { %v2120_v38 = vpop.eup %2119  ;;  %v901_v39 = vadd.f32 1.0, %v2118_v37 }
 0x14c   : > { %v907_v40 = vadd.f32 1.0, %v2120_v38  ;;  %v2122_v41 = vpop.eup %2121 }
 0x14d   : > { %2125 = vrcp.f32 %v901_v39  ;;  %v2124_v42 = vpop.eup %2123  ;;  %v914_v47 = vadd.f32 1.0, %v2122_v41 }
 0x14e   : > { %2127 = vrcp.f32 %v907_v40  ;;  %v927_v40 = vld [vmem:[#allocation3 + $0x8] sm:$0xff] }
 0x14f   : > { %2129 = vrcp.f32 %v914_v47  ;;  %v1683_v47 = vld [vmem:[%s3241_s12] ss:$0 sm:$0xff] }
 0x157   : > { %v2126_v44 = vpop.eup %2125 }
 0x158   : > { %v2128_v45 = vpop.eup %2127  ;;  %v918_v46 = vmul.f32 %v2126_v44, %v2124_v42 }
 0x159   : > { %v917_v48 = vmul.f32 %v2128_v45, %v459_v43  ;;  %v2130_v50 = vpop.eup %2129 }
 0x15b   : > { %v919_v49 = vadd.f32 %v918_v46, %v917_v48 }
 0x15d   : > { %923 = vst [vmem:[#allocation3] sm:$0xff] %v919_v49  ;;  %2131 = vtanh.f32 %v919_v49 }
 0x167   : > { %v2132_v51 = vpop.eup %2131 }
 0x168   : > { %v921_v52 = vmul.f32 %v2132_v51, %v2130_v50  ;;  %v3164_v51 = vand.u32 127, %v874_v15  ;;  %v1519_v15 = vld [vmem:[%s3242_s13 + $0x10] sm:$0xff] }
 0x169   : > { %v2076_v61 = vpack.c.bf16 %v1520_v60, %v1519_v15 }
 0x16a   : > { %922 = vst [vmem:[#allocation2] sm:$0xff] %v921_v52  ;;  %1264 = vmatmul.mubr.f32.vlgmr.msra.gmra.mrb[2].mxu0 %v921_v52  ;;  %1335 = vmatmul.mubr.f32.vlgmr.msra.gmra.mrb[2].mxu1 %v921_v52 }
 0x16b   : > { %2050 = vmatpush3.bf16.msra.mxu0 %v2049_v55  ;;  %1754 = vmatprep.mubr.msk.f32.mxu0 %vm2178_vm0, %v2176_v12 }
 0x16c   : > { %2051 = vmatprep.subr.bf16.mxu0 %v2177_v56  ;;  %1789 = vmatprep.mubr.msk.f32.mxu1 %vm2178_vm0, %v2176_v12  ;;  %v1056_v12 = vld [vmem:[%s3239_s10] sm:$0xf] }
 0x16d   : > { %v1345_v18 = vrot.slane %v1056_v12, %v876_v17  ;;  %v1349_v20 = vrot.slane %v1056_v12, %v880_v19  ;;  %v1357_v30 = vrot.slane %v1056_v12, %v888_v23  ;;  %v1353_v17 = vrot.slane %v1056_v12, %v884_v32 }
 0x16f   : > { %2053 = vmatpush3.bf16.msra.mxu0 %v2052_v59  ;;  %v2073_v59 = vpack.c.bf16 %v1518_v58, %v1517_v57 }
 0x170   : > { %2054 = vmatprep.subr.bf16.mxu0 %v2177_v56 }
 0x171   : > { %2074 = vmatpush3.bf16.msra.mxu1 %v2073_v59 }
 0x172   : > { %2075 = vmatprep.subr.bf16.mxu1 %v2177_v56 }
 0x173   : > { %2056 = vmatpush3.bf16.msra.mxu0 %v2055_v62  ;;  %v1521_v62 = vld [vmem:[%s3242_s13 + $0x20] sm:$0xff] }
 0x174   : > { %2057 = vmatprep.subr.bf16.mxu0 %v2177_v56  ;;  %v2079_v0 = vpack.c.bf16 %v1522_v63, %v1521_v62 }
 0x175   : > { %2077 = vmatpush3.bf16.msra.mxu1 %v2076_v61 }
 0x176   : > { %2078 = vmatprep.subr.bf16.mxu1 %v2177_v56 }
 0x177   : > { %2059 = vmatpush3.bf16.msra.mxu0 %v2058_v1  ;;  %v1523_v1 = vld [vmem:[%s3242_s13 + $0x30] sm:$0xff] }
 0x178   : > { %2060 = vmatprep.subr.bf16.mxu0 %v2177_v56  ;;  %v2082_v3 = vpack.c.bf16 %v1524_v2, %v1523_v1 }
 0x179   : > { %2080 = vmatpush3.bf16.msra.mxu1 %v2079_v0 }
 0x17a   : > { %2081 = vmatprep.subr.bf16.mxu1 %v2177_v56 }
 0x17b   : > { %2062 = vmatpush3.bf16.msra.mxu0 %v2061_v4  ;;  %v1525_v4 = vld [vmem:[%s3242_s13 + $0x40] sm:$0xff] }
 0x17c   : > { %2063 = vmatprep.subr.bf16.mxu0 %v2177_v56  ;;  %v2085_v6 = vpack.c.bf16 %v1526_v5, %v1525_v4 }
 0x17d   : > { %2083 = vmatpush3.bf16.msra.mxu1 %v2082_v3 }
 0x17e   : > { %2084 = vmatprep.subr.bf16.mxu1 %v2177_v56 }
 0x17f   : > { %2065 = vmatpush3.bf16.msra.mxu0 %v2064_v8  ;;  %v1528_v8 = vld [vmem:[%s3242_s13 + $0x58] sm:$0xff] }
 0x180   : > { %2066 = vmatprep.subr.bf16.mxu0 %v2177_v56  ;;  %v2088_v9 = vpack.c.bf16 %v1528_v8, %v1527_v7 }
 0x181   : > { %2086 = vmatpush3.bf16.msra.mxu1 %v2085_v6 }
 0x182   : > { %2087 = vmatprep.subr.bf16.mxu1 %v2177_v56 }
 0x183   : > { %2068 = vmatpush3.bf16.msra.mxu0 %v2067_v10  ;;  %v1529_v10 = vld [vmem:[%s3242_s13 + $0x60] sm:$0xff] }
 0x184   : > { %2069 = vmatprep.subr.bf16.mxu0 %v2177_v56  ;;  %v2091_v13 = vpack.c.bf16 %v1530_v11, %v1529_v10 }
 0x185   : > { %2089 = vmatpush3.bf16.msra.mxu1 %v2088_v9 }
 0x186   : > { %2090 = vmatprep.subr.bf16.mxu1 %v2177_v56 }
 0x187   : > { %2071 = vmatpush3.bf16.msra.mxu0 %v2070_v14 }
 0x189   : > { %2092 = vmatpush3.bf16.msra.mxu1 %v2091_v13 }
 0x18a   : > { %2093 = vmatprep.subr.bf16.mxu1 %v2177_v56 }
 0x23d   : > { %v1265_v21 = vpop.f32.mrb[2].mxu0  ;;  %v1336_v22 = vpop.f32.mrb[2].mxu1 }
 0x23e   : > { %v1362_v24 = vadd.f32 %v1345_v18, %v1265_v21  ;;  %v1267_v25 = vpop.f32.mrb[3].mxu0  ;;  %v1338_v26 = vpop.f32.mrb[3].mxu1  ;;  %v1364_v34 = vadd.f32 %v1353_v17, %v1336_v22 }
 0x23f   : > { %v1363_v27 = vadd.f32 %v1349_v20, %v1267_v25  ;;  %v1365_v31 = vadd.f32 %v1357_v30, %v1338_v26  ;;  %v1531_v25 = vld [vmem:[%s3242_s13 + $0x70] sm:$0xff]  ;;  %v1532_v26 = vld [vmem:[%s3242_s13 + $0x78] sm:$0xff] }
 0x240   : > { %v1680_v28 = vmul.f32 -1.442695, %v1362_v24  ;;  %v2094_v56 = vpack.c.bf16 %v1532_v26, %v1531_v25 }
 0x241   : > { %v1681_v29 = vmul.f32 -1.442695, %v1363_v27  ;;  %v1682_v33 = vmul.f32 -1.442695, %v1365_v31 }
 0x242   : > { %2133 = vpow2.f32 %v1680_v28  ;;  %2095 = vmatpush3.bf16.msra.mxu1 %v2094_v56 }
 0x243   : > { %2135 = vpow2.f32 %v1681_v29 }
 0x244   : > { %2137 = vpow2.f32 %v1682_v33  ;;  %v2179_v33 = vmov 1.0  }
 0x245   : > { %2139 = vtanh.f32 %v1364_v34 }
 0x24c   : > { %v2134_v19 = vpop.eup %2133 }
 0x24d   : > { %v2136_v35 = vpop.eup %2135  ;;  %v1369_v36 = vadd.f32 1.0, %v2134_v19 }
 0x24e   : > { %v1375_v37 = vadd.f32 1.0, %v2136_v35  ;;  %v2138_v38 = vpop.eup %2137 }
 0x24f   : > { %2141 = vrcp.f32 %v1369_v36  ;;  %v2140_v39 = vpop.eup %2139  ;;  %v1382_v43 = vadd.f32 1.0, %v2138_v38  ;;  %v1608_v36 = vld [vmem:[%s2273_s23] sm:$0xff]  ;;  %v1612_v38 = vstv %s1611_s24 }
 0x250   : > { %2143 = vrcp.f32 %v1375_v37  ;;  %v1609_v37 = vstv %s1607_s22 }
 0x251   : > { %2145 = vrcp.f32 %v1382_v43 }
 0x259   : > { %v2142_v23 = vpop.eup %2141 }
 0x25a   : > { %v2144_v41 = vpop.eup %2143  ;;  %v1386_v42 = vmul.f32 %v2142_v23, %v2140_v39  ;;  %v1610_v39 = vmul.f32 %v1609_v37, %v1608_v36 }
 0x25b   : > { %v1385_v44 = vmul.f32 %v2144_v41, %v927_v40  ;;  %v2146_v32 = vpop.eup %2145 }
 0x25d   : > { %v1387_v16 = vadd.f32 %v1386_v42, %v1385_v44 }
 0x25f   : > { %1391 = vst [vmem:[#allocation3 + $0x8] sm:$0xff] %v1387_v16  ;;  %2147 = vtanh.f32 %v1387_v16 }
 0x269   : > { %v2148_v45 = vpop.eup %2147 }
 0x26a   : > { %v1389_v46 = vmul.f32 %v2148_v45, %v2146_v32 }
 0x26c   : > { %1390 = vst [vmem:[#allocation2 + $0x8] sm:$0xff] %v1389_v46  ;;  %1755 = vmatmul.mubr.f32.vlgmr.msra.gmra.mrb[4].mxu0 %v1389_v46 }
 0x33f   : > { %v1481_v48 = vpop.f32.mrb[4].mxu0 }
 0x340   : > { %v1482_v49 = vadd.f32 %v1683_v47, %v1481_v48  ;;  %v1756_v50 = vpop.f32.mrb[5].mxu0 }
 0x342   : > { %1485 = vmax.xlane.f32.xlu0 %v1482_v49 }
 0x3cf   : > { %v1486_v52 = vpop.xlane.xlu0 %1485 }
 0x3d0   : > { %vm1498_vm1 = vcmp.ge.f32.partialorder %v1482_v49, %v1486_v52  ;;  %v1487_v14 = vsub.f32 %v1482_v49, %v1486_v52 }
 0x3d1   : > { %v1499_v53 = vsel %vm1498_vm1, %v3164_v51, 128 }
 0x3d2   : > { %v1501_v54 = vshra.s32 %v1499_v53, 16  ;;  %v1488_v12 = vmul.f32 1.442695, %v1487_v14  ;;  %v1500_v18 = vand.u32 65535, %v1499_v53 }
 0x3d4   : > { %v1503_v55 = vcvt.s32.f32 %v1501_v54  ;;  %2149 = vpow2.f32 %v1488_v12  ;;  %v1502_v21 = vcvt.s32.f32 %v1500_v18 }
 0x3d6   : > { %1504 = vmin.xlane.f32.xlu0 %v1503_v55 }
 0x3de   : > { %v2150_v24 = vpop.eup %2149 }
 0x463   : > { %v1505_v20 = vpop.xlane.xlu0 %1504 }
 0x464   : > { %vm1506_vm2 = vcmp.eq.f32.partialorder %v1503_v55, %v1505_v20  ;;  %v1511_v27 = vcvt.f32.s32 %v1505_v20 }
 0x465   : > { %v1507_v22 = vsel %vm1506_vm2, %v1502_v21, inf }
 0x466   : > { %1508 = vmin.xlane.f32.xlu1 %v1507_v22  ;;  %v1512_v29 = vshll.u32 %v1511_v27, 16 }
 0x46a   : > { %1490 = vadd.xlane.f32.xlu1 %v2150_v24 }
 0x4f3   : > { %v1509_v28 = vpop.xlane.xlu1 %1508 }
 0x4f4   : > { %v1510_v30 = vcvt.f32.s32 %v1509_v28 }
 0x4f6   : > { %v1513_v31 = vadd.s32 %v1512_v29, %v1510_v30 }
 0x4f7   : > { %v1491_v17 = vpop.xlane.xlu1 %1490 }
 0x4f8   : > { %vm1514_vm3 = vcmp.eq.s32.totalorder %v3164_v51, %v1513_v31  ;;  %2151 = vlog2.f32 %v1491_v17 }
 0x4f9   : > { %1790 = vmatmul.mubr.msk.f32.vlgmr.msra.gmra.mrb[4].mxu1 %vm1514_vm3, %v2179_v33 }
 0x502   : > { %v2152_v34 = vpop.eup %2151 }
 0x503   : > { %v1493_v19 = vmul.f32 0.6931472, %v2152_v34 }
 0x505   : > { %v1494_v35 = vsub.f32 %v1487_v14, %v1493_v19 }
 0x507   : > { %1495 = vst [vmem:[%s2278_s26] sm:$0xff] %v1494_v35 }
 0x5cc   : > { %v1599_v40 = vpop.f32.mrb[4].mxu1 }
 0x5cd   : > { %v1613_v23 = vmul.f32 %v1612_v38, %v1599_v40  ;;  %v1791_v41 = vpop.f32.mrb[5].mxu1 }
 0x5cf   : > { %v1614_v42 = vadd.f32 %v1613_v23, %v1610_v39 }
 0x5d1   : > { %1615 = vst [vmem:[#allocation4] sm:$0xff] %v1614_v42 }
 0x5d2 PF: > { %s30_s18 = sadd.s32 1, %s2173_s18  }
 0x5d3   : > { %p27_p11 = scmp.ge.s32.totalorder %s30_s18, 9  }
 0x5d5   :  { %29 = sbr.rel (!%p27_p11) target bundleno = 16 (0x10), region = 108 }

</bundles_post_ra>
